<compile_context>
chip_gen: v5e
topology: v5e:2x2
jax: 0.10.0
libtpu: 0.0.40
codegen_flags: <defaults>
</compile_context>

<pallas_src>
import jax
import jax.numpy as jnp
from jax.experimental import pallas as pl
from jax.experimental.pallas import tpu as pltpu


# --------------------------------------------------------------------------- #
# Pallas kernel: the full 2-layer bidirectional GRU encoder in one launch
# --------------------------------------------------------------------------- #
def _encoder_gru_kernel(x_ref, h0_ref,
                        wih0_ref, whh0_ref, bx0_ref, bhn0_ref,
                        wih1_ref, whh1_ref, bx1_ref, bhn1_ref,
                        out_ref, hfin_ref, l0_ref):
    """
    x_ref    : (T*B, Din)      time-major first-layer input
    h0_ref   : (4, B, H)       initial hidden [l0_fwd, l0_bwd, l1_fwd, l1_bwd]
    wih{l}   : (2, Din_l, 3H)  per-direction W_ih^T, gate columns r|z|n
    whh{l}   : (2, H, 3H)      per-direction W_hh^T, gate columns r|z|n
    bx{l}    : (2, 1, 3H)      folded biases (b_ir+b_hr | b_iz+b_hz | b_in)
    bhn{l}   : (2, 1, H)       recurrent bias of the n gate
    out_ref  : (T*B, 2H)       layer-1 output, fwd cols [0:H], bwd cols [H:2H]
    hfin_ref : (4, B, H)       final hidden states
    l0_ref   : (T*B, 2H)       VMEM scratch holding the layer-0 output
    """
    TB = x_ref.shape[0]
    _, B, H = h0_ref.shape
    T = TB // B
    H2 = 2 * H

    def gru_step(h, gx_tb, whh_cat, b_hn):
        # One fused (B,H)@(H,3H) recurrent matmul on the serial chain.
        gh = jnp.dot(h, whh_cat, preferred_element_type=jnp.float32)   # (B, 3H)
        rz = jax.nn.sigmoid(gx_tb[:, :H2] + gh[:, :H2])
        r = rz[:, :H]
        z = rz[:, H:]
        n = jnp.tanh(gx_tb[:, H2:] + r * (gh[:, H2:] + b_hn))
        return (1.0 - z) * n + z * h

    def run_layer(x2d, h_f, h_b, wih_ref, whh_ref, bx_ref, bhn_ref,
                  store_f, store_b):
        # Hoisted input projection (off the recurrence critical path):
        # one (T*B, Din) @ (Din, 3H) matmul per direction, biases folded.
        gx_f = jnp.dot(x2d, wih_ref[0],
                       preferred_element_type=jnp.float32) + bx_ref[0]
        gx_b = jnp.dot(x2d, wih_ref[1],
                       preferred_element_type=jnp.float32) + bx_ref[1]
        whh_f, whh_b = whh_ref[0], whh_ref[1]
        bhn_f, bhn_b = bhn_ref[0], bhn_ref[1]
        # Interleave the two independent recurrences (two h carries) so their
        # MXU/EUP latencies overlap on a single TensorCore.
        for t in range(T):                      # T is small -> full unroll
            tb = T - 1 - t
            h_f = gru_step(h_f, gx_f[t * B:(t + 1) * B, :], whh_f, bhn_f)
            h_b = gru_step(h_b, gx_b[tb * B:(tb + 1) * B, :], whh_b, bhn_b)
            store_f(t, h_f)                     # per-step direct stores,
            store_b(tb, h_b)                    # natural time order
        return h_f, h_b

    # ---- layer 0: output kept on-chip in the VMEM scratch -------------------
    def store_l0_f(t, h):
        l0_ref[t * B:(t + 1) * B, 0:H] = h

    def store_l0_b(t, h):
        l0_ref[t * B:(t + 1) * B, H:H2] = h

    hf0, hb0 = run_layer(x_ref[...], h0_ref[0], h0_ref[1],
                         wih0_ref, whh0_ref, bx0_ref, bhn0_ref,
                         store_l0_f, store_l0_b)
    hfin_ref[0] = hf0
    hfin_ref[1] = hb0

    # ---- layer 1: consumes the pre-concatenated (T*B, 2H) scratch directly --
    def store_out_f(t, h):
        out_ref[t * B:(t + 1) * B, 0:H] = h

    def store_out_b(t, h):
        out_ref[t * B:(t + 1) * B, H:H2] = h

    hf1, hb1 = run_layer(l0_ref[...], h0_ref[2], h0_ref[3],
                         wih1_ref, whh1_ref, bx1_ref, bhn1_ref,
                         store_out_f, store_out_b)
    hfin_ref[2] = hf1
    hfin_ref[3] = hb1


# --------------------------------------------------------------------------- #
# Parameter init (PyTorch layout) + layout prep for the kernel
# --------------------------------------------------------------------------- #
def init_encoder_params(key, input_size, hidden_size, num_layers=2):
    """Deterministic init matching PyTorch GRU parameter shapes (uniform +-1/sqrt(H))."""
    params = {}
    bound = 1.0 / jnp.sqrt(jnp.float32(hidden_size))
    keys = jax.random.split(key, num_layers * 2 * 4)
    k = 0
    for layer in range(num_layers):
        in_dim = input_size if layer == 0 else 2 * hidden_size
        for dname in ("fwd", "bwd"):
            w_ih = jax.random.uniform(keys[k], (3 * hidden_size, in_dim),
                                      jnp.float32, -bound, bound); k += 1
            w_hh = jax.random.uniform(keys[k], (3 * hidden_size, hidden_size),
                                      jnp.float32, -bound, bound); k += 1
            b_ih = jax.random.uniform(keys[k], (3 * hidden_size,),
                                      jnp.float32, -bound, bound); k += 1
            b_hh = jax.random.uniform(keys[k], (3 * hidden_size,),
                                      jnp.float32, -bound, bound); k += 1
            params[f"l{layer}_{dname}"] = (w_ih, w_hh, b_ih, b_hh)
    return params


def _prep_layer_params(params, layer, H):
    """PyTorch-layout GRU weights -> fused kernel layout (gates concatenated)."""
    wih_l, whh_l, bx_l, bhn_l = [], [], [], []
    for dname in ("fwd", "bwd"):
        w_ih, w_hh, b_ih, b_hh = params[f"l{layer}_{dname}"]
        wih_l.append(w_ih.T)                       # (Din, 3H), cols r|z|n
        whh_l.append(w_hh.T)                       # (H, 3H),  cols r|z|n
        # fold b_hr / b_hz into the input-side bias; b_hn stays with W_hn h
        bx_l.append(jnp.concatenate(
            [b_ih[:2 * H] + b_hh[:2 * H], b_ih[2 * H:]]).reshape(1, 3 * H))
        bhn_l.append(b_hh[2 * H:].reshape(1, H))
    f32 = jnp.float32
    return (jnp.stack(wih_l, 0).astype(f32), jnp.stack(whh_l, 0).astype(f32),
            jnp.stack(bx_l, 0).astype(f32), jnp.stack(bhn_l, 0).astype(f32))


def encoder_forward(params, input_seq, hidden):
    """Encoder.forward: input_seq (B, T, D_in), hidden (4, B, H) ->
    (outputs (B, T, 2H), hidden_out (4, B, H)); same as nn.GRU(num_layers=2,
    bidirectional=True, batch_first=True)."""
    B, T, Din = input_seq.shape
    H = hidden.shape[-1]
    TB = T * B
    H2, H3 = 2 * H, 3 * H

    x = jnp.transpose(input_seq, (1, 0, 2)).reshape(TB, Din).astype(jnp.float32)
    h0 = hidden.astype(jnp.float32)

    wih0, whh0, bx0, bhn0 = _prep_layer_params(params, 0, H)
    wih1, whh1, bx1, bhn1 = _prep_layer_params(params, 1, H)

    out, hfin = pl.pallas_call(
        _encoder_gru_kernel,
        out_shape=(jax.ShapeDtypeStruct((TB, H2), jnp.float32),
                   jax.ShapeDtypeStruct((4, B, H), jnp.float32)),
        grid_spec=pltpu.PrefetchScalarGridSpec(
            num_scalar_prefetch=0,
            grid=(1,),
            in_specs=[
                pl.BlockSpec((TB, Din), lambda i: (0, 0)),         # x
                pl.BlockSpec((4, B, H), lambda i: (0, 0, 0)),      # h0
                pl.BlockSpec((2, Din, H3), lambda i: (0, 0, 0)),   # W_ih^T  L0
                pl.BlockSpec((2, H, H3), lambda i: (0, 0, 0)),     # W_hh^T  L0
                pl.BlockSpec((2, 1, H3), lambda i: (0, 0, 0)),     # bx      L0
                pl.BlockSpec((2, 1, H), lambda i: (0, 0, 0)),      # b_hn    L0
                pl.BlockSpec((2, H2, H3), lambda i: (0, 0, 0)),    # W_ih^T  L1
                pl.BlockSpec((2, H, H3), lambda i: (0, 0, 0)),     # W_hh^T  L1
                pl.BlockSpec((2, 1, H3), lambda i: (0, 0, 0)),     # bx      L1
                pl.BlockSpec((2, 1, H), lambda i: (0, 0, 0)),      # b_hn    L1
            ],
            out_specs=[
                pl.BlockSpec((TB, H2), lambda i: (0, 0)),          # outputs
                pl.BlockSpec((4, B, H), lambda i: (0, 0, 0)),      # final h
            ],
            scratch_shapes=[pltpu.VMEM((TB, H2), jnp.float32)],    # layer-0 out
        ),
        compiler_params=pltpu.CompilerParams(
            dimension_semantics=("arbitrary",)),
    )(x, h0, wih0, whh0, bx0, bhn0, wih1, whh1, bx1, bhn1)

    outputs = jnp.transpose(out.reshape(T, B, H2), (1, 0, 2))   # (B, T, 2H)
    return outputs, hfin


# ---------------- pure-JAX reference (self-consistency check) ---------------- #
def _gru_dir_ref(x_tbd, h0, w_ih, w_hh, b_ih, b_hh):
    H = h0.shape[-1]

    def step(h, x):
        gx = x @ w_ih.T + b_ih
        gh = h @ w_hh.T + b_hh
        r = jax.nn.sigmoid(gx[:, :H] + gh[:, :H])
        z = jax.nn.sigmoid(gx[:, H:2 * H] + gh[:, H:2 * H])
        n = jnp.tanh(gx[:, 2 * H:] + r * gh[:, 2 * H:])
        h_new = (1.0 - z) * n + z * h
        return h_new, h_new

    h_fin, outs = jax.lax.scan(step, h0, x_tbd)
    return outs, h_fin


def _encoder_ref(params, input_seq, hidden, num_layers=2):
    x = jnp.transpose(input_seq, (1, 0, 2))
    hid = []
    layer_in = x
    for layer in range(num_layers):
        of, hf = _gru_dir_ref(layer_in, hidden[2 * layer], *params[f"l{layer}_fwd"])
        ob_r, hb = _gru_dir_ref(layer_in[::-1], hidden[2 * layer + 1],
                                *params[f"l{layer}_bwd"])
        layer_in = jnp.concatenate([of, ob_r[::-1]], axis=-1)
        hid += [hf, hb]
    return jnp.transpose(layer_in, (1, 0, 2)), jnp.stack(hid, axis=0)


if __name__ == "__main__":
    B, T, INPUT_SIZE, HIDDEN_SIZE = 2, 8, 16, 32

    key = jax.random.PRNGKey(0)
    k_param, k_input = jax.random.split(key)

    params = init_encoder_params(k_param, INPUT_SIZE, HIDDEN_SIZE)
    input_seq = jax.random.normal(k_input, (B, T, INPUT_SIZE), jnp.float32)
    hidden0 = jnp.zeros((4, B, HIDDEN_SIZE), jnp.float32)   # Encoder.init_hidden

    fwd = jax.jit(encoder_forward)
    outputs, hidden = fwd(params, input_seq, hidden0)
    jax.block_until_ready((outputs, hidden))

    assert outputs.shape == (B, T, 2 * HIDDEN_SIZE)
    assert hidden.shape == (4, B, HIDDEN_SIZE)

    # self-consistency vs pure-JAX reference of the same GRU equations
    ref_out, ref_hid = _encoder_ref(params, input_seq, hidden0)
    assert jnp.allclose(outputs, ref_out, atol=1e-4, rtol=1e-4)
    assert jnp.allclose(hidden, ref_hid, atol=1e-4, rtol=1e-4)

    print("KERNEL_OK")
</pallas_src>

<mosaic_0001>
module attributes {stable_mosaic.version = 11 : i64} {
  func.func @_encoder_gru_kernel(%arg0: i32, %arg1: memref<16x16xf32, #tpu.memory_space<vmem>>, %arg2: memref<4x2x32xf32, #tpu.memory_space<vmem>>, %arg3: memref<2x16x96xf32, #tpu.memory_space<vmem>>, %arg4: memref<2x32x96xf32, #tpu.memory_space<vmem>>, %arg5: memref<2x1x96xf32, #tpu.memory_space<vmem>>, %arg6: memref<2x1x32xf32, #tpu.memory_space<vmem>>, %arg7: memref<2x64x96xf32, #tpu.memory_space<vmem>>, %arg8: memref<2x32x96xf32, #tpu.memory_space<vmem>>, %arg9: memref<2x1x96xf32, #tpu.memory_space<vmem>>, %arg10: memref<2x1x32xf32, #tpu.memory_space<vmem>>, %arg11: memref<16x64xf32, #tpu.memory_space<vmem>>, %arg12: memref<4x2x32xf32, #tpu.memory_space<vmem>>, %arg13: memref<16x64xf32, #tpu.memory_space<vmem>>) attributes {dimension_semantics = [#tpu.dimension_semantics<arbitrary>], iteration_bounds = array<i64: 1>, scalar_prefetch = 0 : i64, scratch_operands = 1 : i64, tpu.core_type = #tpu.core_type<tc>, window_params = [{pipeline_mode = #tpu.pipeline_mode<synchronous>, transform_indices = @transform_0, window_bounds = array<i64: 16, 16>}, {pipeline_mode = #tpu.pipeline_mode<synchronous>, transform_indices = @transform_1, window_bounds = array<i64: 4, 2, 32>}, {pipeline_mode = #tpu.pipeline_mode<synchronous>, transform_indices = @transform_2, window_bounds = array<i64: 2, 16, 96>}, {pipeline_mode = #tpu.pipeline_mode<synchronous>, transform_indices = @transform_3, window_bounds = array<i64: 2, 32, 96>}, {pipeline_mode = #tpu.pipeline_mode<synchronous>, transform_indices = @transform_4, window_bounds = array<i64: 2, 1, 96>}, {pipeline_mode = #tpu.pipeline_mode<synchronous>, transform_indices = @transform_5, window_bounds = array<i64: 2, 1, 32>}, {pipeline_mode = #tpu.pipeline_mode<synchronous>, transform_indices = @transform_6, window_bounds = array<i64: 2, 64, 96>}, {pipeline_mode = #tpu.pipeline_mode<synchronous>, transform_indices = @transform_7, window_bounds = array<i64: 2, 32, 96>}, {pipeline_mode = #tpu.pipeline_mode<synchronous>, transform_indices = @transform_8, window_bounds = array<i64: 2, 1, 96>}, {pipeline_mode = #tpu.pipeline_mode<synchronous>, transform_indices = @transform_9, window_bounds = array<i64: 2, 1, 32>}, {pipeline_mode = #tpu.pipeline_mode<synchronous>, transform_indices = @transform_10, window_bounds = array<i64: 16, 64>}, {pipeline_mode = #tpu.pipeline_mode<synchronous>, transform_indices = @transform_11, window_bounds = array<i64: 4, 2, 32>}]} {
    %c0 = arith.constant 0 : index
    %c0_0 = arith.constant 0 : index
    %0 = vector.load %arg1[%c0, %c0_0] : memref<16x16xf32, #tpu.memory_space<vmem>>, vector<16x16xf32>
    %c0_1 = arith.constant 0 : index
    %c0_2 = arith.constant 0 : index
    %c0_3 = arith.constant 0 : index
    %1 = vector.load %arg2[%c0_1, %c0_2, %c0_3] : memref<4x2x32xf32, #tpu.memory_space<vmem>>, vector<1x2x32xf32>
    %2 = vector.shape_cast %1 : vector<1x2x32xf32> to vector<2x32xf32>
    %c1 = arith.constant 1 : index
    %c0_4 = arith.constant 0 : index
    %c0_5 = arith.constant 0 : index
    %3 = vector.load %arg2[%c1, %c0_4, %c0_5] : memref<4x2x32xf32, #tpu.memory_space<vmem>>, vector<1x2x32xf32>
    %4 = vector.shape_cast %3 : vector<1x2x32xf32> to vector<2x32xf32>
    %c0_6 = arith.constant 0 : index
    %c0_7 = arith.constant 0 : index
    %c0_8 = arith.constant 0 : index
    %5 = vector.load %arg3[%c0_6, %c0_7, %c0_8] : memref<2x16x96xf32, #tpu.memory_space<vmem>>, vector<1x16x96xf32>
    %6 = vector.shape_cast %5 : vector<1x16x96xf32> to vector<16x96xf32>
    %cst = arith.constant dense<0.000000e+00> : vector<16x96xf32>
    %7 = tpu.matmul %0, %6, %cst {dimension_numbers = #tpu.dot_dimension_numbers<[1], [0], [0], [1], [0, 0, 1, 1], [], []>} : vector<16x16xf32>, vector<16x96xf32>, vector<16x96xf32> -> vector<16x96xf32>
    %c0_9 = arith.constant 0 : index
    %c0_10 = arith.constant 0 : index
    %c0_11 = arith.constant 0 : index
    %8 = vector.load %arg5[%c0_9, %c0_10, %c0_11] : memref<2x1x96xf32, #tpu.memory_space<vmem>>, vector<1x1x96xf32>
    %9 = vector.shape_cast %8 : vector<1x1x96xf32> to vector<1x96xf32>
    %10 = vector.broadcast %9 : vector<1x96xf32> to vector<16x96xf32>
    %11 = arith.addf %7, %10 : vector<16x96xf32>
    %c1_12 = arith.constant 1 : index
    %c0_13 = arith.constant 0 : index
    %c0_14 = arith.constant 0 : index
    %12 = vector.load %arg3[%c1_12, %c0_13, %c0_14] : memref<2x16x96xf32, #tpu.memory_space<vmem>>, vector<1x16x96xf32>
    %13 = vector.shape_cast %12 : vector<1x16x96xf32> to vector<16x96xf32>
    %cst_15 = arith.constant dense<0.000000e+00> : vector<16x96xf32>
    %14 = tpu.matmul %0, %13, %cst_15 {dimension_numbers = #tpu.dot_dimension_numbers<[1], [0], [0], [1], [0, 0, 1, 1], [], []>} : vector<16x16xf32>, vector<16x96xf32>, vector<16x96xf32> -> vector<16x96xf32>
    %c1_16 = arith.constant 1 : index
    %c0_17 = arith.constant 0 : index
    %c0_18 = arith.constant 0 : index
    %15 = vector.load %arg5[%c1_16, %c0_17, %c0_18] : memref<2x1x96xf32, #tpu.memory_space<vmem>>, vector<1x1x96xf32>
    %16 = vector.shape_cast %15 : vector<1x1x96xf32> to vector<1x96xf32>
    %17 = vector.broadcast %16 : vector<1x96xf32> to vector<16x96xf32>
    %18 = arith.addf %14, %17 : vector<16x96xf32>
    %c0_19 = arith.constant 0 : index
    %c0_20 = arith.constant 0 : index
    %c0_21 = arith.constant 0 : index
    %19 = vector.load %arg4[%c0_19, %c0_20, %c0_21] : memref<2x32x96xf32, #tpu.memory_space<vmem>>, vector<1x32x96xf32>
    %20 = vector.shape_cast %19 : vector<1x32x96xf32> to vector<32x96xf32>
    %c1_22 = arith.constant 1 : index
    %c0_23 = arith.constant 0 : index
    %c0_24 = arith.constant 0 : index
    %21 = vector.load %arg4[%c1_22, %c0_23, %c0_24] : memref<2x32x96xf32, #tpu.memory_space<vmem>>, vector<1x32x96xf32>
    %22 = vector.shape_cast %21 : vector<1x32x96xf32> to vector<32x96xf32>
    %c0_25 = arith.constant 0 : index
    %c0_26 = arith.constant 0 : index
    %c0_27 = arith.constant 0 : index
    %23 = vector.load %arg6[%c0_25, %c0_26, %c0_27] : memref<2x1x32xf32, #tpu.memory_space<vmem>>, vector<1x1x32xf32>
    %24 = vector.shape_cast %23 : vector<1x1x32xf32> to vector<1x32xf32>
    %c1_28 = arith.constant 1 : index
    %c0_29 = arith.constant 0 : index
    %c0_30 = arith.constant 0 : index
    %25 = vector.load %arg6[%c1_28, %c0_29, %c0_30] : memref<2x1x32xf32, #tpu.memory_space<vmem>>, vector<1x1x32xf32>
    %26 = vector.shape_cast %25 : vector<1x1x32xf32> to vector<1x32xf32>
    %27 = vector.extract_strided_slice %11 {offsets = [0, 0], sizes = [2, 96], strides = [1, 1]} : vector<16x96xf32> to vector<2x96xf32>
    %cst_31 = arith.constant dense<0.000000e+00> : vector<2x96xf32>
    %28 = tpu.matmul %2, %20, %cst_31 {dimension_numbers = #tpu.dot_dimension_numbers<[1], [0], [0], [1], [0, 0, 1, 1], [], []>} : vector<2x32xf32>, vector<32x96xf32>, vector<2x96xf32> -> vector<2x96xf32>
    %29 = vector.extract_strided_slice %27 {offsets = [0, 0], sizes = [2, 64], strides = [1, 1]} : vector<2x96xf32> to vector<2x64xf32>
    %30 = vector.extract_strided_slice %28 {offsets = [0, 0], sizes = [2, 64], strides = [1, 1]} : vector<2x96xf32> to vector<2x64xf32>
    %31 = arith.addf %29, %30 : vector<2x64xf32>
    %32 = arith.negf %31 : vector<2x64xf32>
    %33 = math.exp %32 : vector<2x64xf32>
    %cst_32 = arith.constant 1.000000e+00 : f32
    %34 = vector.broadcast %cst_32 : f32 to vector<2x64xf32>
    %35 = arith.addf %34, %33 : vector<2x64xf32>
    %36 = arith.divf %34, %35 : vector<2x64xf32>
    %37 = vector.extract_strided_slice %36 {offsets = [0, 0], sizes = [2, 32], strides = [1, 1]} : vector<2x64xf32> to vector<2x32xf32>
    %38 = vector.extract_strided_slice %36 {offsets = [0, 32], sizes = [2, 32], strides = [1, 1]} : vector<2x64xf32> to vector<2x32xf32>
    %39 = vector.extract_strided_slice %27 {offsets = [0, 64], sizes = [2, 32], strides = [1, 1]} : vector<2x96xf32> to vector<2x32xf32>
    %40 = vector.extract_strided_slice %28 {offsets = [0, 64], sizes = [2, 32], strides = [1, 1]} : vector<2x96xf32> to vector<2x32xf32>
    %41 = vector.broadcast %24 : vector<1x32xf32> to vector<2x32xf32>
    %42 = arith.addf %40, %41 : vector<2x32xf32>
    %43 = arith.mulf %37, %42 : vector<2x32xf32>
    %44 = arith.addf %39, %43 : vector<2x32xf32>
    %45 = math.tanh %44 : vector<2x32xf32>
    %cst_33 = arith.constant 1.000000e+00 : f32
    %46 = vector.broadcast %cst_33 : f32 to vector<2x32xf32>
    %47 = arith.subf %46, %38 : vector<2x32xf32>
    %48 = arith.mulf %47, %45 : vector<2x32xf32>
    %49 = arith.mulf %38, %2 : vector<2x32xf32>
    %50 = arith.addf %48, %49 : vector<2x32xf32>
    %51 = vector.extract_strided_slice %18 {offsets = [14, 0], sizes = [2, 96], strides = [1, 1]} : vector<16x96xf32> to vector<2x96xf32>
    %cst_34 = arith.constant dense<0.000000e+00> : vector<2x96xf32>
    %52 = tpu.matmul %4, %22, %cst_34 {dimension_numbers = #tpu.dot_dimension_numbers<[1], [0], [0], [1], [0, 0, 1, 1], [], []>} : vector<2x32xf32>, vector<32x96xf32>, vector<2x96xf32> -> vector<2x96xf32>
    %53 = vector.extract_strided_slice %51 {offsets = [0, 0], sizes = [2, 64], strides = [1, 1]} : vector<2x96xf32> to vector<2x64xf32>
    %54 = vector.extract_strided_slice %52 {offsets = [0, 0], sizes = [2, 64], strides = [1, 1]} : vector<2x96xf32> to vector<2x64xf32>
    %55 = arith.addf %53, %54 : vector<2x64xf32>
    %56 = arith.negf %55 : vector<2x64xf32>
    %57 = math.exp %56 : vector<2x64xf32>
    %cst_35 = arith.constant 1.000000e+00 : f32
    %58 = vector.broadcast %cst_35 : f32 to vector<2x64xf32>
    %59 = arith.addf %58, %57 : vector<2x64xf32>
    %60 = arith.divf %58, %59 : vector<2x64xf32>
    %61 = vector.extract_strided_slice %60 {offsets = [0, 0], sizes = [2, 32], strides = [1, 1]} : vector<2x64xf32> to vector<2x32xf32>
    %62 = vector.extract_strided_slice %60 {offsets = [0, 32], sizes = [2, 32], strides = [1, 1]} : vector<2x64xf32> to vector<2x32xf32>
    %63 = vector.extract_strided_slice %51 {offsets = [0, 64], sizes = [2, 32], strides = [1, 1]} : vector<2x96xf32> to vector<2x32xf32>
    %64 = vector.extract_strided_slice %52 {offsets = [0, 64], sizes = [2, 32], strides = [1, 1]} : vector<2x96xf32> to vector<2x32xf32>
    %65 = vector.broadcast %26 : vector<1x32xf32> to vector<2x32xf32>
    %66 = arith.addf %64, %65 : vector<2x32xf32>
    %67 = arith.mulf %61, %66 : vector<2x32xf32>
    %68 = arith.addf %63, %67 : vector<2x32xf32>
    %69 = math.tanh %68 : vector<2x32xf32>
    %cst_36 = arith.constant 1.000000e+00 : f32
    %70 = vector.broadcast %cst_36 : f32 to vector<2x32xf32>
    %71 = arith.subf %70, %62 : vector<2x32xf32>
    %72 = arith.mulf %71, %69 : vector<2x32xf32>
    %73 = arith.mulf %62, %4 : vector<2x32xf32>
    %74 = arith.addf %72, %73 : vector<2x32xf32>
    %c0_37 = arith.constant 0 : index
    %c0_38 = arith.constant 0 : index
    %75 = vector.load %arg13[%c0_37, %c0_38] : memref<16x64xf32, #tpu.memory_space<vmem>>, vector<2x32xf32>
    tpu.vector_store %arg13[%c0_37, %c0_38], %50 {strides = array<i32>} : memref<16x64xf32, #tpu.memory_space<vmem>>, vector<2x32xf32>,
    %c14 = arith.constant 14 : index
    %c32 = arith.constant 32 : index
    %76 = vector.load %arg13[%c14, %c32] : memref<16x64xf32, #tpu.memory_space<vmem>>, vector<2x32xf32>
    tpu.vector_store %arg13[%c14, %c32], %74 {strides = array<i32>} : memref<16x64xf32, #tpu.memory_space<vmem>>, vector<2x32xf32>,
    %77 = vector.extract_strided_slice %11 {offsets = [2, 0], sizes = [2, 96], strides = [1, 1]} : vector<16x96xf32> to vector<2x96xf32>
    %cst_39 = arith.constant dense<0.000000e+00> : vector<2x96xf32>
    %78 = tpu.matmul %50, %20, %cst_39 {dimension_numbers = #tpu.dot_dimension_numbers<[1], [0], [0], [1], [0, 0, 1, 1], [], []>} : vector<2x32xf32>, vector<32x96xf32>, vector<2x96xf32> -> vector<2x96xf32>
    %79 = vector.extract_strided_slice %77 {offsets = [0, 0], sizes = [2, 64], strides = [1, 1]} : vector<2x96xf32> to vector<2x64xf32>
    %80 = vector.extract_strided_slice %78 {offsets = [0, 0], sizes = [2, 64], strides = [1, 1]} : vector<2x96xf32> to vector<2x64xf32>
    %81 = arith.addf %79, %80 : vector<2x64xf32>
    %82 = arith.negf %81 : vector<2x64xf32>
    %83 = math.exp %82 : vector<2x64xf32>
    %cst_40 = arith.constant 1.000000e+00 : f32
    %84 = vector.broadcast %cst_40 : f32 to vector<2x64xf32>
    %85 = arith.addf %84, %83 : vector<2x64xf32>
    %86 = arith.divf %84, %85 : vector<2x64xf32>
    %87 = vector.extract_strided_slice %86 {offsets = [0, 0], sizes = [2, 32], strides = [1, 1]} : vector<2x64xf32> to vector<2x32xf32>
    %88 = vector.extract_strided_slice %86 {offsets = [0, 32], sizes = [2, 32], strides = [1, 1]} : vector<2x64xf32> to vector<2x32xf32>
    %89 = vector.extract_strided_slice %77 {offsets = [0, 64], sizes = [2, 32], strides = [1, 1]} : vector<2x96xf32> to vector<2x32xf32>
    %90 = vector.extract_strided_slice %78 {offsets = [0, 64], sizes = [2, 32], strides = [1, 1]} : vector<2x96xf32> to vector<2x32xf32>
    %91 = vector.broadcast %24 : vector<1x32xf32> to vector<2x32xf32>
    %92 = arith.addf %90, %91 : vector<2x32xf32>
    %93 = arith.mulf %87, %92 : vector<2x32xf32>
    %94 = arith.addf %89, %93 : vector<2x32xf32>
    %95 = math.tanh %94 : vector<2x32xf32>
    %cst_41 = arith.constant 1.000000e+00 : f32
    %96 = vector.broadcast %cst_41 : f32 to vector<2x32xf32>
    %97 = arith.subf %96, %88 : vector<2x32xf32>
    %98 = arith.mulf %97, %95 : vector<2x32xf32>
    %99 = arith.mulf %88, %50 : vector<2x32xf32>
    %100 = arith.addf %98, %99 : vector<2x32xf32>
    %101 = vector.extract_strided_slice %18 {offsets = [12, 0], sizes = [2, 96], strides = [1, 1]} : vector<16x96xf32> to vector<2x96xf32>
    %cst_42 = arith.constant dense<0.000000e+00> : vector<2x96xf32>
    %102 = tpu.matmul %74, %22, %cst_42 {dimension_numbers = #tpu.dot_dimension_numbers<[1], [0], [0], [1], [0, 0, 1, 1], [], []>} : vector<2x32xf32>, vector<32x96xf32>, vector<2x96xf32> -> vector<2x96xf32>
    %103 = vector.extract_strided_slice %101 {offsets = [0, 0], sizes = [2, 64], strides = [1, 1]} : vector<2x96xf32> to vector<2x64xf32>
    %104 = vector.extract_strided_slice %102 {offsets = [0, 0], sizes = [2, 64], strides = [1, 1]} : vector<2x96xf32> to vector<2x64xf32>
    %105 = arith.addf %103, %104 : vector<2x64xf32>
    %106 = arith.negf %105 : vector<2x64xf32>
    %107 = math.exp %106 : vector<2x64xf32>
    %cst_43 = arith.constant 1.000000e+00 : f32
    %108 = vector.broadcast %cst_43 : f32 to vector<2x64xf32>
    %109 = arith.addf %108, %107 : vector<2x64xf32>
    %110 = arith.divf %108, %109 : vector<2x64xf32>
    %111 = vector.extract_strided_slice %110 {offsets = [0, 0], sizes = [2, 32], strides = [1, 1]} : vector<2x64xf32> to vector<2x32xf32>
    %112 = vector.extract_strided_slice %110 {offsets = [0, 32], sizes = [2, 32], strides = [1, 1]} : vector<2x64xf32> to vector<2x32xf32>
    %113 = vector.extract_strided_slice %101 {offsets = [0, 64], sizes = [2, 32], strides = [1, 1]} : vector<2x96xf32> to vector<2x32xf32>
    %114 = vector.extract_strided_slice %102 {offsets = [0, 64], sizes = [2, 32], strides = [1, 1]} : vector<2x96xf32> to vector<2x32xf32>
    %115 = vector.broadcast %26 : vector<1x32xf32> to vector<2x32xf32>
    %116 = arith.addf %114, %115 : vector<2x32xf32>
    %117 = arith.mulf %111, %116 : vector<2x32xf32>
    %118 = arith.addf %113, %117 : vector<2x32xf32>
    %119 = math.tanh %118 : vector<2x32xf32>
    %cst_44 = arith.constant 1.000000e+00 : f32
    %120 = vector.broadcast %cst_44 : f32 to vector<2x32xf32>
    %121 = arith.subf %120, %112 : vector<2x32xf32>
    %122 = arith.mulf %121, %119 : vector<2x32xf32>
    %123 = arith.mulf %112, %74 : vector<2x32xf32>
    %124 = arith.addf %122, %123 : vector<2x32xf32>
    %c2 = arith.constant 2 : index
    %c0_45 = arith.constant 0 : index
    %125 = vector.load %arg13[%c2, %c0_45] : memref<16x64xf32, #tpu.memory_space<vmem>>, vector<2x32xf32>
    tpu.vector_store %arg13[%c2, %c0_45], %100 {strides = array<i32>} : memref<16x64xf32, #tpu.memory_space<vmem>>, vector<2x32xf32>,
    %c12 = arith.constant 12 : index
    %c32_46 = arith.constant 32 : index
    %126 = vector.load %arg13[%c12, %c32_46] : memref<16x64xf32, #tpu.memory_space<vmem>>, vector<2x32xf32>
    tpu.vector_store %arg13[%c12, %c32_46], %124 {strides = array<i32>} : memref<16x64xf32, #tpu.memory_space<vmem>>, vector<2x32xf32>,
    %127 = vector.extract_strided_slice %11 {offsets = [4, 0], sizes = [2, 96], strides = [1, 1]} : vector<16x96xf32> to vector<2x96xf32>
    %cst_47 = arith.constant dense<0.000000e+00> : vector<2x96xf32>
    %128 = tpu.matmul %100, %20, %cst_47 {dimension_numbers = #tpu.dot_dimension_numbers<[1], [0], [0], [1], [0, 0, 1, 1], [], []>} : vector<2x32xf32>, vector<32x96xf32>, vector<2x96xf32> -> vector<2x96xf32>
    %129 = vector.extract_strided_slice %127 {offsets = [0, 0], sizes = [2, 64], strides = [1, 1]} : vector<2x96xf32> to vector<2x64xf32>
    %130 = vector.extract_strided_slice %128 {offsets = [0, 0], sizes = [2, 64], strides = [1, 1]} : vector<2x96xf32> to vector<2x64xf32>
    %131 = arith.addf %129, %130 : vector<2x64xf32>
    %132 = arith.negf %131 : vector<2x64xf32>
    %133 = math.exp %132 : vector<2x64xf32>
    %cst_48 = arith.constant 1.000000e+00 : f32
    %134 = vector.broadcast %cst_48 : f32 to vector<2x64xf32>
    %135 = arith.addf %134, %133 : vector<2x64xf32>
    %136 = arith.divf %134, %135 : vector<2x64xf32>
    %137 = vector.extract_strided_slice %136 {offsets = [0, 0], sizes = [2, 32], strides = [1, 1]} : vector<2x64xf32> to vector<2x32xf32>
    %138 = vector.extract_strided_slice %136 {offsets = [0, 32], sizes = [2, 32], strides = [1, 1]} : vector<2x64xf32> to vector<2x32xf32>
    %139 = vector.extract_strided_slice %127 {offsets = [0, 64], sizes = [2, 32], strides = [1, 1]} : vector<2x96xf32> to vector<2x32xf32>
    %140 = vector.extract_strided_slice %128 {offsets = [0, 64], sizes = [2, 32], strides = [1, 1]} : vector<2x96xf32> to vector<2x32xf32>
    %141 = vector.broadcast %24 : vector<1x32xf32> to vector<2x32xf32>
    %142 = arith.addf %140, %141 : vector<2x32xf32>
    %143 = arith.mulf %137, %142 : vector<2x32xf32>
    %144 = arith.addf %139, %143 : vector<2x32xf32>
    %145 = math.tanh %144 : vector<2x32xf32>
    %cst_49 = arith.constant 1.000000e+00 : f32
    %146 = vector.broadcast %cst_49 : f32 to vector<2x32xf32>
    %147 = arith.subf %146, %138 : vector<2x32xf32>
    %148 = arith.mulf %147, %145 : vector<2x32xf32>
    %149 = arith.mulf %138, %100 : vector<2x32xf32>
    %150 = arith.addf %148, %149 : vector<2x32xf32>
    %151 = vector.extract_strided_slice %18 {offsets = [10, 0], sizes = [2, 96], strides = [1, 1]} : vector<16x96xf32> to vector<2x96xf32>
    %cst_50 = arith.constant dense<0.000000e+00> : vector<2x96xf32>
    %152 = tpu.matmul %124, %22, %cst_50 {dimension_numbers = #tpu.dot_dimension_numbers<[1], [0], [0], [1], [0, 0, 1, 1], [], []>} : vector<2x32xf32>, vector<32x96xf32>, vector<2x96xf32> -> vector<2x96xf32>
    %153 = vector.extract_strided_slice %151 {offsets = [0, 0], sizes = [2, 64], strides = [1, 1]} : vector<2x96xf32> to vector<2x64xf32>
    %154 = vector.extract_strided_slice %152 {offsets = [0, 0], sizes = [2, 64], strides = [1, 1]} : vector<2x96xf32> to vector<2x64xf32>
    %155 = arith.addf %153, %154 : vector<2x64xf32>
    %156 = arith.negf %155 : vector<2x64xf32>
    %157 = math.exp %156 : vector<2x64xf32>
    %cst_51 = arith.constant 1.000000e+00 : f32
    %158 = vector.broadcast %cst_51 : f32 to vector<2x64xf32>
    %159 = arith.addf %158, %157 : vector<2x64xf32>
    %160 = arith.divf %158, %159 : vector<2x64xf32>
    %161 = vector.extract_strided_slice %160 {offsets = [0, 0], sizes = [2, 32], strides = [1, 1]} : vector<2x64xf32> to vector<2x32xf32>
    %162 = vector.extract_strided_slice %160 {offsets = [0, 32], sizes = [2, 32], strides = [1, 1]} : vector<2x64xf32> to vector<2x32xf32>
    %163 = vector.extract_strided_slice %151 {offsets = [0, 64], sizes = [2, 32], strides = [1, 1]} : vector<2x96xf32> to vector<2x32xf32>
    %164 = vector.extract_strided_slice %152 {offsets = [0, 64], sizes = [2, 32], strides = [1, 1]} : vector<2x96xf32> to vector<2x32xf32>
    %165 = vector.broadcast %26 : vector<1x32xf32> to vector<2x32xf32>
    %166 = arith.addf %164, %165 : vector<2x32xf32>
    %167 = arith.mulf %161, %166 : vector<2x32xf32>
    %168 = arith.addf %163, %167 : vector<2x32xf32>
    %169 = math.tanh %168 : vector<2x32xf32>
    %cst_52 = arith.constant 1.000000e+00 : f32
    %170 = vector.broadcast %cst_52 : f32 to vector<2x32xf32>
    %171 = arith.subf %170, %162 : vector<2x32xf32>
    %172 = arith.mulf %171, %169 : vector<2x32xf32>
    %173 = arith.mulf %162, %124 : vector<2x32xf32>
    %174 = arith.addf %172, %173 : vector<2x32xf32>
    %c4 = arith.constant 4 : index
    %c0_53 = arith.constant 0 : index
    %175 = vector.load %arg13[%c4, %c0_53] : memref<16x64xf32, #tpu.memory_space<vmem>>, vector<2x32xf32>
    tpu.vector_store %arg13[%c4, %c0_53], %150 {strides = array<i32>} : memref<16x64xf32, #tpu.memory_space<vmem>>, vector<2x32xf32>,
    %c10 = arith.constant 10 : index
    %c32_54 = arith.constant 32 : index
    %176 = vector.load %arg13[%c10, %c32_54] : memref<16x64xf32, #tpu.memory_space<vmem>>, vector<2x32xf32>
    tpu.vector_store %arg13[%c10, %c32_54], %174 {strides = array<i32>} : memref<16x64xf32, #tpu.memory_space<vmem>>, vector<2x32xf32>,
    %177 = vector.extract_strided_slice %11 {offsets = [6, 0], sizes = [2, 96], strides = [1, 1]} : vector<16x96xf32> to vector<2x96xf32>
    %cst_55 = arith.constant dense<0.000000e+00> : vector<2x96xf32>
    %178 = tpu.matmul %150, %20, %cst_55 {dimension_numbers = #tpu.dot_dimension_numbers<[1], [0], [0], [1], [0, 0, 1, 1], [], []>} : vector<2x32xf32>, vector<32x96xf32>, vector<2x96xf32> -> vector<2x96xf32>
    %179 = vector.extract_strided_slice %177 {offsets = [0, 0], sizes = [2, 64], strides = [1, 1]} : vector<2x96xf32> to vector<2x64xf32>
    %180 = vector.extract_strided_slice %178 {offsets = [0, 0], sizes = [2, 64], strides = [1, 1]} : vector<2x96xf32> to vector<2x64xf32>
    %181 = arith.addf %179, %180 : vector<2x64xf32>
    %182 = arith.negf %181 : vector<2x64xf32>
    %183 = math.exp %182 : vector<2x64xf32>
    %cst_56 = arith.constant 1.000000e+00 : f32
    %184 = vector.broadcast %cst_56 : f32 to vector<2x64xf32>
    %185 = arith.addf %184, %183 : vector<2x64xf32>
    %186 = arith.divf %184, %185 : vector<2x64xf32>
    %187 = vector.extract_strided_slice %186 {offsets = [0, 0], sizes = [2, 32], strides = [1, 1]} : vector<2x64xf32> to vector<2x32xf32>
    %188 = vector.extract_strided_slice %186 {offsets = [0, 32], sizes = [2, 32], strides = [1, 1]} : vector<2x64xf32> to vector<2x32xf32>
    %189 = vector.extract_strided_slice %177 {offsets = [0, 64], sizes = [2, 32], strides = [1, 1]} : vector<2x96xf32> to vector<2x32xf32>
    %190 = vector.extract_strided_slice %178 {offsets = [0, 64], sizes = [2, 32], strides = [1, 1]} : vector<2x96xf32> to vector<2x32xf32>
    %191 = vector.broadcast %24 : vector<1x32xf32> to vector<2x32xf32>
    %192 = arith.addf %190, %191 : vector<2x32xf32>
    %193 = arith.mulf %187, %192 : vector<2x32xf32>
    %194 = arith.addf %189, %193 : vector<2x32xf32>
    %195 = math.tanh %194 : vector<2x32xf32>
    %cst_57 = arith.constant 1.000000e+00 : f32
    %196 = vector.broadcast %cst_57 : f32 to vector<2x32xf32>
    %197 = arith.subf %196, %188 : vector<2x32xf32>
    %198 = arith.mulf %197, %195 : vector<2x32xf32>
    %199 = arith.mulf %188, %150 : vector<2x32xf32>
    %200 = arith.addf %198, %199 : vector<2x32xf32>
    %201 = vector.extract_strided_slice %18 {offsets = [8, 0], sizes = [2, 96], strides = [1, 1]} : vector<16x96xf32> to vector<2x96xf32>
    %cst_58 = arith.constant dense<0.000000e+00> : vector<2x96xf32>
    %202 = tpu.matmul %174, %22, %cst_58 {dimension_numbers = #tpu.dot_dimension_numbers<[1], [0], [0], [1], [0, 0, 1, 1], [], []>} : vector<2x32xf32>, vector<32x96xf32>, vector<2x96xf32> -> vector<2x96xf32>
    %203 = vector.extract_strided_slice %201 {offsets = [0, 0], sizes = [2, 64], strides = [1, 1]} : vector<2x96xf32> to vector<2x64xf32>
    %204 = vector.extract_strided_slice %202 {offsets = [0, 0], sizes = [2, 64], strides = [1, 1]} : vector<2x96xf32> to vector<2x64xf32>
    %205 = arith.addf %203, %204 : vector<2x64xf32>
    %206 = arith.negf %205 : vector<2x64xf32>
    %207 = math.exp %206 : vector<2x64xf32>
    %cst_59 = arith.constant 1.000000e+00 : f32
    %208 = vector.broadcast %cst_59 : f32 to vector<2x64xf32>
    %209 = arith.addf %208, %207 : vector<2x64xf32>
    %210 = arith.divf %208, %209 : vector<2x64xf32>
    %211 = vector.extract_strided_slice %210 {offsets = [0, 0], sizes = [2, 32], strides = [1, 1]} : vector<2x64xf32> to vector<2x32xf32>
    %212 = vector.extract_strided_slice %210 {offsets = [0, 32], sizes = [2, 32], strides = [1, 1]} : vector<2x64xf32> to vector<2x32xf32>
    %213 = vector.extract_strided_slice %201 {offsets = [0, 64], sizes = [2, 32], strides = [1, 1]} : vector<2x96xf32> to vector<2x32xf32>
    %214 = vector.extract_strided_slice %202 {offsets = [0, 64], sizes = [2, 32], strides = [1, 1]} : vector<2x96xf32> to vector<2x32xf32>
    %215 = vector.broadcast %26 : vector<1x32xf32> to vector<2x32xf32>
    %216 = arith.addf %214, %215 : vector<2x32xf32>
    %217 = arith.mulf %211, %216 : vector<2x32xf32>
    %218 = arith.addf %213, %217 : vector<2x32xf32>
    %219 = math.tanh %218 : vector<2x32xf32>
    %cst_60 = arith.constant 1.000000e+00 : f32
    %220 = vector.broadcast %cst_60 : f32 to vector<2x32xf32>
    %221 = arith.subf %220, %212 : vector<2x32xf32>
    %222 = arith.mulf %221, %219 : vector<2x32xf32>
    %223 = arith.mulf %212, %174 : vector<2x32xf32>
    %224 = arith.addf %222, %223 : vector<2x32xf32>
    %c6 = arith.constant 6 : index
    %c0_61 = arith.constant 0 : index
    %225 = vector.load %arg13[%c6, %c0_61] : memref<16x64xf32, #tpu.memory_space<vmem>>, vector<2x32xf32>
    tpu.vector_store %arg13[%c6, %c0_61], %200 {strides = array<i32>} : memref<16x64xf32, #tpu.memory_space<vmem>>, vector<2x32xf32>,
    %c8 = arith.constant 8 : index
    %c32_62 = arith.constant 32 : index
    %226 = vector.load %arg13[%c8, %c32_62] : memref<16x64xf32, #tpu.memory_space<vmem>>, vector<2x32xf32>
    tpu.vector_store %arg13[%c8, %c32_62], %224 {strides = array<i32>} : memref<16x64xf32, #tpu.memory_space<vmem>>, vector<2x32xf32>,
    %227 = vector.extract_strided_slice %11 {offsets = [8, 0], sizes = [2, 96], strides = [1, 1]} : vector<16x96xf32> to vector<2x96xf32>
    %cst_63 = arith.constant dense<0.000000e+00> : vector<2x96xf32>
    %228 = tpu.matmul %200, %20, %cst_63 {dimension_numbers = #tpu.dot_dimension_numbers<[1], [0], [0], [1], [0, 0, 1, 1], [], []>} : vector<2x32xf32>, vector<32x96xf32>, vector<2x96xf32> -> vector<2x96xf32>
    %229 = vector.extract_strided_slice %227 {offsets = [0, 0], sizes = [2, 64], strides = [1, 1]} : vector<2x96xf32> to vector<2x64xf32>
    %230 = vector.extract_strided_slice %228 {offsets = [0, 0], sizes = [2, 64], strides = [1, 1]} : vector<2x96xf32> to vector<2x64xf32>
    %231 = arith.addf %229, %230 : vector<2x64xf32>
    %232 = arith.negf %231 : vector<2x64xf32>
    %233 = math.exp %232 : vector<2x64xf32>
    %cst_64 = arith.constant 1.000000e+00 : f32
    %234 = vector.broadcast %cst_64 : f32 to vector<2x64xf32>
    %235 = arith.addf %234, %233 : vector<2x64xf32>
    %236 = arith.divf %234, %235 : vector<2x64xf32>
    %237 = vector.extract_strided_slice %236 {offsets = [0, 0], sizes = [2, 32], strides = [1, 1]} : vector<2x64xf32> to vector<2x32xf32>
    %238 = vector.extract_strided_slice %236 {offsets = [0, 32], sizes = [2, 32], strides = [1, 1]} : vector<2x64xf32> to vector<2x32xf32>
    %239 = vector.extract_strided_slice %227 {offsets = [0, 64], sizes = [2, 32], strides = [1, 1]} : vector<2x96xf32> to vector<2x32xf32>
    %240 = vector.extract_strided_slice %228 {offsets = [0, 64], sizes = [2, 32], strides = [1, 1]} : vector<2x96xf32> to vector<2x32xf32>
    %241 = vector.broadcast %24 : vector<1x32xf32> to vector<2x32xf32>
    %242 = arith.addf %240, %241 : vector<2x32xf32>
    %243 = arith.mulf %237, %242 : vector<2x32xf32>
    %244 = arith.addf %239, %243 : vector<2x32xf32>
    %245 = math.tanh %244 : vector<2x32xf32>
    %cst_65 = arith.constant 1.000000e+00 : f32
    %246 = vector.broadcast %cst_65 : f32 to vector<2x32xf32>
    %247 = arith.subf %246, %238 : vector<2x32xf32>
    %248 = arith.mulf %247, %245 : vector<2x32xf32>
    %249 = arith.mulf %238, %200 : vector<2x32xf32>
    %250 = arith.addf %248, %249 : vector<2x32xf32>
    %251 = vector.extract_strided_slice %18 {offsets = [6, 0], sizes = [2, 96], strides = [1, 1]} : vector<16x96xf32> to vector<2x96xf32>
    %cst_66 = arith.constant dense<0.000000e+00> : vector<2x96xf32>
    %252 = tpu.matmul %224, %22, %cst_66 {dimension_numbers = #tpu.dot_dimension_numbers<[1], [0], [0], [1], [0, 0, 1, 1], [], []>} : vector<2x32xf32>, vector<32x96xf32>, vector<2x96xf32> -> vector<2x96xf32>
    %253 = vector.extract_strided_slice %251 {offsets = [0, 0], sizes = [2, 64], strides = [1, 1]} : vector<2x96xf32> to vector<2x64xf32>
    %254 = vector.extract_strided_slice %252 {offsets = [0, 0], sizes = [2, 64], strides = [1, 1]} : vector<2x96xf32> to vector<2x64xf32>
    %255 = arith.addf %253, %254 : vector<2x64xf32>
    %256 = arith.negf %255 : vector<2x64xf32>
    %257 = math.exp %256 : vector<2x64xf32>
    %cst_67 = arith.constant 1.000000e+00 : f32
    %258 = vector.broadcast %cst_67 : f32 to vector<2x64xf32>
    %259 = arith.addf %258, %257 : vector<2x64xf32>
    %260 = arith.divf %258, %259 : vector<2x64xf32>
    %261 = vector.extract_strided_slice %260 {offsets = [0, 0], sizes = [2, 32], strides = [1, 1]} : vector<2x64xf32> to vector<2x32xf32>
    %262 = vector.extract_strided_slice %260 {offsets = [0, 32], sizes = [2, 32], strides = [1, 1]} : vector<2x64xf32> to vector<2x32xf32>
    %263 = vector.extract_strided_slice %251 {offsets = [0, 64], sizes = [2, 32], strides = [1, 1]} : vector<2x96xf32> to vector<2x32xf32>
    %264 = vector.extract_strided_slice %252 {offsets = [0, 64], sizes = [2, 32], strides = [1, 1]} : vector<2x96xf32> to vector<2x32xf32>
    %265 = vector.broadcast %26 : vector<1x32xf32> to vector<2x32xf32>
    %266 = arith.addf %264, %265 : vector<2x32xf32>
    %267 = arith.mulf %261, %266 : vector<2x32xf32>
    %268 = arith.addf %263, %267 : vector<2x32xf32>
    %269 = math.tanh %268 : vector<2x32xf32>
    %cst_68 = arith.constant 1.000000e+00 : f32
    %270 = vector.broadcast %cst_68 : f32 to vector<2x32xf32>
    %271 = arith.subf %270, %262 : vector<2x32xf32>
    %272 = arith.mulf %271, %269 : vector<2x32xf32>
    %273 = arith.mulf %262, %224 : vector<2x32xf32>
    %274 = arith.addf %272, %273 : vector<2x32xf32>
    %c8_69 = arith.constant 8 : index
    %c0_70 = arith.constant 0 : index
    %275 = vector.load %arg13[%c8_69, %c0_70] : memref<16x64xf32, #tpu.memory_space<vmem>>, vector<2x32xf32>
    tpu.vector_store %arg13[%c8_69, %c0_70], %250 {strides = array<i32>} : memref<16x64xf32, #tpu.memory_space<vmem>>, vector<2x32xf32>,
    %c6_71 = arith.constant 6 : index
    %c32_72 = arith.constant 32 : index
    %276 = vector.load %arg13[%c6_71, %c32_72] : memref<16x64xf32, #tpu.memory_space<vmem>>, vector<2x32xf32>
    tpu.vector_store %arg13[%c6_71, %c32_72], %274 {strides = array<i32>} : memref<16x64xf32, #tpu.memory_space<vmem>>, vector<2x32xf32>,
    %277 = vector.extract_strided_slice %11 {offsets = [10, 0], sizes = [2, 96], strides = [1, 1]} : vector<16x96xf32> to vector<2x96xf32>
    %cst_73 = arith.constant dense<0.000000e+00> : vector<2x96xf32>
    %278 = tpu.matmul %250, %20, %cst_73 {dimension_numbers = #tpu.dot_dimension_numbers<[1], [0], [0], [1], [0, 0, 1, 1], [], []>} : vector<2x32xf32>, vector<32x96xf32>, vector<2x96xf32> -> vector<2x96xf32>
    %279 = vector.extract_strided_slice %277 {offsets = [0, 0], sizes = [2, 64], strides = [1, 1]} : vector<2x96xf32> to vector<2x64xf32>
    %280 = vector.extract_strided_slice %278 {offsets = [0, 0], sizes = [2, 64], strides = [1, 1]} : vector<2x96xf32> to vector<2x64xf32>
    %281 = arith.addf %279, %280 : vector<2x64xf32>
    %282 = arith.negf %281 : vector<2x64xf32>
    %283 = math.exp %282 : vector<2x64xf32>
    %cst_74 = arith.constant 1.000000e+00 : f32
    %284 = vector.broadcast %cst_74 : f32 to vector<2x64xf32>
    %285 = arith.addf %284, %283 : vector<2x64xf32>
    %286 = arith.divf %284, %285 : vector<2x64xf32>
    %287 = vector.extract_strided_slice %286 {offsets = [0, 0], sizes = [2, 32], strides = [1, 1]} : vector<2x64xf32> to vector<2x32xf32>
    %288 = vector.extract_strided_slice %286 {offsets = [0, 32], sizes = [2, 32], strides = [1, 1]} : vector<2x64xf32> to vector<2x32xf32>
    %289 = vector.extract_strided_slice %277 {offsets = [0, 64], sizes = [2, 32], strides = [1, 1]} : vector<2x96xf32> to vector<2x32xf32>
    %290 = vector.extract_strided_slice %278 {offsets = [0, 64], sizes = [2, 32], strides = [1, 1]} : vector<2x96xf32> to vector<2x32xf32>
    %291 = vector.broadcast %24 : vector<1x32xf32> to vector<2x32xf32>
    %292 = arith.addf %290, %291 : vector<2x32xf32>
    %293 = arith.mulf %287, %292 : vector<2x32xf32>
    %294 = arith.addf %289, %293 : vector<2x32xf32>
    %295 = math.tanh %294 : vector<2x32xf32>
    %cst_75 = arith.constant 1.000000e+00 : f32
    %296 = vector.broadcast %cst_75 : f32 to vector<2x32xf32>
    %297 = arith.subf %296, %288 : vector<2x32xf32>
    %298 = arith.mulf %297, %295 : vector<2x32xf32>
    %299 = arith.mulf %288, %250 : vector<2x32xf32>
    %300 = arith.addf %298, %299 : vector<2x32xf32>
    %301 = vector.extract_strided_slice %18 {offsets = [4, 0], sizes = [2, 96], strides = [1, 1]} : vector<16x96xf32> to vector<2x96xf32>
    %cst_76 = arith.constant dense<0.000000e+00> : vector<2x96xf32>
    %302 = tpu.matmul %274, %22, %cst_76 {dimension_numbers = #tpu.dot_dimension_numbers<[1], [0], [0], [1], [0, 0, 1, 1], [], []>} : vector<2x32xf32>, vector<32x96xf32>, vector<2x96xf32> -> vector<2x96xf32>
    %303 = vector.extract_strided_slice %301 {offsets = [0, 0], sizes = [2, 64], strides = [1, 1]} : vector<2x96xf32> to vector<2x64xf32>
    %304 = vector.extract_strided_slice %302 {offsets = [0, 0], sizes = [2, 64], strides = [1, 1]} : vector<2x96xf32> to vector<2x64xf32>
    %305 = arith.addf %303, %304 : vector<2x64xf32>
    %306 = arith.negf %305 : vector<2x64xf32>
    %307 = math.exp %306 : vector<2x64xf32>
    %cst_77 = arith.constant 1.000000e+00 : f32
    %308 = vector.broadcast %cst_77 : f32 to vector<2x64xf32>
    %309 = arith.addf %308, %307 : vector<2x64xf32>
    %310 = arith.divf %308, %309 : vector<2x64xf32>
    %311 = vector.extract_strided_slice %310 {offsets = [0, 0], sizes = [2, 32], strides = [1, 1]} : vector<2x64xf32> to vector<2x32xf32>
    %312 = vector.extract_strided_slice %310 {offsets = [0, 32], sizes = [2, 32], strides = [1, 1]} : vector<2x64xf32> to vector<2x32xf32>
    %313 = vector.extract_strided_slice %301 {offsets = [0, 64], sizes = [2, 32], strides = [1, 1]} : vector<2x96xf32> to vector<2x32xf32>
    %314 = vector.extract_strided_slice %302 {offsets = [0, 64], sizes = [2, 32], strides = [1, 1]} : vector<2x96xf32> to vector<2x32xf32>
    %315 = vector.broadcast %26 : vector<1x32xf32> to vector<2x32xf32>
    %316 = arith.addf %314, %315 : vector<2x32xf32>
    %317 = arith.mulf %311, %316 : vector<2x32xf32>
    %318 = arith.addf %313, %317 : vector<2x32xf32>
    %319 = math.tanh %318 : vector<2x32xf32>
    %cst_78 = arith.constant 1.000000e+00 : f32
    %320 = vector.broadcast %cst_78 : f32 to vector<2x32xf32>
    %321 = arith.subf %320, %312 : vector<2x32xf32>
    %322 = arith.mulf %321, %319 : vector<2x32xf32>
    %323 = arith.mulf %312, %274 : vector<2x32xf32>
    %324 = arith.addf %322, %323 : vector<2x32xf32>
    %c10_79 = arith.constant 10 : index
    %c0_80 = arith.constant 0 : index
    %325 = vector.load %arg13[%c10_79, %c0_80] : memref<16x64xf32, #tpu.memory_space<vmem>>, vector<2x32xf32>
    tpu.vector_store %arg13[%c10_79, %c0_80], %300 {strides = array<i32>} : memref<16x64xf32, #tpu.memory_space<vmem>>, vector<2x32xf32>,
    %c4_81 = arith.constant 4 : index
    %c32_82 = arith.constant 32 : index
    %326 = vector.load %arg13[%c4_81, %c32_82] : memref<16x64xf32, #tpu.memory_space<vmem>>, vector<2x32xf32>
    tpu.vector_store %arg13[%c4_81, %c32_82], %324 {strides = array<i32>} : memref<16x64xf32, #tpu.memory_space<vmem>>, vector<2x32xf32>,
    %327 = vector.extract_strided_slice %11 {offsets = [12, 0], sizes = [2, 96], strides = [1, 1]} : vector<16x96xf32> to vector<2x96xf32>
    %cst_83 = arith.constant dense<0.000000e+00> : vector<2x96xf32>
    %328 = tpu.matmul %300, %20, %cst_83 {dimension_numbers = #tpu.dot_dimension_numbers<[1], [0], [0], [1], [0, 0, 1, 1], [], []>} : vector<2x32xf32>, vector<32x96xf32>, vector<2x96xf32> -> vector<2x96xf32>
    %329 = vector.extract_strided_slice %327 {offsets = [0, 0], sizes = [2, 64], strides = [1, 1]} : vector<2x96xf32> to vector<2x64xf32>
    %330 = vector.extract_strided_slice %328 {offsets = [0, 0], sizes = [2, 64], strides = [1, 1]} : vector<2x96xf32> to vector<2x64xf32>
    %331 = arith.addf %329, %330 : vector<2x64xf32>
    %332 = arith.negf %331 : vector<2x64xf32>
    %333 = math.exp %332 : vector<2x64xf32>
    %cst_84 = arith.constant 1.000000e+00 : f32
    %334 = vector.broadcast %cst_84 : f32 to vector<2x64xf32>
    %335 = arith.addf %334, %333 : vector<2x64xf32>
    %336 = arith.divf %334, %335 : vector<2x64xf32>
    %337 = vector.extract_strided_slice %336 {offsets = [0, 0], sizes = [2, 32], strides = [1, 1]} : vector<2x64xf32> to vector<2x32xf32>
    %338 = vector.extract_strided_slice %336 {offsets = [0, 32], sizes = [2, 32], strides = [1, 1]} : vector<2x64xf32> to vector<2x32xf32>
    %339 = vector.extract_strided_slice %327 {offsets = [0, 64], sizes = [2, 32], strides = [1, 1]} : vector<2x96xf32> to vector<2x32xf32>
    %340 = vector.extract_strided_slice %328 {offsets = [0, 64], sizes = [2, 32], strides = [1, 1]} : vector<2x96xf32> to vector<2x32xf32>
    %341 = vector.broadcast %24 : vector<1x32xf32> to vector<2x32xf32>
    %342 = arith.addf %340, %341 : vector<2x32xf32>
    %343 = arith.mulf %337, %342 : vector<2x32xf32>
    %344 = arith.addf %339, %343 : vector<2x32xf32>
    %345 = math.tanh %344 : vector<2x32xf32>
    %cst_85 = arith.constant 1.000000e+00 : f32
    %346 = vector.broadcast %cst_85 : f32 to vector<2x32xf32>
    %347 = arith.subf %346, %338 : vector<2x32xf32>
    %348 = arith.mulf %347, %345 : vector<2x32xf32>
    %349 = arith.mulf %338, %300 : vector<2x32xf32>
    %350 = arith.addf %348, %349 : vector<2x32xf32>
    %351 = vector.extract_strided_slice %18 {offsets = [2, 0], sizes = [2, 96], strides = [1, 1]} : vector<16x96xf32> to vector<2x96xf32>
    %cst_86 = arith.constant dense<0.000000e+00> : vector<2x96xf32>
    %352 = tpu.matmul %324, %22, %cst_86 {dimension_numbers = #tpu.dot_dimension_numbers<[1], [0], [0], [1], [0, 0, 1, 1], [], []>} : vector<2x32xf32>, vector<32x96xf32>, vector<2x96xf32> -> vector<2x96xf32>
    %353 = vector.extract_strided_slice %351 {offsets = [0, 0], sizes = [2, 64], strides = [1, 1]} : vector<2x96xf32> to vector<2x64xf32>
    %354 = vector.extract_strided_slice %352 {offsets = [0, 0], sizes = [2, 64], strides = [1, 1]} : vector<2x96xf32> to vector<2x64xf32>
    %355 = arith.addf %353, %354 : vector<2x64xf32>
    %356 = arith.negf %355 : vector<2x64xf32>
    %357 = math.exp %356 : vector<2x64xf32>
    %cst_87 = arith.constant 1.000000e+00 : f32
    %358 = vector.broadcast %cst_87 : f32 to vector<2x64xf32>
    %359 = arith.addf %358, %357 : vector<2x64xf32>
    %360 = arith.divf %358, %359 : vector<2x64xf32>
    %361 = vector.extract_strided_slice %360 {offsets = [0, 0], sizes = [2, 32], strides = [1, 1]} : vector<2x64xf32> to vector<2x32xf32>
    %362 = vector.extract_strided_slice %360 {offsets = [0, 32], sizes = [2, 32], strides = [1, 1]} : vector<2x64xf32> to vector<2x32xf32>
    %363 = vector.extract_strided_slice %351 {offsets = [0, 64], sizes = [2, 32], strides = [1, 1]} : vector<2x96xf32> to vector<2x32xf32>
    %364 = vector.extract_strided_slice %352 {offsets = [0, 64], sizes = [2, 32], strides = [1, 1]} : vector<2x96xf32> to vector<2x32xf32>
    %365 = vector.broadcast %26 : vector<1x32xf32> to vector<2x32xf32>
    %366 = arith.addf %364, %365 : vector<2x32xf32>
    %367 = arith.mulf %361, %366 : vector<2x32xf32>
    %368 = arith.addf %363, %367 : vector<2x32xf32>
    %369 = math.tanh %368 : vector<2x32xf32>
    %cst_88 = arith.constant 1.000000e+00 : f32
    %370 = vector.broadcast %cst_88 : f32 to vector<2x32xf32>
    %371 = arith.subf %370, %362 : vector<2x32xf32>
    %372 = arith.mulf %371, %369 : vector<2x32xf32>
    %373 = arith.mulf %362, %324 : vector<2x32xf32>
    %374 = arith.addf %372, %373 : vector<2x32xf32>
    %c12_89 = arith.constant 12 : index
    %c0_90 = arith.constant 0 : index
    %375 = vector.load %arg13[%c12_89, %c0_90] : memref<16x64xf32, #tpu.memory_space<vmem>>, vector<2x32xf32>
    tpu.vector_store %arg13[%c12_89, %c0_90], %350 {strides = array<i32>} : memref<16x64xf32, #tpu.memory_space<vmem>>, vector<2x32xf32>,
    %c2_91 = arith.constant 2 : index
    %c32_92 = arith.constant 32 : index
    %376 = vector.load %arg13[%c2_91, %c32_92] : memref<16x64xf32, #tpu.memory_space<vmem>>, vector<2x32xf32>
    tpu.vector_store %arg13[%c2_91, %c32_92], %374 {strides = array<i32>} : memref<16x64xf32, #tpu.memory_space<vmem>>, vector<2x32xf32>,
    %377 = vector.extract_strided_slice %11 {offsets = [14, 0], sizes = [2, 96], strides = [1, 1]} : vector<16x96xf32> to vector<2x96xf32>
    %cst_93 = arith.constant dense<0.000000e+00> : vector<2x96xf32>
    %378 = tpu.matmul %350, %20, %cst_93 {dimension_numbers = #tpu.dot_dimension_numbers<[1], [0], [0], [1], [0, 0, 1, 1], [], []>} : vector<2x32xf32>, vector<32x96xf32>, vector<2x96xf32> -> vector<2x96xf32>
    %379 = vector.extract_strided_slice %377 {offsets = [0, 0], sizes = [2, 64], strides = [1, 1]} : vector<2x96xf32> to vector<2x64xf32>
    %380 = vector.extract_strided_slice %378 {offsets = [0, 0], sizes = [2, 64], strides = [1, 1]} : vector<2x96xf32> to vector<2x64xf32>
    %381 = arith.addf %379, %380 : vector<2x64xf32>
    %382 = arith.negf %381 : vector<2x64xf32>
    %383 = math.exp %382 : vector<2x64xf32>
    %cst_94 = arith.constant 1.000000e+00 : f32
    %384 = vector.broadcast %cst_94 : f32 to vector<2x64xf32>
    %385 = arith.addf %384, %383 : vector<2x64xf32>
    %386 = arith.divf %384, %385 : vector<2x64xf32>
    %387 = vector.extract_strided_slice %386 {offsets = [0, 0], sizes = [2, 32], strides = [1, 1]} : vector<2x64xf32> to vector<2x32xf32>
    %388 = vector.extract_strided_slice %386 {offsets = [0, 32], sizes = [2, 32], strides = [1, 1]} : vector<2x64xf32> to vector<2x32xf32>
    %389 = vector.extract_strided_slice %377 {offsets = [0, 64], sizes = [2, 32], strides = [1, 1]} : vector<2x96xf32> to vector<2x32xf32>
    %390 = vector.extract_strided_slice %378 {offsets = [0, 64], sizes = [2, 32], strides = [1, 1]} : vector<2x96xf32> to vector<2x32xf32>
    %391 = vector.broadcast %24 : vector<1x32xf32> to vector<2x32xf32>
    %392 = arith.addf %390, %391 : vector<2x32xf32>
    %393 = arith.mulf %387, %392 : vector<2x32xf32>
    %394 = arith.addf %389, %393 : vector<2x32xf32>
    %395 = math.tanh %394 : vector<2x32xf32>
    %cst_95 = arith.constant 1.000000e+00 : f32
    %396 = vector.broadcast %cst_95 : f32 to vector<2x32xf32>
    %397 = arith.subf %396, %388 : vector<2x32xf32>
    %398 = arith.mulf %397, %395 : vector<2x32xf32>
    %399 = arith.mulf %388, %350 : vector<2x32xf32>
    %400 = arith.addf %398, %399 : vector<2x32xf32>
    %401 = vector.extract_strided_slice %18 {offsets = [0, 0], sizes = [2, 96], strides = [1, 1]} : vector<16x96xf32> to vector<2x96xf32>
    %cst_96 = arith.constant dense<0.000000e+00> : vector<2x96xf32>
    %402 = tpu.matmul %374, %22, %cst_96 {dimension_numbers = #tpu.dot_dimension_numbers<[1], [0], [0], [1], [0, 0, 1, 1], [], []>} : vector<2x32xf32>, vector<32x96xf32>, vector<2x96xf32> -> vector<2x96xf32>
    %403 = vector.extract_strided_slice %401 {offsets = [0, 0], sizes = [2, 64], strides = [1, 1]} : vector<2x96xf32> to vector<2x64xf32>
    %404 = vector.extract_strided_slice %402 {offsets = [0, 0], sizes = [2, 64], strides = [1, 1]} : vector<2x96xf32> to vector<2x64xf32>
    %405 = arith.addf %403, %404 : vector<2x64xf32>
    %406 = arith.negf %405 : vector<2x64xf32>
    %407 = math.exp %406 : vector<2x64xf32>
    %cst_97 = arith.constant 1.000000e+00 : f32
    %408 = vector.broadcast %cst_97 : f32 to vector<2x64xf32>
    %409 = arith.addf %408, %407 : vector<2x64xf32>
    %410 = arith.divf %408, %409 : vector<2x64xf32>
    %411 = vector.extract_strided_slice %410 {offsets = [0, 0], sizes = [2, 32], strides = [1, 1]} : vector<2x64xf32> to vector<2x32xf32>
    %412 = vector.extract_strided_slice %410 {offsets = [0, 32], sizes = [2, 32], strides = [1, 1]} : vector<2x64xf32> to vector<2x32xf32>
    %413 = vector.extract_strided_slice %401 {offsets = [0, 64], sizes = [2, 32], strides = [1, 1]} : vector<2x96xf32> to vector<2x32xf32>
    %414 = vector.extract_strided_slice %402 {offsets = [0, 64], sizes = [2, 32], strides = [1, 1]} : vector<2x96xf32> to vector<2x32xf32>
    %415 = vector.broadcast %26 : vector<1x32xf32> to vector<2x32xf32>
    %416 = arith.addf %414, %415 : vector<2x32xf32>
    %417 = arith.mulf %411, %416 : vector<2x32xf32>
    %418 = arith.addf %413, %417 : vector<2x32xf32>
    %419 = math.tanh %418 : vector<2x32xf32>
    %cst_98 = arith.constant 1.000000e+00 : f32
    %420 = vector.broadcast %cst_98 : f32 to vector<2x32xf32>
    %421 = arith.subf %420, %412 : vector<2x32xf32>
    %422 = arith.mulf %421, %419 : vector<2x32xf32>
    %423 = arith.mulf %412, %374 : vector<2x32xf32>
    %424 = arith.addf %422, %423 : vector<2x32xf32>
    %c14_99 = arith.constant 14 : index
    %c0_100 = arith.constant 0 : index
    %425 = vector.load %arg13[%c14_99, %c0_100] : memref<16x64xf32, #tpu.memory_space<vmem>>, vector<2x32xf32>
    tpu.vector_store %arg13[%c14_99, %c0_100], %400 {strides = array<i32>} : memref<16x64xf32, #tpu.memory_space<vmem>>, vector<2x32xf32>,
    %c0_101 = arith.constant 0 : index
    %c32_102 = arith.constant 32 : index
    %426 = vector.load %arg13[%c0_101, %c32_102] : memref<16x64xf32, #tpu.memory_space<vmem>>, vector<2x32xf32>
    tpu.vector_store %arg13[%c0_101, %c32_102], %424 {strides = array<i32>} : memref<16x64xf32, #tpu.memory_space<vmem>>, vector<2x32xf32>,
    %c0_103 = arith.constant 0 : index
    %c0_104 = arith.constant 0 : index
    %c0_105 = arith.constant 0 : index
    %427 = vector.load %arg12[%c0_103, %c0_104, %c0_105] : memref<4x2x32xf32, #tpu.memory_space<vmem>>, vector<1x2x32xf32>
    %428 = vector.shape_cast %427 : vector<1x2x32xf32> to vector<2x32xf32>
    %429 = vector.shape_cast %400 : vector<2x32xf32> to vector<1x2x32xf32>
    tpu.vector_store %arg12[%c0_103, %c0_104, %c0_105], %429 {strides = array<i32>} : memref<4x2x32xf32, #tpu.memory_space<vmem>>, vector<1x2x32xf32>,
    %c1_106 = arith.constant 1 : index
    %c0_107 = arith.constant 0 : index
    %c0_108 = arith.constant 0 : index
    %430 = vector.load %arg12[%c1_106, %c0_107, %c0_108] : memref<4x2x32xf32, #tpu.memory_space<vmem>>, vector<1x2x32xf32>
    %431 = vector.shape_cast %430 : vector<1x2x32xf32> to vector<2x32xf32>
    %432 = vector.shape_cast %424 : vector<2x32xf32> to vector<1x2x32xf32>
    tpu.vector_store %arg12[%c1_106, %c0_107, %c0_108], %432 {strides = array<i32>} : memref<4x2x32xf32, #tpu.memory_space<vmem>>, vector<1x2x32xf32>,
    %c0_109 = arith.constant 0 : index
    %c0_110 = arith.constant 0 : index
    %433 = vector.load %arg13[%c0_109, %c0_110] : memref<16x64xf32, #tpu.memory_space<vmem>>, vector<16x64xf32>
    %c2_111 = arith.constant 2 : index
    %c0_112 = arith.constant 0 : index
    %c0_113 = arith.constant 0 : index
    %434 = vector.load %arg2[%c2_111, %c0_112, %c0_113] : memref<4x2x32xf32, #tpu.memory_space<vmem>>, vector<1x2x32xf32>
    %435 = vector.shape_cast %434 : vector<1x2x32xf32> to vector<2x32xf32>
    %c3 = arith.constant 3 : index
    %c0_114 = arith.constant 0 : index
    %c0_115 = arith.constant 0 : index
    %436 = vector.load %arg2[%c3, %c0_114, %c0_115] : memref<4x2x32xf32, #tpu.memory_space<vmem>>, vector<1x2x32xf32>
    %437 = vector.shape_cast %436 : vector<1x2x32xf32> to vector<2x32xf32>
    %c0_116 = arith.constant 0 : index
    %c0_117 = arith.constant 0 : index
    %c0_118 = arith.constant 0 : index
    %438 = vector.load %arg7[%c0_116, %c0_117, %c0_118] : memref<2x64x96xf32, #tpu.memory_space<vmem>>, vector<1x64x96xf32>
    %439 = vector.shape_cast %438 : vector<1x64x96xf32> to vector<64x96xf32>
    %cst_119 = arith.constant dense<0.000000e+00> : vector<16x96xf32>
    %440 = tpu.matmul %433, %439, %cst_119 {dimension_numbers = #tpu.dot_dimension_numbers<[1], [0], [0], [1], [0, 0, 1, 1], [], []>} : vector<16x64xf32>, vector<64x96xf32>, vector<16x96xf32> -> vector<16x96xf32>
    %c0_120 = arith.constant 0 : index
    %c0_121 = arith.constant 0 : index
    %c0_122 = arith.constant 0 : index
    %441 = vector.load %arg9[%c0_120, %c0_121, %c0_122] : memref<2x1x96xf32, #tpu.memory_space<vmem>>, vector<1x1x96xf32>
    %442 = vector.shape_cast %441 : vector<1x1x96xf32> to vector<1x96xf32>
    %443 = vector.broadcast %442 : vector<1x96xf32> to vector<16x96xf32>
    %444 = arith.addf %440, %443 : vector<16x96xf32>
    %c1_123 = arith.constant 1 : index
    %c0_124 = arith.constant 0 : index
    %c0_125 = arith.constant 0 : index
    %445 = vector.load %arg7[%c1_123, %c0_124, %c0_125] : memref<2x64x96xf32, #tpu.memory_space<vmem>>, vector<1x64x96xf32>
    %446 = vector.shape_cast %445 : vector<1x64x96xf32> to vector<64x96xf32>
    %cst_126 = arith.constant dense<0.000000e+00> : vector<16x96xf32>
    %447 = tpu.matmul %433, %446, %cst_126 {dimension_numbers = #tpu.dot_dimension_numbers<[1], [0], [0], [1], [0, 0, 1, 1], [], []>} : vector<16x64xf32>, vector<64x96xf32>, vector<16x96xf32> -> vector<16x96xf32>
    %c1_127 = arith.constant 1 : index
    %c0_128 = arith.constant 0 : index
    %c0_129 = arith.constant 0 : index
    %448 = vector.load %arg9[%c1_127, %c0_128, %c0_129] : memref<2x1x96xf32, #tpu.memory_space<vmem>>, vector<1x1x96xf32>
    %449 = vector.shape_cast %448 : vector<1x1x96xf32> to vector<1x96xf32>
    %450 = vector.broadcast %449 : vector<1x96xf32> to vector<16x96xf32>
    %451 = arith.addf %447, %450 : vector<16x96xf32>
    %c0_130 = arith.constant 0 : index
    %c0_131 = arith.constant 0 : index
    %c0_132 = arith.constant 0 : index
    %452 = vector.load %arg8[%c0_130, %c0_131, %c0_132] : memref<2x32x96xf32, #tpu.memory_space<vmem>>, vector<1x32x96xf32>
    %453 = vector.shape_cast %452 : vector<1x32x96xf32> to vector<32x96xf32>
    %c1_133 = arith.constant 1 : index
    %c0_134 = arith.constant 0 : index
    %c0_135 = arith.constant 0 : index
    %454 = vector.load %arg8[%c1_133, %c0_134, %c0_135] : memref<2x32x96xf32, #tpu.memory_space<vmem>>, vector<1x32x96xf32>
    %455 = vector.shape_cast %454 : vector<1x32x96xf32> to vector<32x96xf32>
    %c0_136 = arith.constant 0 : index
    %c0_137 = arith.constant 0 : index
    %c0_138 = arith.constant 0 : index
    %456 = vector.load %arg10[%c0_136, %c0_137, %c0_138] : memref<2x1x32xf32, #tpu.memory_space<vmem>>, vector<1x1x32xf32>
    %457 = vector.shape_cast %456 : vector<1x1x32xf32> to vector<1x32xf32>
    %c1_139 = arith.constant 1 : index
    %c0_140 = arith.constant 0 : index
    %c0_141 = arith.constant 0 : index
    %458 = vector.load %arg10[%c1_139, %c0_140, %c0_141] : memref<2x1x32xf32, #tpu.memory_space<vmem>>, vector<1x1x32xf32>
    %459 = vector.shape_cast %458 : vector<1x1x32xf32> to vector<1x32xf32>
    %460 = vector.extract_strided_slice %444 {offsets = [0, 0], sizes = [2, 96], strides = [1, 1]} : vector<16x96xf32> to vector<2x96xf32>
    %cst_142 = arith.constant dense<0.000000e+00> : vector<2x96xf32>
    %461 = tpu.matmul %435, %453, %cst_142 {dimension_numbers = #tpu.dot_dimension_numbers<[1], [0], [0], [1], [0, 0, 1, 1], [], []>} : vector<2x32xf32>, vector<32x96xf32>, vector<2x96xf32> -> vector<2x96xf32>
    %462 = vector.extract_strided_slice %460 {offsets = [0, 0], sizes = [2, 64], strides = [1, 1]} : vector<2x96xf32> to vector<2x64xf32>
    %463 = vector.extract_strided_slice %461 {offsets = [0, 0], sizes = [2, 64], strides = [1, 1]} : vector<2x96xf32> to vector<2x64xf32>
    %464 = arith.addf %462, %463 : vector<2x64xf32>
    %465 = arith.negf %464 : vector<2x64xf32>
    %466 = math.exp %465 : vector<2x64xf32>
    %cst_143 = arith.constant 1.000000e+00 : f32
    %467 = vector.broadcast %cst_143 : f32 to vector<2x64xf32>
    %468 = arith.addf %467, %466 : vector<2x64xf32>
    %469 = arith.divf %467, %468 : vector<2x64xf32>
    %470 = vector.extract_strided_slice %469 {offsets = [0, 0], sizes = [2, 32], strides = [1, 1]} : vector<2x64xf32> to vector<2x32xf32>
    %471 = vector.extract_strided_slice %469 {offsets = [0, 32], sizes = [2, 32], strides = [1, 1]} : vector<2x64xf32> to vector<2x32xf32>
    %472 = vector.extract_strided_slice %460 {offsets = [0, 64], sizes = [2, 32], strides = [1, 1]} : vector<2x96xf32> to vector<2x32xf32>
    %473 = vector.extract_strided_slice %461 {offsets = [0, 64], sizes = [2, 32], strides = [1, 1]} : vector<2x96xf32> to vector<2x32xf32>
    %474 = vector.broadcast %457 : vector<1x32xf32> to vector<2x32xf32>
    %475 = arith.addf %473, %474 : vector<2x32xf32>
    %476 = arith.mulf %470, %475 : vector<2x32xf32>
    %477 = arith.addf %472, %476 : vector<2x32xf32>
    %478 = math.tanh %477 : vector<2x32xf32>
    %cst_144 = arith.constant 1.000000e+00 : f32
    %479 = vector.broadcast %cst_144 : f32 to vector<2x32xf32>
    %480 = arith.subf %479, %471 : vector<2x32xf32>
    %481 = arith.mulf %480, %478 : vector<2x32xf32>
    %482 = arith.mulf %471, %435 : vector<2x32xf32>
    %483 = arith.addf %481, %482 : vector<2x32xf32>
    %484 = vector.extract_strided_slice %451 {offsets = [14, 0], sizes = [2, 96], strides = [1, 1]} : vector<16x96xf32> to vector<2x96xf32>
    %cst_145 = arith.constant dense<0.000000e+00> : vector<2x96xf32>
    %485 = tpu.matmul %437, %455, %cst_145 {dimension_numbers = #tpu.dot_dimension_numbers<[1], [0], [0], [1], [0, 0, 1, 1], [], []>} : vector<2x32xf32>, vector<32x96xf32>, vector<2x96xf32> -> vector<2x96xf32>
    %486 = vector.extract_strided_slice %484 {offsets = [0, 0], sizes = [2, 64], strides = [1, 1]} : vector<2x96xf32> to vector<2x64xf32>
    %487 = vector.extract_strided_slice %485 {offsets = [0, 0], sizes = [2, 64], strides = [1, 1]} : vector<2x96xf32> to vector<2x64xf32>
    %488 = arith.addf %486, %487 : vector<2x64xf32>
    %489 = arith.negf %488 : vector<2x64xf32>
    %490 = math.exp %489 : vector<2x64xf32>
    %cst_146 = arith.constant 1.000000e+00 : f32
    %491 = vector.broadcast %cst_146 : f32 to vector<2x64xf32>
    %492 = arith.addf %491, %490 : vector<2x64xf32>
    %493 = arith.divf %491, %492 : vector<2x64xf32>
    %494 = vector.extract_strided_slice %493 {offsets = [0, 0], sizes = [2, 32], strides = [1, 1]} : vector<2x64xf32> to vector<2x32xf32>
    %495 = vector.extract_strided_slice %493 {offsets = [0, 32], sizes = [2, 32], strides = [1, 1]} : vector<2x64xf32> to vector<2x32xf32>
    %496 = vector.extract_strided_slice %484 {offsets = [0, 64], sizes = [2, 32], strides = [1, 1]} : vector<2x96xf32> to vector<2x32xf32>
    %497 = vector.extract_strided_slice %485 {offsets = [0, 64], sizes = [2, 32], strides = [1, 1]} : vector<2x96xf32> to vector<2x32xf32>
    %498 = vector.broadcast %459 : vector<1x32xf32> to vector<2x32xf32>
    %499 = arith.addf %497, %498 : vector<2x32xf32>
    %500 = arith.mulf %494, %499 : vector<2x32xf32>
    %501 = arith.addf %496, %500 : vector<2x32xf32>
    %502 = math.tanh %501 : vector<2x32xf32>
    %cst_147 = arith.constant 1.000000e+00 : f32
    %503 = vector.broadcast %cst_147 : f32 to vector<2x32xf32>
    %504 = arith.subf %503, %495 : vector<2x32xf32>
    %505 = arith.mulf %504, %502 : vector<2x32xf32>
    %506 = arith.mulf %495, %437 : vector<2x32xf32>
    %507 = arith.addf %505, %506 : vector<2x32xf32>
    %c0_148 = arith.constant 0 : index
    %c0_149 = arith.constant 0 : index
    %508 = vector.load %arg11[%c0_148, %c0_149] : memref<16x64xf32, #tpu.memory_space<vmem>>, vector<2x32xf32>
    tpu.vector_store %arg11[%c0_148, %c0_149], %483 {strides = array<i32>} : memref<16x64xf32, #tpu.memory_space<vmem>>, vector<2x32xf32>,
    %c14_150 = arith.constant 14 : index
    %c32_151 = arith.constant 32 : index
    %509 = vector.load %arg11[%c14_150, %c32_151] : memref<16x64xf32, #tpu.memory_space<vmem>>, vector<2x32xf32>
    tpu.vector_store %arg11[%c14_150, %c32_151], %507 {strides = array<i32>} : memref<16x64xf32, #tpu.memory_space<vmem>>, vector<2x32xf32>,
    %510 = vector.extract_strided_slice %444 {offsets = [2, 0], sizes = [2, 96], strides = [1, 1]} : vector<16x96xf32> to vector<2x96xf32>
    %cst_152 = arith.constant dense<0.000000e+00> : vector<2x96xf32>
    %511 = tpu.matmul %483, %453, %cst_152 {dimension_numbers = #tpu.dot_dimension_numbers<[1], [0], [0], [1], [0, 0, 1, 1], [], []>} : vector<2x32xf32>, vector<32x96xf32>, vector<2x96xf32> -> vector<2x96xf32>
    %512 = vector.extract_strided_slice %510 {offsets = [0, 0], sizes = [2, 64], strides = [1, 1]} : vector<2x96xf32> to vector<2x64xf32>
    %513 = vector.extract_strided_slice %511 {offsets = [0, 0], sizes = [2, 64], strides = [1, 1]} : vector<2x96xf32> to vector<2x64xf32>
    %514 = arith.addf %512, %513 : vector<2x64xf32>
    %515 = arith.negf %514 : vector<2x64xf32>
    %516 = math.exp %515 : vector<2x64xf32>
    %cst_153 = arith.constant 1.000000e+00 : f32
    %517 = vector.broadcast %cst_153 : f32 to vector<2x64xf32>
    %518 = arith.addf %517, %516 : vector<2x64xf32>
    %519 = arith.divf %517, %518 : vector<2x64xf32>
    %520 = vector.extract_strided_slice %519 {offsets = [0, 0], sizes = [2, 32], strides = [1, 1]} : vector<2x64xf32> to vector<2x32xf32>
    %521 = vector.extract_strided_slice %519 {offsets = [0, 32], sizes = [2, 32], strides = [1, 1]} : vector<2x64xf32> to vector<2x32xf32>
    %522 = vector.extract_strided_slice %510 {offsets = [0, 64], sizes = [2, 32], strides = [1, 1]} : vector<2x96xf32> to vector<2x32xf32>
    %523 = vector.extract_strided_slice %511 {offsets = [0, 64], sizes = [2, 32], strides = [1, 1]} : vector<2x96xf32> to vector<2x32xf32>
    %524 = vector.broadcast %457 : vector<1x32xf32> to vector<2x32xf32>
    %525 = arith.addf %523, %524 : vector<2x32xf32>
    %526 = arith.mulf %520, %525 : vector<2x32xf32>
    %527 = arith.addf %522, %526 : vector<2x32xf32>
    %528 = math.tanh %527 : vector<2x32xf32>
    %cst_154 = arith.constant 1.000000e+00 : f32
    %529 = vector.broadcast %cst_154 : f32 to vector<2x32xf32>
    %530 = arith.subf %529, %521 : vector<2x32xf32>
    %531 = arith.mulf %530, %528 : vector<2x32xf32>
    %532 = arith.mulf %521, %483 : vector<2x32xf32>
    %533 = arith.addf %531, %532 : vector<2x32xf32>
    %534 = vector.extract_strided_slice %451 {offsets = [12, 0], sizes = [2, 96], strides = [1, 1]} : vector<16x96xf32> to vector<2x96xf32>
    %cst_155 = arith.constant dense<0.000000e+00> : vector<2x96xf32>
    %535 = tpu.matmul %507, %455, %cst_155 {dimension_numbers = #tpu.dot_dimension_numbers<[1], [0], [0], [1], [0, 0, 1, 1], [], []>} : vector<2x32xf32>, vector<32x96xf32>, vector<2x96xf32> -> vector<2x96xf32>
    %536 = vector.extract_strided_slice %534 {offsets = [0, 0], sizes = [2, 64], strides = [1, 1]} : vector<2x96xf32> to vector<2x64xf32>
    %537 = vector.extract_strided_slice %535 {offsets = [0, 0], sizes = [2, 64], strides = [1, 1]} : vector<2x96xf32> to vector<2x64xf32>
    %538 = arith.addf %536, %537 : vector<2x64xf32>
    %539 = arith.negf %538 : vector<2x64xf32>
    %540 = math.exp %539 : vector<2x64xf32>
    %cst_156 = arith.constant 1.000000e+00 : f32
    %541 = vector.broadcast %cst_156 : f32 to vector<2x64xf32>
    %542 = arith.addf %541, %540 : vector<2x64xf32>
    %543 = arith.divf %541, %542 : vector<2x64xf32>
    %544 = vector.extract_strided_slice %543 {offsets = [0, 0], sizes = [2, 32], strides = [1, 1]} : vector<2x64xf32> to vector<2x32xf32>
    %545 = vector.extract_strided_slice %543 {offsets = [0, 32], sizes = [2, 32], strides = [1, 1]} : vector<2x64xf32> to vector<2x32xf32>
    %546 = vector.extract_strided_slice %534 {offsets = [0, 64], sizes = [2, 32], strides = [1, 1]} : vector<2x96xf32> to vector<2x32xf32>
    %547 = vector.extract_strided_slice %535 {offsets = [0, 64], sizes = [2, 32], strides = [1, 1]} : vector<2x96xf32> to vector<2x32xf32>
    %548 = vector.broadcast %459 : vector<1x32xf32> to vector<2x32xf32>
    %549 = arith.addf %547, %548 : vector<2x32xf32>
    %550 = arith.mulf %544, %549 : vector<2x32xf32>
    %551 = arith.addf %546, %550 : vector<2x32xf32>
    %552 = math.tanh %551 : vector<2x32xf32>
    %cst_157 = arith.constant 1.000000e+00 : f32
    %553 = vector.broadcast %cst_157 : f32 to vector<2x32xf32>
    %554 = arith.subf %553, %545 : vector<2x32xf32>
    %555 = arith.mulf %554, %552 : vector<2x32xf32>
    %556 = arith.mulf %545, %507 : vector<2x32xf32>
    %557 = arith.addf %555, %556 : vector<2x32xf32>
    %c2_158 = arith.constant 2 : index
    %c0_159 = arith.constant 0 : index
    %558 = vector.load %arg11[%c2_158, %c0_159] : memref<16x64xf32, #tpu.memory_space<vmem>>, vector<2x32xf32>
    tpu.vector_store %arg11[%c2_158, %c0_159], %533 {strides = array<i32>} : memref<16x64xf32, #tpu.memory_space<vmem>>, vector<2x32xf32>,
    %c12_160 = arith.constant 12 : index
    %c32_161 = arith.constant 32 : index
    %559 = vector.load %arg11[%c12_160, %c32_161] : memref<16x64xf32, #tpu.memory_space<vmem>>, vector<2x32xf32>
    tpu.vector_store %arg11[%c12_160, %c32_161], %557 {strides = array<i32>} : memref<16x64xf32, #tpu.memory_space<vmem>>, vector<2x32xf32>,
    %560 = vector.extract_strided_slice %444 {offsets = [4, 0], sizes = [2, 96], strides = [1, 1]} : vector<16x96xf32> to vector<2x96xf32>
    %cst_162 = arith.constant dense<0.000000e+00> : vector<2x96xf32>
    %561 = tpu.matmul %533, %453, %cst_162 {dimension_numbers = #tpu.dot_dimension_numbers<[1], [0], [0], [1], [0, 0, 1, 1], [], []>} : vector<2x32xf32>, vector<32x96xf32>, vector<2x96xf32> -> vector<2x96xf32>
    %562 = vector.extract_strided_slice %560 {offsets = [0, 0], sizes = [2, 64], strides = [1, 1]} : vector<2x96xf32> to vector<2x64xf32>
    %563 = vector.extract_strided_slice %561 {offsets = [0, 0], sizes = [2, 64], strides = [1, 1]} : vector<2x96xf32> to vector<2x64xf32>
    %564 = arith.addf %562, %563 : vector<2x64xf32>
    %565 = arith.negf %564 : vector<2x64xf32>
    %566 = math.exp %565 : vector<2x64xf32>
    %cst_163 = arith.constant 1.000000e+00 : f32
    %567 = vector.broadcast %cst_163 : f32 to vector<2x64xf32>
    %568 = arith.addf %567, %566 : vector<2x64xf32>
    %569 = arith.divf %567, %568 : vector<2x64xf32>
    %570 = vector.extract_strided_slice %569 {offsets = [0, 0], sizes = [2, 32], strides = [1, 1]} : vector<2x64xf32> to vector<2x32xf32>
    %571 = vector.extract_strided_slice %569 {offsets = [0, 32], sizes = [2, 32], strides = [1, 1]} : vector<2x64xf32> to vector<2x32xf32>
    %572 = vector.extract_strided_slice %560 {offsets = [0, 64], sizes = [2, 32], strides = [1, 1]} : vector<2x96xf32> to vector<2x32xf32>
    %573 = vector.extract_strided_slice %561 {offsets = [0, 64], sizes = [2, 32], strides = [1, 1]} : vector<2x96xf32> to vector<2x32xf32>
    %574 = vector.broadcast %457 : vector<1x32xf32> to vector<2x32xf32>
    %575 = arith.addf %573, %574 : vector<2x32xf32>
    %576 = arith.mulf %570, %575 : vector<2x32xf32>
    %577 = arith.addf %572, %576 : vector<2x32xf32>
    %578 = math.tanh %577 : vector<2x32xf32>
    %cst_164 = arith.constant 1.000000e+00 : f32
    %579 = vector.broadcast %cst_164 : f32 to vector<2x32xf32>
    %580 = arith.subf %579, %571 : vector<2x32xf32>
    %581 = arith.mulf %580, %578 : vector<2x32xf32>
    %582 = arith.mulf %571, %533 : vector<2x32xf32>
    %583 = arith.addf %581, %582 : vector<2x32xf32>
    %584 = vector.extract_strided_slice %451 {offsets = [10, 0], sizes = [2, 96], strides = [1, 1]} : vector<16x96xf32> to vector<2x96xf32>
    %cst_165 = arith.constant dense<0.000000e+00> : vector<2x96xf32>
    %585 = tpu.matmul %557, %455, %cst_165 {dimension_numbers = #tpu.dot_dimension_numbers<[1], [0], [0], [1], [0, 0, 1, 1], [], []>} : vector<2x32xf32>, vector<32x96xf32>, vector<2x96xf32> -> vector<2x96xf32>
    %586 = vector.extract_strided_slice %584 {offsets = [0, 0], sizes = [2, 64], strides = [1, 1]} : vector<2x96xf32> to vector<2x64xf32>
    %587 = vector.extract_strided_slice %585 {offsets = [0, 0], sizes = [2, 64], strides = [1, 1]} : vector<2x96xf32> to vector<2x64xf32>
    %588 = arith.addf %586, %587 : vector<2x64xf32>
    %589 = arith.negf %588 : vector<2x64xf32>
    %590 = math.exp %589 : vector<2x64xf32>
    %cst_166 = arith.constant 1.000000e+00 : f32
    %591 = vector.broadcast %cst_166 : f32 to vector<2x64xf32>
    %592 = arith.addf %591, %590 : vector<2x64xf32>
    %593 = arith.divf %591, %592 : vector<2x64xf32>
    %594 = vector.extract_strided_slice %593 {offsets = [0, 0], sizes = [2, 32], strides = [1, 1]} : vector<2x64xf32> to vector<2x32xf32>
    %595 = vector.extract_strided_slice %593 {offsets = [0, 32], sizes = [2, 32], strides = [1, 1]} : vector<2x64xf32> to vector<2x32xf32>
    %596 = vector.extract_strided_slice %584 {offsets = [0, 64], sizes = [2, 32], strides = [1, 1]} : vector<2x96xf32> to vector<2x32xf32>
    %597 = vector.extract_strided_slice %585 {offsets = [0, 64], sizes = [2, 32], strides = [1, 1]} : vector<2x96xf32> to vector<2x32xf32>
    %598 = vector.broadcast %459 : vector<1x32xf32> to vector<2x32xf32>
    %599 = arith.addf %597, %598 : vector<2x32xf32>
    %600 = arith.mulf %594, %599 : vector<2x32xf32>
    %601 = arith.addf %596, %600 : vector<2x32xf32>
    %602 = math.tanh %601 : vector<2x32xf32>
    %cst_167 = arith.constant 1.000000e+00 : f32
    %603 = vector.broadcast %cst_167 : f32 to vector<2x32xf32>
    %604 = arith.subf %603, %595 : vector<2x32xf32>
    %605 = arith.mulf %604, %602 : vector<2x32xf32>
    %606 = arith.mulf %595, %557 : vector<2x32xf32>
    %607 = arith.addf %605, %606 : vector<2x32xf32>
    %c4_168 = arith.constant 4 : index
    %c0_169 = arith.constant 0 : index
    %608 = vector.load %arg11[%c4_168, %c0_169] : memref<16x64xf32, #tpu.memory_space<vmem>>, vector<2x32xf32>
    tpu.vector_store %arg11[%c4_168, %c0_169], %583 {strides = array<i32>} : memref<16x64xf32, #tpu.memory_space<vmem>>, vector<2x32xf32>,
    %c10_170 = arith.constant 10 : index
    %c32_171 = arith.constant 32 : index
    %609 = vector.load %arg11[%c10_170, %c32_171] : memref<16x64xf32, #tpu.memory_space<vmem>>, vector<2x32xf32>
    tpu.vector_store %arg11[%c10_170, %c32_171], %607 {strides = array<i32>} : memref<16x64xf32, #tpu.memory_space<vmem>>, vector<2x32xf32>,
    %610 = vector.extract_strided_slice %444 {offsets = [6, 0], sizes = [2, 96], strides = [1, 1]} : vector<16x96xf32> to vector<2x96xf32>
    %cst_172 = arith.constant dense<0.000000e+00> : vector<2x96xf32>
    %611 = tpu.matmul %583, %453, %cst_172 {dimension_numbers = #tpu.dot_dimension_numbers<[1], [0], [0], [1], [0, 0, 1, 1], [], []>} : vector<2x32xf32>, vector<32x96xf32>, vector<2x96xf32> -> vector<2x96xf32>
    %612 = vector.extract_strided_slice %610 {offsets = [0, 0], sizes = [2, 64], strides = [1, 1]} : vector<2x96xf32> to vector<2x64xf32>
    %613 = vector.extract_strided_slice %611 {offsets = [0, 0], sizes = [2, 64], strides = [1, 1]} : vector<2x96xf32> to vector<2x64xf32>
    %614 = arith.addf %612, %613 : vector<2x64xf32>
    %615 = arith.negf %614 : vector<2x64xf32>
    %616 = math.exp %615 : vector<2x64xf32>
    %cst_173 = arith.constant 1.000000e+00 : f32
    %617 = vector.broadcast %cst_173 : f32 to vector<2x64xf32>
    %618 = arith.addf %617, %616 : vector<2x64xf32>
    %619 = arith.divf %617, %618 : vector<2x64xf32>
    %620 = vector.extract_strided_slice %619 {offsets = [0, 0], sizes = [2, 32], strides = [1, 1]} : vector<2x64xf32> to vector<2x32xf32>
    %621 = vector.extract_strided_slice %619 {offsets = [0, 32], sizes = [2, 32], strides = [1, 1]} : vector<2x64xf32> to vector<2x32xf32>
    %622 = vector.extract_strided_slice %610 {offsets = [0, 64], sizes = [2, 32], strides = [1, 1]} : vector<2x96xf32> to vector<2x32xf32>
    %623 = vector.extract_strided_slice %611 {offsets = [0, 64], sizes = [2, 32], strides = [1, 1]} : vector<2x96xf32> to vector<2x32xf32>
    %624 = vector.broadcast %457 : vector<1x32xf32> to vector<2x32xf32>
    %625 = arith.addf %623, %624 : vector<2x32xf32>
    %626 = arith.mulf %620, %625 : vector<2x32xf32>
    %627 = arith.addf %622, %626 : vector<2x32xf32>
    %628 = math.tanh %627 : vector<2x32xf32>
    %cst_174 = arith.constant 1.000000e+00 : f32
    %629 = vector.broadcast %cst_174 : f32 to vector<2x32xf32>
    %630 = arith.subf %629, %621 : vector<2x32xf32>
    %631 = arith.mulf %630, %628 : vector<2x32xf32>
    %632 = arith.mulf %621, %583 : vector<2x32xf32>
    %633 = arith.addf %631, %632 : vector<2x32xf32>
    %634 = vector.extract_strided_slice %451 {offsets = [8, 0], sizes = [2, 96], strides = [1, 1]} : vector<16x96xf32> to vector<2x96xf32>
    %cst_175 = arith.constant dense<0.000000e+00> : vector<2x96xf32>
    %635 = tpu.matmul %607, %455, %cst_175 {dimension_numbers = #tpu.dot_dimension_numbers<[1], [0], [0], [1], [0, 0, 1, 1], [], []>} : vector<2x32xf32>, vector<32x96xf32>, vector<2x96xf32> -> vector<2x96xf32>
    %636 = vector.extract_strided_slice %634 {offsets = [0, 0], sizes = [2, 64], strides = [1, 1]} : vector<2x96xf32> to vector<2x64xf32>
    %637 = vector.extract_strided_slice %635 {offsets = [0, 0], sizes = [2, 64], strides = [1, 1]} : vector<2x96xf32> to vector<2x64xf32>
    %638 = arith.addf %636, %637 : vector<2x64xf32>
    %639 = arith.negf %638 : vector<2x64xf32>
    %640 = math.exp %639 : vector<2x64xf32>
    %cst_176 = arith.constant 1.000000e+00 : f32
    %641 = vector.broadcast %cst_176 : f32 to vector<2x64xf32>
    %642 = arith.addf %641, %640 : vector<2x64xf32>
    %643 = arith.divf %641, %642 : vector<2x64xf32>
    %644 = vector.extract_strided_slice %643 {offsets = [0, 0], sizes = [2, 32], strides = [1, 1]} : vector<2x64xf32> to vector<2x32xf32>
    %645 = vector.extract_strided_slice %643 {offsets = [0, 32], sizes = [2, 32], strides = [1, 1]} : vector<2x64xf32> to vector<2x32xf32>
    %646 = vector.extract_strided_slice %634 {offsets = [0, 64], sizes = [2, 32], strides = [1, 1]} : vector<2x96xf32> to vector<2x32xf32>
    %647 = vector.extract_strided_slice %635 {offsets = [0, 64], sizes = [2, 32], strides = [1, 1]} : vector<2x96xf32> to vector<2x32xf32>
    %648 = vector.broadcast %459 : vector<1x32xf32> to vector<2x32xf32>
    %649 = arith.addf %647, %648 : vector<2x32xf32>
    %650 = arith.mulf %644, %649 : vector<2x32xf32>
    %651 = arith.addf %646, %650 : vector<2x32xf32>
    %652 = math.tanh %651 : vector<2x32xf32>
    %cst_177 = arith.constant 1.000000e+00 : f32
    %653 = vector.broadcast %cst_177 : f32 to vector<2x32xf32>
    %654 = arith.subf %653, %645 : vector<2x32xf32>
    %655 = arith.mulf %654, %652 : vector<2x32xf32>
    %656 = arith.mulf %645, %607 : vector<2x32xf32>
    %657 = arith.addf %655, %656 : vector<2x32xf32>
    %c6_178 = arith.constant 6 : index
    %c0_179 = arith.constant 0 : index
    %658 = vector.load %arg11[%c6_178, %c0_179] : memref<16x64xf32, #tpu.memory_space<vmem>>, vector<2x32xf32>
    tpu.vector_store %arg11[%c6_178, %c0_179], %633 {strides = array<i32>} : memref<16x64xf32, #tpu.memory_space<vmem>>, vector<2x32xf32>,
    %c8_180 = arith.constant 8 : index
    %c32_181 = arith.constant 32 : index
    %659 = vector.load %arg11[%c8_180, %c32_181] : memref<16x64xf32, #tpu.memory_space<vmem>>, vector<2x32xf32>
    tpu.vector_store %arg11[%c8_180, %c32_181], %657 {strides = array<i32>} : memref<16x64xf32, #tpu.memory_space<vmem>>, vector<2x32xf32>,
    %660 = vector.extract_strided_slice %444 {offsets = [8, 0], sizes = [2, 96], strides = [1, 1]} : vector<16x96xf32> to vector<2x96xf32>
    %cst_182 = arith.constant dense<0.000000e+00> : vector<2x96xf32>
    %661 = tpu.matmul %633, %453, %cst_182 {dimension_numbers = #tpu.dot_dimension_numbers<[1], [0], [0], [1], [0, 0, 1, 1], [], []>} : vector<2x32xf32>, vector<32x96xf32>, vector<2x96xf32> -> vector<2x96xf32>
    %662 = vector.extract_strided_slice %660 {offsets = [0, 0], sizes = [2, 64], strides = [1, 1]} : vector<2x96xf32> to vector<2x64xf32>
    %663 = vector.extract_strided_slice %661 {offsets = [0, 0], sizes = [2, 64], strides = [1, 1]} : vector<2x96xf32> to vector<2x64xf32>
    %664 = arith.addf %662, %663 : vector<2x64xf32>
    %665 = arith.negf %664 : vector<2x64xf32>
    %666 = math.exp %665 : vector<2x64xf32>
    %cst_183 = arith.constant 1.000000e+00 : f32
    %667 = vector.broadcast %cst_183 : f32 to vector<2x64xf32>
    %668 = arith.addf %667, %666 : vector<2x64xf32>
    %669 = arith.divf %667, %668 : vector<2x64xf32>
    %670 = vector.extract_strided_slice %669 {offsets = [0, 0], sizes = [2, 32], strides = [1, 1]} : vector<2x64xf32> to vector<2x32xf32>
    %671 = vector.extract_strided_slice %669 {offsets = [0, 32], sizes = [2, 32], strides = [1, 1]} : vector<2x64xf32> to vector<2x32xf32>
    %672 = vector.extract_strided_slice %660 {offsets = [0, 64], sizes = [2, 32], strides = [1, 1]} : vector<2x96xf32> to vector<2x32xf32>
    %673 = vector.extract_strided_slice %661 {offsets = [0, 64], sizes = [2, 32], strides = [1, 1]} : vector<2x96xf32> to vector<2x32xf32>
    %674 = vector.broadcast %457 : vector<1x32xf32> to vector<2x32xf32>
    %675 = arith.addf %673, %674 : vector<2x32xf32>
    %676 = arith.mulf %670, %675 : vector<2x32xf32>
    %677 = arith.addf %672, %676 : vector<2x32xf32>
    %678 = math.tanh %677 : vector<2x32xf32>
    %cst_184 = arith.constant 1.000000e+00 : f32
    %679 = vector.broadcast %cst_184 : f32 to vector<2x32xf32>
    %680 = arith.subf %679, %671 : vector<2x32xf32>
    %681 = arith.mulf %680, %678 : vector<2x32xf32>
    %682 = arith.mulf %671, %633 : vector<2x32xf32>
    %683 = arith.addf %681, %682 : vector<2x32xf32>
    %684 = vector.extract_strided_slice %451 {offsets = [6, 0], sizes = [2, 96], strides = [1, 1]} : vector<16x96xf32> to vector<2x96xf32>
    %cst_185 = arith.constant dense<0.000000e+00> : vector<2x96xf32>
    %685 = tpu.matmul %657, %455, %cst_185 {dimension_numbers = #tpu.dot_dimension_numbers<[1], [0], [0], [1], [0, 0, 1, 1], [], []>} : vector<2x32xf32>, vector<32x96xf32>, vector<2x96xf32> -> vector<2x96xf32>
    %686 = vector.extract_strided_slice %684 {offsets = [0, 0], sizes = [2, 64], strides = [1, 1]} : vector<2x96xf32> to vector<2x64xf32>
    %687 = vector.extract_strided_slice %685 {offsets = [0, 0], sizes = [2, 64], strides = [1, 1]} : vector<2x96xf32> to vector<2x64xf32>
    %688 = arith.addf %686, %687 : vector<2x64xf32>
    %689 = arith.negf %688 : vector<2x64xf32>
    %690 = math.exp %689 : vector<2x64xf32>
    %cst_186 = arith.constant 1.000000e+00 : f32
    %691 = vector.broadcast %cst_186 : f32 to vector<2x64xf32>
    %692 = arith.addf %691, %690 : vector<2x64xf32>
    %693 = arith.divf %691, %692 : vector<2x64xf32>
    %694 = vector.extract_strided_slice %693 {offsets = [0, 0], sizes = [2, 32], strides = [1, 1]} : vector<2x64xf32> to vector<2x32xf32>
    %695 = vector.extract_strided_slice %693 {offsets = [0, 32], sizes = [2, 32], strides = [1, 1]} : vector<2x64xf32> to vector<2x32xf32>
    %696 = vector.extract_strided_slice %684 {offsets = [0, 64], sizes = [2, 32], strides = [1, 1]} : vector<2x96xf32> to vector<2x32xf32>
    %697 = vector.extract_strided_slice %685 {offsets = [0, 64], sizes = [2, 32], strides = [1, 1]} : vector<2x96xf32> to vector<2x32xf32>
    %698 = vector.broadcast %459 : vector<1x32xf32> to vector<2x32xf32>
    %699 = arith.addf %697, %698 : vector<2x32xf32>
    %700 = arith.mulf %694, %699 : vector<2x32xf32>
    %701 = arith.addf %696, %700 : vector<2x32xf32>
    %702 = math.tanh %701 : vector<2x32xf32>
    %cst_187 = arith.constant 1.000000e+00 : f32
    %703 = vector.broadcast %cst_187 : f32 to vector<2x32xf32>
    %704 = arith.subf %703, %695 : vector<2x32xf32>
    %705 = arith.mulf %704, %702 : vector<2x32xf32>
    %706 = arith.mulf %695, %657 : vector<2x32xf32>
    %707 = arith.addf %705, %706 : vector<2x32xf32>
    %c8_188 = arith.constant 8 : index
    %c0_189 = arith.constant 0 : index
    %708 = vector.load %arg11[%c8_188, %c0_189] : memref<16x64xf32, #tpu.memory_space<vmem>>, vector<2x32xf32>
    tpu.vector_store %arg11[%c8_188, %c0_189], %683 {strides = array<i32>} : memref<16x64xf32, #tpu.memory_space<vmem>>, vector<2x32xf32>,
    %c6_190 = arith.constant 6 : index
    %c32_191 = arith.constant 32 : index
    %709 = vector.load %arg11[%c6_190, %c32_191] : memref<16x64xf32, #tpu.memory_space<vmem>>, vector<2x32xf32>
    tpu.vector_store %arg11[%c6_190, %c32_191], %707 {strides = array<i32>} : memref<16x64xf32, #tpu.memory_space<vmem>>, vector<2x32xf32>,
    %710 = vector.extract_strided_slice %444 {offsets = [10, 0], sizes = [2, 96], strides = [1, 1]} : vector<16x96xf32> to vector<2x96xf32>
    %cst_192 = arith.constant dense<0.000000e+00> : vector<2x96xf32>
    %711 = tpu.matmul %683, %453, %cst_192 {dimension_numbers = #tpu.dot_dimension_numbers<[1], [0], [0], [1], [0, 0, 1, 1], [], []>} : vector<2x32xf32>, vector<32x96xf32>, vector<2x96xf32> -> vector<2x96xf32>
    %712 = vector.extract_strided_slice %710 {offsets = [0, 0], sizes = [2, 64], strides = [1, 1]} : vector<2x96xf32> to vector<2x64xf32>
    %713 = vector.extract_strided_slice %711 {offsets = [0, 0], sizes = [2, 64], strides = [1, 1]} : vector<2x96xf32> to vector<2x64xf32>
    %714 = arith.addf %712, %713 : vector<2x64xf32>
    %715 = arith.negf %714 : vector<2x64xf32>
    %716 = math.exp %715 : vector<2x64xf32>
    %cst_193 = arith.constant 1.000000e+00 : f32
    %717 = vector.broadcast %cst_193 : f32 to vector<2x64xf32>
    %718 = arith.addf %717, %716 : vector<2x64xf32>
    %719 = arith.divf %717, %718 : vector<2x64xf32>
    %720 = vector.extract_strided_slice %719 {offsets = [0, 0], sizes = [2, 32], strides = [1, 1]} : vector<2x64xf32> to vector<2x32xf32>
    %721 = vector.extract_strided_slice %719 {offsets = [0, 32], sizes = [2, 32], strides = [1, 1]} : vector<2x64xf32> to vector<2x32xf32>
    %722 = vector.extract_strided_slice %710 {offsets = [0, 64], sizes = [2, 32], strides = [1, 1]} : vector<2x96xf32> to vector<2x32xf32>
    %723 = vector.extract_strided_slice %711 {offsets = [0, 64], sizes = [2, 32], strides = [1, 1]} : vector<2x96xf32> to vector<2x32xf32>
    %724 = vector.broadcast %457 : vector<1x32xf32> to vector<2x32xf32>
    %725 = arith.addf %723, %724 : vector<2x32xf32>
    %726 = arith.mulf %720, %725 : vector<2x32xf32>
    %727 = arith.addf %722, %726 : vector<2x32xf32>
    %728 = math.tanh %727 : vector<2x32xf32>
    %cst_194 = arith.constant 1.000000e+00 : f32
    %729 = vector.broadcast %cst_194 : f32 to vector<2x32xf32>
    %730 = arith.subf %729, %721 : vector<2x32xf32>
    %731 = arith.mulf %730, %728 : vector<2x32xf32>
    %732 = arith.mulf %721, %683 : vector<2x32xf32>
    %733 = arith.addf %731, %732 : vector<2x32xf32>
    %734 = vector.extract_strided_slice %451 {offsets = [4, 0], sizes = [2, 96], strides = [1, 1]} : vector<16x96xf32> to vector<2x96xf32>
    %cst_195 = arith.constant dense<0.000000e+00> : vector<2x96xf32>
    %735 = tpu.matmul %707, %455, %cst_195 {dimension_numbers = #tpu.dot_dimension_numbers<[1], [0], [0], [1], [0, 0, 1, 1], [], []>} : vector<2x32xf32>, vector<32x96xf32>, vector<2x96xf32> -> vector<2x96xf32>
    %736 = vector.extract_strided_slice %734 {offsets = [0, 0], sizes = [2, 64], strides = [1, 1]} : vector<2x96xf32> to vector<2x64xf32>
    %737 = vector.extract_strided_slice %735 {offsets = [0, 0], sizes = [2, 64], strides = [1, 1]} : vector<2x96xf32> to vector<2x64xf32>
    %738 = arith.addf %736, %737 : vector<2x64xf32>
    %739 = arith.negf %738 : vector<2x64xf32>
    %740 = math.exp %739 : vector<2x64xf32>
    %cst_196 = arith.constant 1.000000e+00 : f32
    %741 = vector.broadcast %cst_196 : f32 to vector<2x64xf32>
    %742 = arith.addf %741, %740 : vector<2x64xf32>
    %743 = arith.divf %741, %742 : vector<2x64xf32>
    %744 = vector.extract_strided_slice %743 {offsets = [0, 0], sizes = [2, 32], strides = [1, 1]} : vector<2x64xf32> to vector<2x32xf32>
    %745 = vector.extract_strided_slice %743 {offsets = [0, 32], sizes = [2, 32], strides = [1, 1]} : vector<2x64xf32> to vector<2x32xf32>
    %746 = vector.extract_strided_slice %734 {offsets = [0, 64], sizes = [2, 32], strides = [1, 1]} : vector<2x96xf32> to vector<2x32xf32>
    %747 = vector.extract_strided_slice %735 {offsets = [0, 64], sizes = [2, 32], strides = [1, 1]} : vector<2x96xf32> to vector<2x32xf32>
    %748 = vector.broadcast %459 : vector<1x32xf32> to vector<2x32xf32>
    %749 = arith.addf %747, %748 : vector<2x32xf32>
    %750 = arith.mulf %744, %749 : vector<2x32xf32>
    %751 = arith.addf %746, %750 : vector<2x32xf32>
    %752 = math.tanh %751 : vector<2x32xf32>
    %cst_197 = arith.constant 1.000000e+00 : f32
    %753 = vector.broadcast %cst_197 : f32 to vector<2x32xf32>
    %754 = arith.subf %753, %745 : vector<2x32xf32>
    %755 = arith.mulf %754, %752 : vector<2x32xf32>
    %756 = arith.mulf %745, %707 : vector<2x32xf32>
    %757 = arith.addf %755, %756 : vector<2x32xf32>
    %c10_198 = arith.constant 10 : index
    %c0_199 = arith.constant 0 : index
    %758 = vector.load %arg11[%c10_198, %c0_199] : memref<16x64xf32, #tpu.memory_space<vmem>>, vector<2x32xf32>
    tpu.vector_store %arg11[%c10_198, %c0_199], %733 {strides = array<i32>} : memref<16x64xf32, #tpu.memory_space<vmem>>, vector<2x32xf32>,
    %c4_200 = arith.constant 4 : index
    %c32_201 = arith.constant 32 : index
    %759 = vector.load %arg11[%c4_200, %c32_201] : memref<16x64xf32, #tpu.memory_space<vmem>>, vector<2x32xf32>
    tpu.vector_store %arg11[%c4_200, %c32_201], %757 {strides = array<i32>} : memref<16x64xf32, #tpu.memory_space<vmem>>, vector<2x32xf32>,
    %760 = vector.extract_strided_slice %444 {offsets = [12, 0], sizes = [2, 96], strides = [1, 1]} : vector<16x96xf32> to vector<2x96xf32>
    %cst_202 = arith.constant dense<0.000000e+00> : vector<2x96xf32>
    %761 = tpu.matmul %733, %453, %cst_202 {dimension_numbers = #tpu.dot_dimension_numbers<[1], [0], [0], [1], [0, 0, 1, 1], [], []>} : vector<2x32xf32>, vector<32x96xf32>, vector<2x96xf32> -> vector<2x96xf32>
    %762 = vector.extract_strided_slice %760 {offsets = [0, 0], sizes = [2, 64], strides = [1, 1]} : vector<2x96xf32> to vector<2x64xf32>
    %763 = vector.extract_strided_slice %761 {offsets = [0, 0], sizes = [2, 64], strides = [1, 1]} : vector<2x96xf32> to vector<2x64xf32>
    %764 = arith.addf %762, %763 : vector<2x64xf32>
    %765 = arith.negf %764 : vector<2x64xf32>
    %766 = math.exp %765 : vector<2x64xf32>
    %cst_203 = arith.constant 1.000000e+00 : f32
    %767 = vector.broadcast %cst_203 : f32 to vector<2x64xf32>
    %768 = arith.addf %767, %766 : vector<2x64xf32>
    %769 = arith.divf %767, %768 : vector<2x64xf32>
    %770 = vector.extract_strided_slice %769 {offsets = [0, 0], sizes = [2, 32], strides = [1, 1]} : vector<2x64xf32> to vector<2x32xf32>
    %771 = vector.extract_strided_slice %769 {offsets = [0, 32], sizes = [2, 32], strides = [1, 1]} : vector<2x64xf32> to vector<2x32xf32>
    %772 = vector.extract_strided_slice %760 {offsets = [0, 64], sizes = [2, 32], strides = [1, 1]} : vector<2x96xf32> to vector<2x32xf32>
    %773 = vector.extract_strided_slice %761 {offsets = [0, 64], sizes = [2, 32], strides = [1, 1]} : vector<2x96xf32> to vector<2x32xf32>
    %774 = vector.broadcast %457 : vector<1x32xf32> to vector<2x32xf32>
    %775 = arith.addf %773, %774 : vector<2x32xf32>
    %776 = arith.mulf %770, %775 : vector<2x32xf32>
    %777 = arith.addf %772, %776 : vector<2x32xf32>
    %778 = math.tanh %777 : vector<2x32xf32>
    %cst_204 = arith.constant 1.000000e+00 : f32
    %779 = vector.broadcast %cst_204 : f32 to vector<2x32xf32>
    %780 = arith.subf %779, %771 : vector<2x32xf32>
    %781 = arith.mulf %780, %778 : vector<2x32xf32>
    %782 = arith.mulf %771, %733 : vector<2x32xf32>
    %783 = arith.addf %781, %782 : vector<2x32xf32>
    %784 = vector.extract_strided_slice %451 {offsets = [2, 0], sizes = [2, 96], strides = [1, 1]} : vector<16x96xf32> to vector<2x96xf32>
    %cst_205 = arith.constant dense<0.000000e+00> : vector<2x96xf32>
    %785 = tpu.matmul %757, %455, %cst_205 {dimension_numbers = #tpu.dot_dimension_numbers<[1], [0], [0], [1], [0, 0, 1, 1], [], []>} : vector<2x32xf32>, vector<32x96xf32>, vector<2x96xf32> -> vector<2x96xf32>
    %786 = vector.extract_strided_slice %784 {offsets = [0, 0], sizes = [2, 64], strides = [1, 1]} : vector<2x96xf32> to vector<2x64xf32>
    %787 = vector.extract_strided_slice %785 {offsets = [0, 0], sizes = [2, 64], strides = [1, 1]} : vector<2x96xf32> to vector<2x64xf32>
    %788 = arith.addf %786, %787 : vector<2x64xf32>
    %789 = arith.negf %788 : vector<2x64xf32>
    %790 = math.exp %789 : vector<2x64xf32>
    %cst_206 = arith.constant 1.000000e+00 : f32
    %791 = vector.broadcast %cst_206 : f32 to vector<2x64xf32>
    %792 = arith.addf %791, %790 : vector<2x64xf32>
    %793 = arith.divf %791, %792 : vector<2x64xf32>
    %794 = vector.extract_strided_slice %793 {offsets = [0, 0], sizes = [2, 32], strides = [1, 1]} : vector<2x64xf32> to vector<2x32xf32>
    %795 = vector.extract_strided_slice %793 {offsets = [0, 32], sizes = [2, 32], strides = [1, 1]} : vector<2x64xf32> to vector<2x32xf32>
    %796 = vector.extract_strided_slice %784 {offsets = [0, 64], sizes = [2, 32], strides = [1, 1]} : vector<2x96xf32> to vector<2x32xf32>
    %797 = vector.extract_strided_slice %785 {offsets = [0, 64], sizes = [2, 32], strides = [1, 1]} : vector<2x96xf32> to vector<2x32xf32>
    %798 = vector.broadcast %459 : vector<1x32xf32> to vector<2x32xf32>
    %799 = arith.addf %797, %798 : vector<2x32xf32>
    %800 = arith.mulf %794, %799 : vector<2x32xf32>
    %801 = arith.addf %796, %800 : vector<2x32xf32>
    %802 = math.tanh %801 : vector<2x32xf32>
    %cst_207 = arith.constant 1.000000e+00 : f32
    %803 = vector.broadcast %cst_207 : f32 to vector<2x32xf32>
    %804 = arith.subf %803, %795 : vector<2x32xf32>
    %805 = arith.mulf %804, %802 : vector<2x32xf32>
    %806 = arith.mulf %795, %757 : vector<2x32xf32>
    %807 = arith.addf %805, %806 : vector<2x32xf32>
    %c12_208 = arith.constant 12 : index
    %c0_209 = arith.constant 0 : index
    %808 = vector.load %arg11[%c12_208, %c0_209] : memref<16x64xf32, #tpu.memory_space<vmem>>, vector<2x32xf32>
    tpu.vector_store %arg11[%c12_208, %c0_209], %783 {strides = array<i32>} : memref<16x64xf32, #tpu.memory_space<vmem>>, vector<2x32xf32>,
    %c2_210 = arith.constant 2 : index
    %c32_211 = arith.constant 32 : index
    %809 = vector.load %arg11[%c2_210, %c32_211] : memref<16x64xf32, #tpu.memory_space<vmem>>, vector<2x32xf32>
    tpu.vector_store %arg11[%c2_210, %c32_211], %807 {strides = array<i32>} : memref<16x64xf32, #tpu.memory_space<vmem>>, vector<2x32xf32>,
    %810 = vector.extract_strided_slice %444 {offsets = [14, 0], sizes = [2, 96], strides = [1, 1]} : vector<16x96xf32> to vector<2x96xf32>
    %cst_212 = arith.constant dense<0.000000e+00> : vector<2x96xf32>
    %811 = tpu.matmul %783, %453, %cst_212 {dimension_numbers = #tpu.dot_dimension_numbers<[1], [0], [0], [1], [0, 0, 1, 1], [], []>} : vector<2x32xf32>, vector<32x96xf32>, vector<2x96xf32> -> vector<2x96xf32>
    %812 = vector.extract_strided_slice %810 {offsets = [0, 0], sizes = [2, 64], strides = [1, 1]} : vector<2x96xf32> to vector<2x64xf32>
    %813 = vector.extract_strided_slice %811 {offsets = [0, 0], sizes = [2, 64], strides = [1, 1]} : vector<2x96xf32> to vector<2x64xf32>
    %814 = arith.addf %812, %813 : vector<2x64xf32>
    %815 = arith.negf %814 : vector<2x64xf32>
    %816 = math.exp %815 : vector<2x64xf32>
    %cst_213 = arith.constant 1.000000e+00 : f32
    %817 = vector.broadcast %cst_213 : f32 to vector<2x64xf32>
    %818 = arith.addf %817, %816 : vector<2x64xf32>
    %819 = arith.divf %817, %818 : vector<2x64xf32>
    %820 = vector.extract_strided_slice %819 {offsets = [0, 0], sizes = [2, 32], strides = [1, 1]} : vector<2x64xf32> to vector<2x32xf32>
    %821 = vector.extract_strided_slice %819 {offsets = [0, 32], sizes = [2, 32], strides = [1, 1]} : vector<2x64xf32> to vector<2x32xf32>
    %822 = vector.extract_strided_slice %810 {offsets = [0, 64], sizes = [2, 32], strides = [1, 1]} : vector<2x96xf32> to vector<2x32xf32>
    %823 = vector.extract_strided_slice %811 {offsets = [0, 64], sizes = [2, 32], strides = [1, 1]} : vector<2x96xf32> to vector<2x32xf32>
    %824 = vector.broadcast %457 : vector<1x32xf32> to vector<2x32xf32>
    %825 = arith.addf %823, %824 : vector<2x32xf32>
    %826 = arith.mulf %820, %825 : vector<2x32xf32>
    %827 = arith.addf %822, %826 : vector<2x32xf32>
    %828 = math.tanh %827 : vector<2x32xf32>
    %cst_214 = arith.constant 1.000000e+00 : f32
    %829 = vector.broadcast %cst_214 : f32 to vector<2x32xf32>
    %830 = arith.subf %829, %821 : vector<2x32xf32>
    %831 = arith.mulf %830, %828 : vector<2x32xf32>
    %832 = arith.mulf %821, %783 : vector<2x32xf32>
    %833 = arith.addf %831, %832 : vector<2x32xf32>
    %834 = vector.extract_strided_slice %451 {offsets = [0, 0], sizes = [2, 96], strides = [1, 1]} : vector<16x96xf32> to vector<2x96xf32>
    %cst_215 = arith.constant dense<0.000000e+00> : vector<2x96xf32>
    %835 = tpu.matmul %807, %455, %cst_215 {dimension_numbers = #tpu.dot_dimension_numbers<[1], [0], [0], [1], [0, 0, 1, 1], [], []>} : vector<2x32xf32>, vector<32x96xf32>, vector<2x96xf32> -> vector<2x96xf32>
    %836 = vector.extract_strided_slice %834 {offsets = [0, 0], sizes = [2, 64], strides = [1, 1]} : vector<2x96xf32> to vector<2x64xf32>
    %837 = vector.extract_strided_slice %835 {offsets = [0, 0], sizes = [2, 64], strides = [1, 1]} : vector<2x96xf32> to vector<2x64xf32>
    %838 = arith.addf %836, %837 : vector<2x64xf32>
    %839 = arith.negf %838 : vector<2x64xf32>
    %840 = math.exp %839 : vector<2x64xf32>
    %cst_216 = arith.constant 1.000000e+00 : f32
    %841 = vector.broadcast %cst_216 : f32 to vector<2x64xf32>
    %842 = arith.addf %841, %840 : vector<2x64xf32>
    %843 = arith.divf %841, %842 : vector<2x64xf32>
    %844 = vector.extract_strided_slice %843 {offsets = [0, 0], sizes = [2, 32], strides = [1, 1]} : vector<2x64xf32> to vector<2x32xf32>
    %845 = vector.extract_strided_slice %843 {offsets = [0, 32], sizes = [2, 32], strides = [1, 1]} : vector<2x64xf32> to vector<2x32xf32>
    %846 = vector.extract_strided_slice %834 {offsets = [0, 64], sizes = [2, 32], strides = [1, 1]} : vector<2x96xf32> to vector<2x32xf32>
    %847 = vector.extract_strided_slice %835 {offsets = [0, 64], sizes = [2, 32], strides = [1, 1]} : vector<2x96xf32> to vector<2x32xf32>
    %848 = vector.broadcast %459 : vector<1x32xf32> to vector<2x32xf32>
    %849 = arith.addf %847, %848 : vector<2x32xf32>
    %850 = arith.mulf %844, %849 : vector<2x32xf32>
    %851 = arith.addf %846, %850 : vector<2x32xf32>
    %852 = math.tanh %851 : vector<2x32xf32>
    %cst_217 = arith.constant 1.000000e+00 : f32
    %853 = vector.broadcast %cst_217 : f32 to vector<2x32xf32>
    %854 = arith.subf %853, %845 : vector<2x32xf32>
    %855 = arith.mulf %854, %852 : vector<2x32xf32>
    %856 = arith.mulf %845, %807 : vector<2x32xf32>
    %857 = arith.addf %855, %856 : vector<2x32xf32>
    %c14_218 = arith.constant 14 : index
    %c0_219 = arith.constant 0 : index
    %858 = vector.load %arg11[%c14_218, %c0_219] : memref<16x64xf32, #tpu.memory_space<vmem>>, vector<2x32xf32>
    tpu.vector_store %arg11[%c14_218, %c0_219], %833 {strides = array<i32>} : memref<16x64xf32, #tpu.memory_space<vmem>>, vector<2x32xf32>,
    %c0_220 = arith.constant 0 : index
    %c32_221 = arith.constant 32 : index
    %859 = vector.load %arg11[%c0_220, %c32_221] : memref<16x64xf32, #tpu.memory_space<vmem>>, vector<2x32xf32>
    tpu.vector_store %arg11[%c0_220, %c32_221], %857 {strides = array<i32>} : memref<16x64xf32, #tpu.memory_space<vmem>>, vector<2x32xf32>,
    %c2_222 = arith.constant 2 : index
    %c0_223 = arith.constant 0 : index
    %c0_224 = arith.constant 0 : index
    %860 = vector.load %arg12[%c2_222, %c0_223, %c0_224] : memref<4x2x32xf32, #tpu.memory_space<vmem>>, vector<1x2x32xf32>
    %861 = vector.shape_cast %860 : vector<1x2x32xf32> to vector<2x32xf32>
    %862 = vector.shape_cast %833 : vector<2x32xf32> to vector<1x2x32xf32>
    tpu.vector_store %arg12[%c2_222, %c0_223, %c0_224], %862 {strides = array<i32>} : memref<4x2x32xf32, #tpu.memory_space<vmem>>, vector<1x2x32xf32>,
    %c3_225 = arith.constant 3 : index
    %c0_226 = arith.constant 0 : index
    %c0_227 = arith.constant 0 : index
    %863 = vector.load %arg12[%c3_225, %c0_226, %c0_227] : memref<4x2x32xf32, #tpu.memory_space<vmem>>, vector<1x2x32xf32>
    %864 = vector.shape_cast %863 : vector<1x2x32xf32> to vector<2x32xf32>
    %865 = vector.shape_cast %857 : vector<2x32xf32> to vector<1x2x32xf32>
    tpu.vector_store %arg12[%c3_225, %c0_226, %c0_227], %865 {strides = array<i32>} : memref<4x2x32xf32, #tpu.memory_space<vmem>>, vector<1x2x32xf32>,
    return
  }
  func.func @transform_0(%arg0: i32) -> (i32, i32) {
    %c0_i32 = arith.constant 0 : i32
    %c0_i32_0 = arith.constant 0 : i32
    %c0_i32_1 = arith.constant 0 : i32
    return %c0_i32, %c0_i32_0 : i32, i32
  }
  func.func @transform_1(%arg0: i32) -> (i32, i32, i32) {
    %c0_i32 = arith.constant 0 : i32
    %c0_i32_0 = arith.constant 0 : i32
    %c0_i32_1 = arith.constant 0 : i32
    %c0_i32_2 = arith.constant 0 : i32
    return %c0_i32, %c0_i32_0, %c0_i32_1 : i32, i32, i32
  }
  func.func @transform_2(%arg0: i32) -> (i32, i32, i32) {
    %c0_i32 = arith.constant 0 : i32
    %c0_i32_0 = arith.constant 0 : i32
    %c0_i32_1 = arith.constant 0 : i32
    %c0_i32_2 = arith.constant 0 : i32
    return %c0_i32, %c0_i32_0, %c0_i32_1 : i32, i32, i32
  }
  func.func @transform_3(%arg0: i32) -> (i32, i32, i32) {
    %c0_i32 = arith.constant 0 : i32
    %c0_i32_0 = arith.constant 0 : i32
    %c0_i32_1 = arith.constant 0 : i32
    %c0_i32_2 = arith.constant 0 : i32
    return %c0_i32, %c0_i32_0, %c0_i32_1 : i32, i32, i32
  }
  func.func @transform_4(%arg0: i32) -> (i32, i32, i32) {
    %c0_i32 = arith.constant 0 : i32
    %c0_i32_0 = arith.constant 0 : i32
    %c0_i32_1 = arith.constant 0 : i32
    %c0_i32_2 = arith.constant 0 : i32
    return %c0_i32, %c0_i32_0, %c0_i32_1 : i32, i32, i32
  }
  func.func @transform_5(%arg0: i32) -> (i32, i32, i32) {
    %c0_i32 = arith.constant 0 : i32
    %c0_i32_0 = arith.constant 0 : i32
    %c0_i32_1 = arith.constant 0 : i32
    %c0_i32_2 = arith.constant 0 : i32
    return %c0_i32, %c0_i32_0, %c0_i32_1 : i32, i32, i32
  }
  func.func @transform_6(%arg0: i32) -> (i32, i32, i32) {
    %c0_i32 = arith.constant 0 : i32
    %c0_i32_0 = arith.constant 0 : i32
    %c0_i32_1 = arith.constant 0 : i32
    %c0_i32_2 = arith.constant 0 : i32
    return %c0_i32, %c0_i32_0, %c0_i32_1 : i32, i32, i32
  }
  func.func @transform_7(%arg0: i32) -> (i32, i32, i32) {
    %c0_i32 = arith.constant 0 : i32
    %c0_i32_0 = arith.constant 0 : i32
    %c0_i32_1 = arith.constant 0 : i32
    %c0_i32_2 = arith.constant 0 : i32
    return %c0_i32, %c0_i32_0, %c0_i32_1 : i32, i32, i32
  }
  func.func @transform_8(%arg0: i32) -> (i32, i32, i32) {
    %c0_i32 = arith.constant 0 : i32
    %c0_i32_0 = arith.constant 0 : i32
    %c0_i32_1 = arith.constant 0 : i32
    %c0_i32_2 = arith.constant 0 : i32
    return %c0_i32, %c0_i32_0, %c0_i32_1 : i32, i32, i32
  }
  func.func @transform_9(%arg0: i32) -> (i32, i32, i32) {
    %c0_i32 = arith.constant 0 : i32
    %c0_i32_0 = arith.constant 0 : i32
    %c0_i32_1 = arith.constant 0 : i32
    %c0_i32_2 = arith.constant 0 : i32
    return %c0_i32, %c0_i32_0, %c0_i32_1 : i32, i32, i32
  }
  func.func @transform_10(%arg0: i32) -> (i32, i32) {
    %c0_i32 = arith.constant 0 : i32
    %c0_i32_0 = arith.constant 0 : i32
    %c0_i32_1 = arith.constant 0 : i32
    return %c0_i32, %c0_i32_0 : i32, i32
  }
  func.func @transform_11(%arg0: i32) -> (i32, i32, i32) {
    %c0_i32 = arith.constant 0 : i32
    %c0_i32_0 = arith.constant 0 : i32
    %c0_i32_1 = arith.constant 0 : i32
    %c0_i32_2 = arith.constant 0 : i32
    return %c0_i32, %c0_i32_0, %c0_i32_1 : i32, i32, i32
  }
}

</mosaic_0001>

<bundles_post_ra>
// kernel: encoder_forward.1
= control target key start
LH: loop header
LB: loop body
LE: loop exit
PB: predicated region body
PF: predicated region fallthrough
CT: control target
= control target key end

     0   :  { %vm49_vm0 = vcmask 130048   ;;  %vm122_vm1 = vcmask 261120   ;;  %s3908_s0 = inlined_call_operand.vmem [shape: f32[16,16], index: 0, kind: input, shape index: {}]   ;;  %s3909_s1 = inlined_call_operand.vmem [shape: f32[4,2,32], index: 1, kind: input, shape index: {}]   ;;  %s3910_s2 = inlined_call_operand.vmem [shape: f32[2,16,96], index: 2, kind: input, shape index: {}]   ;;  %s3911_s3 = inlined_call_operand.vmem [shape: f32[2,32,96], index: 3, kind: input, shape index: {}]   ;;  %s3912_s4 = inlined_call_operand.vmem [shape: f32[2,1,96], index: 4, kind: input, shape index: {}]   ;;  %s3913_s5 = inlined_call_operand.vmem [shape: f32[2,1,32], index: 5, kind: input, shape index: {}]   ;;  %s3914_s6 = inlined_call_operand.vmem [shape: f32[2,64,96], index: 6, kind: input, shape index: {}]   ;;  %s3915_s7 = inlined_call_operand.vmem [shape: f32[2,32,96], index: 7, kind: input, shape index: {}]   ;;  %s3916_s8 = inlined_call_operand.vmem [shape: f32[2,1,96], index: 8, kind: input, shape index: {}]   ;;  %s3917_s9 = inlined_call_operand.vmem [shape: f32[2,1,32], index: 9, kind: input, shape index: {}]   ;;  %s3918_s10 = inlined_call_operand.vmem [shape: f32[16,64], index: 10, kind: output, shape index: {0}]   ;;  %s3919_s11 = inlined_call_operand.hbm [shape: f32[4,2,32], index: 11, kind: output, shape index: {1}]  }
   0x1   :  { %v3009_v0 = vld [vmem:[%s3911_s3 + $0x18] sm:$0xff]  ;;  %v3014_v1 = vld [vmem:[%s3911_s3 + $0x10] sm:$0xff]  ;;  %v3020_v2 = vld [vmem:[%s3911_s3 + $0x8] sm:$0xff] }
   0x2   :  { %138 = vmatpush.msra.mxu2 %v3009_v0  ;;  %v3025_v3 = vld [vmem:[%s3911_s3 + $0x38] sm:$0xff]  ;;  %v44_v4 = vld [vmem:[%s3910_s2 + $0x8] sm:$0xff]  ;;  %v3034_v5 = vld [vmem:[%s3911_s3 + $0x30] sm:$0xff] }
   0x3   :  { %209 = vmatpush.msra.mxu3 %v3025_v3  ;;  %v43_v6 = vld [vmem:[%s3910_s2] sm:$0xff]  ;;  %70 = vmatpush.msra.mxu0 %v44_v4  ;;  %v3048_v8 = vld [vmem:[%s3911_s3 + $0x28] sm:$0xff]  ;;  %v2617_v14 = vld [vmem:[%s3910_s2 + $0x18] sm:$0xff] }
   0x4   :  { %139 = vmatpush.msra.mxu2 %v3014_v1  ;;  %v3043_v7 = vld [vmem:[%s3911_s3] sm:$0xff]  ;;  %v2616_v15 = vld [vmem:[%s3910_s2 + $0x10] sm:$0xff] }
   0x5   :  { %v38_v9 = vld [vmem:[%s3908_s0] sm:$0xff]  ;;  %210 = vmatpush.msra.mxu3 %v3034_v5  ;;  %71 = vmatpush.msra.mxu0 %v43_v6 }
   0x6   :  { %v3056_v10 = vld [vmem:[%s3909_s1] sm:$0x3]  ;;  %140 = vmatpush.msra.mxu2 %v3020_v2  ;;  %v3071_v13 = vld [vmem:[%s3909_s1 + $0x2] sm:$0x3]  ;;  %2614 = vmatmul.msk.f32.vlgmr.msra.gmra.mxu0 %vm49_vm0, %v38_v9 }
   0x7   :  { %v2715_v11 = vld [vmem:[%s3913_s5] ss:$0 sm:$0xff]  ;;  %211 = vmatpush.msra.mxu3 %v3048_v8 }
   0x8   :  { %v3066_v12 = vld [vmem:[%s3911_s3 + $0x20] sm:$0xff]  ;;  %141 = vmatpush.msra.mxu2 %v3043_v7  ;;  %s2941_s3 = smov 64  }
   0x9   :  { %168 = vrot.lane.b32.xlu0 %v2715_v11, %s2941_s3  ;;  %2626 = vmatmul.msk.f32.vlgmr.msra.gmra.mxu2 %vm122_vm1, %v3056_v10 }
   0xa   :  { %212 = vmatpush.msra.mxu3 %v3066_v12 }
   0xb   :  { %17 = vsyncpa [#allocation4], 0  ;;  %2628 = vmatmul.msk.f32.vlgmr.msra.gmra.mxu3 %vm122_vm1, %v3071_v13  ;;  %101 = vmatpush.msra.mxu1 %v2617_v14  ;;  %v2716_v16 = vld [vmem:[%s3913_s5 + $0x1] ss:$0 sm:$0xff]  ;;  %v39_v17 = vld [vmem:[%s3908_s0 + $0x8] sm:$0xff]  ;;  %s2942_s14 = smov 32  }
   0xc   :  { %364 = vmatpush.msrb.mxu3 %v3025_v3  ;;  %292 = vmatpush.msrb.mxu2 %v3009_v0  ;;  %v2718_v19 = vld [vmem:[%s3912_s4 + $0x1] ss:$0 sm:$0xff]  ;;  %v3148_v28 = vld [vmem:[%s3912_s4] ss:$0 sm:$0xff]  ;;  %s2943_s4 = smov 96   ;;  %vm276_vm10 = vcmask 523526  }
   0xd   :  { %102 = vmatpush.msra.mxu1 %v2616_v15  ;;  %443 = vmatpush.msrb.mxu0 %v3009_v0  ;;  %vm274_vm11 = vcmask 254976   ;;  %s2944_s0 = smov [#allocation3]   ;;  %s2599_s17 = sshll.u32 %s3919_s11, 4  ;;  %s2600_s17 = int_to_ptr.hbm [resolvable:$true] %s2599_s17 }
   0xe   :  { %2619 = vmatmul.msk.f32.vlgmr.msra.gmra.mxu1 %vm49_vm0, %v38_v9  ;;  %365 = vmatpush.msrb.mxu3 %v3034_v5  ;;  %s2597_s13 = sshll.u32 %s2944_s0, 4  ;;  %s2945_s18 = smov 2   ;;  %s2598_s13 = int_to_ptr.vmem [resolvable:$true] %s2597_s13 }
   0xf   :  { %293 = vmatpush.msrb.mxu2 %v3014_v1  ;;  %515 = vmatpush.msrb.mxu1 %v3025_v3 }
  0x10   :  { %366 = vmatpush.msrb.mxu3 %v3048_v8  ;;  %444 = vmatpush.msrb.mxu0 %v3014_v1 }
  0x11   :  { %242 = vrot.lane.b32.xlu0 %v2716_v16, %s2941_s3  ;;  %294 = vmatpush.msrb.mxu2 %v3020_v2  ;;  %v264_v16 = vrot.slane %v3071_v13, 2 }
  0x12   :  { %367 = vmatpush.msrb.mxu3 %v3066_v12  ;;  %516 = vmatpush.msrb.mxu1 %v3034_v5 }
  0x13   :  { %295 = vmatpush.msrb.mxu2 %v3043_v7  ;;  %2615 = vmatmul.msk.f32.gmra.mxu0 %vm49_vm0, %v39_v17 }
  0x14   :  { %517 = vmatpush.msrb.mxu1 %v3048_v8  ;;  %445 = vmatpush.msrb.mxu0 %v3020_v2 }
  0x15   :  { %594 = vmatpush.msra.mxu2 %v3009_v0  ;;  %666 = vmatpush.msra.mxu3 %v3025_v3 }
  0x16   :  { %2620 = vmatmul.msk.f32.gmra.mxu1 %vm49_vm0, %v39_v17  ;;  %446 = vmatpush.msrb.mxu0 %v3043_v7 }
  0x17   :  { %518 = vmatpush.msrb.mxu1 %v3066_v12  ;;  %595 = vmatpush.msra.mxu2 %v3014_v1 }
  0x18   :  { %667 = vmatpush.msra.mxu3 %v3034_v5  ;;  %740 = vmatpush.msra.mxu0 %v3009_v0 }
  0x19   :  { %806 = vmatpush.msra.mxu1 %v3025_v3  ;;  %596 = vmatpush.msra.mxu2 %v3020_v2 }
  0x1a   :  { %668 = vmatpush.msra.mxu3 %v3048_v8  ;;  %741 = vmatpush.msra.mxu0 %v3014_v1 }
  0x1b   :  { %807 = vmatpush.msra.mxu1 %v3034_v5  ;;  %597 = vmatpush.msra.mxu2 %v3043_v7 }
  0x1c   :  { %669 = vmatpush.msra.mxu3 %v3066_v12  ;;  %742 = vmatpush.msra.mxu0 %v3020_v2 }
  0x1d   :  { %808 = vmatpush.msra.mxu1 %v3048_v8 }
  0x1e   :  { %743 = vmatpush.msra.mxu0 %v3043_v7 }
  0x1f   :  { %809 = vmatpush.msra.mxu1 %v3066_v12 }
  0x7b   :  { %v3130_v18 = vpop.permute.xlu0 %168 }
  0x83   :  { %v3137_v23 = vpop.permute.xlu0 %242  ;;  %v73_v29 = vpop.f32.mrf.mxu0 }
  0x84   :  { %v3151_v30 = vadd.f32 %v3148_v28, %v73_v29 }
  0x8b   :  { %v104_v20 = vpop.f32.mrf.mxu1 }
  0x8c   :  { %v3135_v21 = vadd.f32 %v2718_v19, %v104_v20  ;;  %v143_v22 = vpop.f32.mrf.mxu2 }
  0x8d   :  { %v171_v24 = vadd.f32 %v3130_v18, %v143_v22  ;;  %v146_v31 = vadd.f32 %v143_v22, %v3151_v30 }
  0x8e   :  { %v214_v25 = vpop.f32.mrf.mxu3 }
  0x8f   :  { %173 = vrot.lane.b32.xlu1 %v171_v24, %s2941_s3  ;;  %v245_v26 = vadd.f32 %v3137_v23, %v214_v25  ;;  %v2627_v33 = vmul.f32 -1.442695, %v146_v31  ;;  %v218_v34 = vrot.slane %v214_v25, 2 }
  0x91   :  { %v247_v27 = vrot.slane %v245_v26, 2  ;;  %2723 = vpow2.f32 %v2627_v33 }
  0x93   :  { %v107_v32 = vpop.f32.mrf.mxu1 }
  0x94   :  { %v3154_v35 = vadd.f32 %v2718_v19, %v107_v32 }
  0x96   :  { %v220_v36 = vadd.f32 %v218_v34, %v3154_v35 }
  0x97   :  { %248 = vrot.lane.b32.xlu1 %v247_v27, %s2941_s3  ;;  %v2724_v38 = vpop.eup %2723 }
  0x98   :  { %v2629_v37 = vmul.f32 -1.442695, %v220_v36  ;;  %v150_v39 = vadd.f32 1.0, %v2724_v38 }
  0x9a   :  { %2725 = vpow2.f32 %v2629_v37  ;;  %v162_v50 = vand.u32 2147483648, %v150_v39  ;;  %vm156_vm3 = vweird.f32 %v150_v39  ;;  %v160_v51 = vand.u32 2147483647, %v150_v39 }
  0x9b   :  { %2727 = vrcp.f32 %v150_v39 }
  0x9c   :  { %v163_v54 = vor.u32 1.1754944e-38, %v162_v50  ;;  %vm161_vm5 = vcmp.eq.f32.partialorder %v160_v51, 8.507059e+37 }
  0x9f   :  { %189 = vrot.lane.b32.xlu1 %v3056_v10, %s2942_s14 }
  0xa0   :  { %v2726_v40 = vpop.eup %2725 }
  0xa1   :  { %v224_v41 = vadd.f32 1.0, %v2726_v40  ;;  %v2728_v42 = vpop.eup %2727 }
  0xa2   :  { %v152_v43 = vmul.f32 %v2728_v42, %v150_v39  ;;  %vm157_vm2 = vweird.f32 %v2728_v42 }
  0xa3   :  { %2729 = vrcp.f32 %v224_v41  ;;  %vm158_vm4 = vmor %vm156_vm3, %vm157_vm2  ;;  %vm230_vm6 = vweird.f32 %v224_v41  ;;  %v236_v57 = vand.u32 2147483648, %v224_v41  ;;  %v234_v60 = vand.u32 2147483647, %v224_v41 }
  0xa4   :  { %v153_v44 = vsub.f32 1.0, %v152_v43 }
  0xa5   :  { %v237_v61 = vor.u32 1.1754944e-38, %v236_v57  ;;  %vm235_vm9 = vcmp.eq.f32.partialorder %v234_v60, 8.507059e+37 }
  0xa6   :  { %v154_v46 = vmul.f32 %v2728_v42, %v153_v44 }
  0xa8   :  { %v155_v48 = vadd.f32 %v2728_v42, %v154_v46 }
  0xa9   :  { %v2730_v45 = vpop.eup %2729 }
  0xaa   :  { %v226_v47 = vmul.f32 %v2730_v45, %v224_v41  ;;  %v159_v52 = vsel %vm158_vm4, %v2728_v42, %v155_v48  ;;  %vm231_vm7 = vweird.f32 %v2730_v45 }
  0xab   :  { %v164_v56 = vsel %vm161_vm5, %v163_v54, %v159_v52  ;;  %vm232_vm8 = vmor %vm230_vm6, %vm231_vm7  ;;  %vm3920_vm5 = vcmask 521476  }
  0xac   :  { %v227_v49 = vsub.f32 1.0, %v226_v47  ;;  %v183_v20 = vsub.f32 1.0, %v164_v56 }
  0xae   :  { %v228_v53 = vmul.f32 %v2730_v45, %v227_v49 }
  0xb0   :  { %v229_v59 = vadd.f32 %v2730_v45, %v228_v53 }
  0xb2   :  { %v233_v62 = vsel %vm232_vm8, %v2730_v45, %v229_v59 }
  0xb3   :  { %v238_v4 = vsel %vm235_vm9, %v237_v61, %v233_v62 }
  0xb4   :  { %v258_v29 = vsub.f32 1.0, %v238_v4 }
 0x101   :  { %v174_v55 = vpop.permute.xlu1 %173 }
 0x102   :  { %v176_v58 = vmul.f32 %v174_v55, %v164_v56 }
 0x104   :  { %178 = vrot.lane.b32.xlu2 %v176_v58, %s2941_s3 }
 0x109   :  { %v249_v63 = vpop.permute.xlu1 %248 }
 0x10a   :  { %v251_v6 = vmul.f32 %v249_v63, %v238_v4 }
 0x10c   :  { %253 = vrot.lane.b32.xlu2 %v251_v6, %s2941_s3 }
 0x111   :  { %v190_v19 = vpop.permute.xlu1 %189 }
 0x112   :  { %v192_v24 = vmul.f32 %v190_v19, %v164_v56 }
 0x15e   :  { %v179_v9 = vpop.permute.xlu2 %178 }
 0x15f   :  { %v181_v10 = vadd.f32 %v179_v9, %v3151_v30 }
 0x161   :  { %2731 = vtanh.f32 %v181_v10 }
 0x166   :  { %v254_v11 = vpop.permute.xlu2 %253 }
 0x167   :  { %v2732_v14 = vpop.eup %2731  ;;  %v256_v15 = vadd.f32 %v254_v11, %v3154_v35 }
 0x168   :  { %185 = vrot.lane.b32.xlu0 %v2732_v14, %s2943_s4 }
 0x169   :  { %2733 = vtanh.f32 %v256_v15 }
 0x16f   :  { %v2734_v17 = vpop.eup %2733 }
 0x170   :  { %265 = vrot.lane.b32.xlu0 %v264_v16, %s2942_s14  ;;  %260 = vrot.lane.b32.xlu2 %v2734_v17, %s2943_s4 }
 0x1ca   :  { %v261_v27 = vpop.permute.xlu2 %260 }
 0x1cb   :  { %v263_v32 = vmul.f32 %v261_v27, %v258_v29 }
 0x1da   :  { %v186_v22 = vpop.permute.xlu0 %185 }
 0x1db   :  { %v188_v25 = vmul.f32 %v186_v22, %v183_v20 }
 0x1dd   :  { %v3165_v26 = vadd.f32 %v192_v24, %v188_v25 }
 0x1df   :  { %271 = vrot.lane.b32.xlu1 %v3165_v26, %s2943_s4 }
 0x1e2   :  { %v266_v31 = vpop.permute.xlu0 %265 }
 0x1e3   :  { %v268_v13 = vmul.f32 %v266_v31, %v238_v4 }
 0x1e5   :  { %v3169_v33 = vadd.f32 %v268_v13, %v263_v32 }
 0x1e7   :  { %v347_v34 = vrot.slane %v3169_v33, 6  ;;  %277 = vst.msk [vmem:[#allocation2 + $0x8] sm:$0xc0] %vm276_vm10, %v3169_v33 }
 0x1e9   :  { %348 = vrot.lane.b32.xlu2 %v347_v34, %s2943_s4 }
 0x243   :  { %v349_v36 = vpop.permute.xlu2 %348 }
 0x244   :  { %2632 = vmatmul.msk.f32.vlgmr.msrb.gmra.mxu3 %vm122_vm1, %v349_v36 }
 0x245   :  { %952 = vmatpush.msrb.mxu3 %v3025_v3 }
 0x247   :  { %953 = vmatpush.msrb.mxu3 %v3034_v5 }
 0x249   :  { %954 = vmatpush.msrb.mxu3 %v3048_v8 }
 0x24b   :  { %955 = vmatpush.msrb.mxu3 %v3066_v12 }
 0x251   :  { %v272_v37 = vpop.permute.xlu1 %271 }
 0x252   :  { %275 = vst.msk [vmem:[#allocation2] sm:$0x3] %vm274_vm11, %v272_v37  ;;  %2630 = vmatmul.msk.f32.vlgmr.msrb.gmra.mxu2 %vm122_vm1, %v272_v37  ;;  %v414_v37 = vrot.slane %v3169_v33, 2 }
 0x253   :  { %880 = vmatpush.msrb.mxu2 %v3009_v0 }
 0x255   :  { %881 = vmatpush.msrb.mxu2 %v3014_v1 }
 0x257   :  { %882 = vmatpush.msrb.mxu2 %v3020_v2 }
 0x259   :  { %883 = vmatpush.msrb.mxu2 %v3043_v7 }
 0x2c7   :  { %v369_v38 = vpop.f32.mrf.mxu3 }
 0x2c8   :  { %v395_v39 = vadd.f32 %v369_v38, %v3137_v23  ;;  %v373_v44 = vrot.slane %v369_v38, 4 }
 0x2ca   :  { %v397_v40 = vrot.slane %v395_v39, 4  ;;  %v375_v45 = vadd.f32 %v373_v44, %v3154_v35 }
 0x2cc   :  { %398 = vrot.lane.b32.xlu1 %v397_v40, %s2941_s3  ;;  %v2633_v46 = vmul.f32 -1.442695, %v375_v45 }
 0x2ce   :  { %2735 = vpow2.f32 %v2633_v46 }
 0x2d4   :  { %v2736_v48 = vpop.eup %2735 }
 0x2d5   :  { %v297_v41 = vpop.f32.mrf.mxu2  ;;  %v379_v50 = vadd.f32 1.0, %v2736_v48 }
 0x2d6   :  { %v323_v42 = vadd.f32 %v297_v41, %v3130_v18  ;;  %v301_v47 = vrot.slane %v297_v41, 6 }
 0x2d7   :  { %2737 = vrcp.f32 %v379_v50  ;;  %v391_v60 = vand.u32 2147483648, %v379_v50  ;;  %vm385_vm13 = vweird.f32 %v379_v50  ;;  %v389_v61 = vand.u32 2147483647, %v379_v50 }
 0x2d8   :  { %v325_v43 = vrot.slane %v323_v42, 6  ;;  %v303_v49 = vadd.f32 %v301_v47, %v3151_v30 }
 0x2d9   :  { %v392_v4 = vor.u32 1.1754944e-38, %v391_v60  ;;  %vm390_vm15 = vcmp.eq.f32.partialorder %v389_v61, 8.507059e+37 }
 0x2da   :  { %326 = vrot.lane.b32.xlu0 %v325_v43, %s2941_s3  ;;  %v2631_v51 = vmul.f32 -1.442695, %v303_v49  ;;  %v342_v43 = vrot.slane %v3165_v26, 6 }
 0x2dc   :  { %2739 = vpow2.f32 %v2631_v51 }
 0x2dd   :  { %v2738_v52 = vpop.eup %2737 }
 0x2de   :  { %v381_v54 = vmul.f32 %v2738_v52, %v379_v50  ;;  %vm386_vm12 = vweird.f32 %v2738_v52 }
 0x2df   :  { %vm387_vm14 = vmor %vm385_vm13, %vm386_vm12 }
 0x2e0   :  { %v382_v56 = vsub.f32 1.0, %v381_v54 }
 0x2e2   :  { %v2740_v53 = vpop.eup %2739  ;;  %v383_v57 = vmul.f32 %v2738_v52, %v382_v56 }
 0x2e3   :  { %v307_v55 = vadd.f32 1.0, %v2740_v53  ;;  %v3221_v53 = vpop.f32.mrf.mxu0 }
 0x2e4   :  { %v384_v59 = vadd.f32 %v2738_v52, %v383_v57 }
 0x2e5   :  { %2741 = vrcp.f32 %v307_v55  ;;  %v319_v16 = vand.u32 2147483648, %v307_v55  ;;  %vm313_vm2 = vweird.f32 %v307_v55  ;;  %v317_v17 = vand.u32 2147483647, %v307_v55 }
 0x2e6   :  { %v388_v63 = vsel %vm387_vm14, %v2738_v52, %v384_v59 }
 0x2e7   :  { %v393_v10 = vsel %vm390_vm15, %v392_v4, %v388_v63  ;;  %v320_v20 = vor.u32 1.1754944e-38, %v319_v16  ;;  %vm318_vm4 = vcmp.eq.f32.partialorder %v317_v17, 8.507059e+37 }
 0x2e8   :  { %v408_v36 = vsub.f32 1.0, %v393_v10  ;;  %v416_v39 = vmul.f32 %v414_v37, %v393_v10 }
 0x2eb   :  { %v2742_v58 = vpop.eup %2741 }
 0x2ec   :  { %v309_v62 = vmul.f32 %v2742_v58, %v307_v55  ;;  %vm314_vm0 = vweird.f32 %v2742_v58 }
 0x2ed   :  { %vm315_vm3 = vmor %vm313_vm2, %vm314_vm0  ;;  %vm575_vm0 = vcmask 519426  }
 0x2ee   :  { %v310_v6 = vsub.f32 1.0, %v309_v62 }
 0x2f0   :  { %v311_v14 = vmul.f32 %v2742_v58, %v310_v6 }
 0x2f2   :  { %v312_v15 = vadd.f32 %v2742_v58, %v311_v14 }
 0x2f4   :  { %v316_v19 = vsel %vm315_vm3, %v2742_v58, %v312_v15 }
 0x2f5   :  { %v321_v22 = vsel %vm318_vm4, %v320_v20, %v316_v19 }
 0x2f6   :  { %v336_v44 = vsub.f32 1.0, %v321_v22  ;;  %v344_v46 = vmul.f32 %v342_v43, %v321_v22 }
 0x33e   :  { %v399_v9 = vpop.permute.xlu1 %398 }
 0x33f   :  { %v401_v11 = vmul.f32 %v399_v9, %v393_v10 }
 0x341   :  { %403 = vrot.lane.b32.xlu0 %v401_v11, %s2941_s3 }
 0x34c   :  { %v327_v24 = vpop.permute.xlu0 %326 }
 0x34d   :  { %v329_v25 = vmul.f32 %v327_v24, %v321_v22 }
 0x34f   :  { %331 = vrot.lane.b32.xlu2 %v329_v25, %s2941_s3 }
 0x3a9   :  { %v332_v27 = vpop.permute.xlu2 %331 }
 0x3aa   :  { %v334_v29 = vadd.f32 %v332_v27, %v3151_v30 }
 0x3ac   :  { %2743 = vtanh.f32 %v334_v29 }
 0x3b2   :  { %v2744_v31 = vpop.eup %2743 }
 0x3b3   :  { %v404_v32 = vpop.permute.xlu0 %403  ;;  %338 = vrot.lane.b32.xlu1 %v2744_v31, %s2943_s4 }
 0x3b4   :  { %v406_v13 = vadd.f32 %v404_v32, %v3154_v35 }
 0x3b6   :  { %2745 = vtanh.f32 %v406_v13 }
 0x3bc   :  { %v2746_v34 = vpop.eup %2745 }
 0x3bd   :  { %410 = vrot.lane.b32.xlu2 %v2746_v34, %s2943_s4 }
 0x417   :  { %v411_v38 = vpop.permute.xlu2 %410 }
 0x418   :  { %v413_v40 = vmul.f32 %v411_v38, %v408_v36 }
 0x41a   :  { %v3199_v41 = vadd.f32 %v416_v39, %v413_v40 }
 0x41c   :  { %v498_v42 = vrot.slane %v3199_v41, 4  ;;  %425 = vst.msk [vmem:[#allocation2 + $0x8] sm:$0x30] %vm3920_vm5, %v3199_v41 }
 0x41e   :  { %499 = vrot.lane.b32.xlu1 %v498_v42, %s2943_s4 }
 0x425   :  { %v339_v45 = vpop.permute.xlu1 %338 }
 0x426   :  { %v341_v47 = vmul.f32 %v339_v45, %v336_v44 }
 0x428   :  { %v3206_v33 = vadd.f32 %v344_v46, %v341_v47 }
 0x42a   :  { %v426_v48 = vrot.slane %v3206_v33, 2 }
 0x42c   :  { %427 = vrot.lane.b32.xlu0 %v426_v48, %s2943_s4 }
 0x490   :  { %v500_v49 = vpop.permute.xlu1 %499 }
 0x491   :  { %2636 = vmatmul.msk.f32.vlgmr.msrb.gmra.mxu1 %vm122_vm1, %v500_v49 }
 0x492   :  { %1101 = vmatpush.msrb.mxu1 %v3025_v3 }
 0x494   :  { %1102 = vmatpush.msrb.mxu1 %v3034_v5 }
 0x496   :  { %1103 = vmatpush.msrb.mxu1 %v3048_v8 }
 0x498   :  { %1104 = vmatpush.msrb.mxu1 %v3066_v12 }
 0x49e   :  { %v428_v26 = vpop.permute.xlu0 %427 }
 0x49f   :  { %2634 = vmatmul.msk.f32.vlgmr.msrb.gmra.mxu0 %vm122_vm1, %v428_v26 }
 0x4a0   :  { %1029 = vmatpush.msrb.mxu0 %v3009_v0 }
 0x4a2   :  { %1030 = vmatpush.msrb.mxu0 %v3014_v1 }
 0x4a4   :  { %1031 = vmatpush.msrb.mxu0 %v3020_v2 }
 0x4a6   :  { %1032 = vmatpush.msrb.mxu0 %v3043_v7 }
 0x50e   :  { %v520_v50 = vpop.f32.mrf.mxu1 }
 0x50f   :  { %v546_v51 = vadd.f32 %v520_v50, %v3137_v23  ;;  %v524_v60 = vrot.slane %v520_v50, 6  ;;  %v565_v50 = vrot.slane %v3199_v41, 2 }
 0x511   :  { %v548_v52 = vrot.slane %v546_v51, 6  ;;  %v526_v61 = vadd.f32 %v524_v60, %v3154_v35 }
 0x513   :  { %549 = vrot.lane.b32.xlu0 %v548_v52, %s2941_s3  ;;  %v2637_v63 = vmul.f32 -1.442695, %v526_v61 }
 0x51c   :  { %v448_v54 = vpop.f32.mrf.mxu0 }
 0x51d   :  { %v474_v55 = vadd.f32 %v448_v54, %v3130_v18  ;;  %v452_v57 = vrot.slane %v448_v54, 4 }
 0x51f   :  { %v476_v56 = vrot.slane %v474_v55, 4  ;;  %v454_v58 = vadd.f32 %v452_v57, %v3151_v30 }
 0x521   :  { %477 = vrot.lane.b32.xlu2 %v476_v56, %s2941_s3  ;;  %v2635_v59 = vmul.f32 -1.442695, %v454_v58  ;;  %v493_v58 = vrot.slane %v3206_v33, 6 }
 0x523   :  { %2747 = vpow2.f32 %v2635_v59 }
 0x524   :  { %2749 = vpow2.f32 %v2637_v63 }
 0x529   :  { %v2748_v62 = vpop.eup %2747 }
 0x52a   :  { %v458_v4 = vadd.f32 1.0, %v2748_v62  ;;  %v2750_v6 = vpop.eup %2749 }
 0x52b   :  { %v530_v10 = vadd.f32 1.0, %v2750_v6 }
 0x52c   :  { %2751 = vrcp.f32 %v458_v4  ;;  %v470_v20 = vand.u32 2147483648, %v458_v4  ;;  %vm464_vm7 = vweird.f32 %v458_v4  ;;  %v468_v22 = vand.u32 2147483647, %v458_v4 }
 0x52d   :  { %2753 = vrcp.f32 %v530_v10  ;;  %v542_v36 = vand.u32 2147483648, %v530_v10  ;;  %vm536_vm13 = vweird.f32 %v530_v10  ;;  %v540_v37 = vand.u32 2147483647, %v530_v10 }
 0x52e   :  { %v471_v27 = vor.u32 1.1754944e-38, %v470_v20  ;;  %vm469_vm9 = vcmp.eq.f32.partialorder %v468_v22, 8.507059e+37 }
 0x52f   :  { %v543_v39 = vor.u32 1.1754944e-38, %v542_v36  ;;  %vm541_vm15 = vcmp.eq.f32.partialorder %v540_v37, 8.507059e+37 }
 0x532   :  { %v2752_v9 = vpop.eup %2751 }
 0x533   :  { %v460_v11 = vmul.f32 %v2752_v9, %v458_v4  ;;  %v2754_v15 = vpop.eup %2753  ;;  %vm465_vm6 = vweird.f32 %v2752_v9 }
 0x534   :  { %v532_v17 = vmul.f32 %v2754_v15, %v530_v10  ;;  %vm466_vm8 = vmor %vm464_vm7, %vm465_vm6  ;;  %vm537_vm12 = vweird.f32 %v2754_v15 }
 0x535   :  { %v461_v14 = vsub.f32 1.0, %v460_v11  ;;  %vm538_vm14 = vmor %vm536_vm13, %vm537_vm12  ;;  %vm721_vm13 = vcmask 517376  }
 0x536   :  { %v533_v24 = vsub.f32 1.0, %v532_v17 }
 0x537   :  { %v462_v16 = vmul.f32 %v2752_v9, %v461_v14 }
 0x538   :  { %v534_v29 = vmul.f32 %v2754_v15, %v533_v24 }
 0x539   :  { %v463_v19 = vadd.f32 %v2752_v9, %v462_v16 }
 0x53a   :  { %v535_v34 = vadd.f32 %v2754_v15, %v534_v29 }
 0x53b   :  { %v467_v25 = vsel %vm466_vm8, %v2752_v9, %v463_v19 }
 0x53c   :  { %v472_v31 = vsel %vm469_vm9, %v471_v27, %v467_v25  ;;  %v539_v38 = vsel %vm538_vm14, %v2754_v15, %v535_v34 }
 0x53d   :  { %v544_v42 = vsel %vm541_vm15, %v543_v39, %v539_v38  ;;  %v487_v57 = vsub.f32 1.0, %v472_v31  ;;  %v495_v41 = vmul.f32 %v493_v58, %v472_v31 }
 0x53e   :  { %v559_v26 = vsub.f32 1.0, %v544_v42  ;;  %v567_v52 = vmul.f32 %v565_v50, %v544_v42 }
 0x57b   :  { %v478_v32 = vpop.permute.xlu2 %477 }
 0x57c   :  { %v480_v13 = vmul.f32 %v478_v32, %v472_v31 }
 0x57e   :  { %482 = vrot.lane.b32.xlu1 %v480_v13, %s2941_s3 }
 0x585   :  { %v550_v40 = vpop.permute.xlu0 %549 }
 0x586   :  { %v552_v43 = vmul.f32 %v550_v40, %v544_v42 }
 0x588   :  { %554 = vrot.lane.b32.xlu2 %v552_v43, %s2941_s3 }
 0x5e2   :  { %v555_v44 = vpop.permute.xlu2 %554 }
 0x5e3   :  { %v557_v45 = vadd.f32 %v555_v44, %v3154_v35 }
 0x5e5   :  { %2755 = vtanh.f32 %v557_v45 }
 0x5eb   :  { %v2756_v46 = vpop.eup %2755 }
 0x5ec   :  { %561 = vrot.lane.b32.xlu1 %v2756_v46, %s2943_s4 }
 0x5f0   :  { %v483_v47 = vpop.permute.xlu1 %482 }
 0x5f1   :  { %v485_v48 = vadd.f32 %v483_v47, %v3151_v30 }
 0x5f3   :  { %2757 = vtanh.f32 %v485_v48 }
 0x5f9   :  { %v2758_v49 = vpop.eup %2757 }
 0x5fa   :  { %489 = vrot.lane.b32.xlu0 %v2758_v49, %s2943_s4 }
 0x65e   :  { %v562_v51 = vpop.permute.xlu1 %561 }
 0x65f   :  { %v564_v54 = vmul.f32 %v562_v51, %v559_v26 }
 0x661   :  { %v3235_v55 = vadd.f32 %v567_v52, %v564_v54 }
 0x663   :  { %v649_v56 = vrot.slane %v3235_v55, 2  ;;  %576 = vst.msk [vmem:[#allocation2 + $0x8] sm:$0xc] %vm575_vm0, %v3235_v55 }
 0x665   :  { %650 = vrot.lane.b32.xlu0 %v649_v56, %s2943_s4 }
 0x66c   :  { %v490_v59 = vpop.permute.xlu0 %489 }
 0x66d   :  { %v492_v60 = vmul.f32 %v490_v59, %v487_v57 }
 0x66f   :  { %v3244_v61 = vadd.f32 %v495_v41, %v492_v60 }
 0x671   :  { %v577_v62 = vrot.slane %v3244_v61, 4  ;;  %v644_v57 = vrot.slane %v3244_v61, 6 }
 0x673   :  { %578 = vrot.lane.b32.xlu2 %v577_v62, %s2943_s4 }
 0x6cd   :  { %v579_v63 = vpop.permute.xlu2 %578 }
 0x6ce   :  { %2638 = vmatmul.msk.f32.vlgmr.msra.gmra.mxu2 %vm122_vm1, %v579_v63 }
 0x6cf   :  { %1178 = vmatpush.msra.mxu2 %v3009_v0 }
 0x6d1   :  { %1179 = vmatpush.msra.mxu2 %v3014_v1 }
 0x6d3   :  { %1180 = vmatpush.msra.mxu2 %v3020_v2 }
 0x6d5   :  { %1181 = vmatpush.msra.mxu2 %v3043_v7 }
 0x6d7   :  { %v651_v4 = vpop.permute.xlu0 %650 }
 0x6d8   :  { %2640 = vmatmul.msk.f32.vlgmr.msra.gmra.mxu3 %vm122_vm1, %v651_v4 }
 0x6d9   :  { %1250 = vmatpush.msra.mxu3 %v3025_v3 }
 0x6db   :  { %1251 = vmatpush.msra.mxu3 %v3034_v5 }
 0x6dd   :  { %1252 = vmatpush.msra.mxu3 %v3048_v8 }
 0x6df   :  { %1253 = vmatpush.msra.mxu3 %v3066_v12 }
 0x751   :  { %v599_v6 = vpop.f32.mrf.mxu2 }
 0x752   :  { %v625_v0 = vadd.f32 %v599_v6, %v3130_v18  ;;  %v603_v5 = vrot.slane %v599_v6, 2 }
 0x754   :  { %v627_v9 = vrot.slane %v625_v0, 2  ;;  %v605_v8 = vadd.f32 %v603_v5, %v3151_v30 }
 0x756   :  { %628 = vrot.lane.b32.xlu1 %v627_v9, %s2941_s3  ;;  %v2639_v11 = vmul.f32 -1.442695, %v605_v8 }
 0x75b   :  { %v671_v1 = vpop.f32.mrf.mxu3 }
 0x75c   :  { %v694_v2 = vadd.f32 %v671_v1, %v3137_v23  ;;  %v674_v7 = vadd.f32 %v671_v1, %v3154_v35 }
 0x75e   :  { %696 = vrot.lane.b32.xlu2 %v694_v2, %s2941_s3  ;;  %v2641_v3 = vmul.f32 -1.442695, %v674_v7 }
 0x760   :  { %2759 = vpow2.f32 %v2641_v3 }
 0x766   :  { %v2760_v10 = vpop.eup %2759 }
 0x767   :  { %v678_v12 = vadd.f32 1.0, %v2760_v10 }
 0x769   :  { %2761 = vrcp.f32 %v678_v12  ;;  %v690_v25 = vand.u32 2147483648, %v678_v12  ;;  %vm684_vm3 = vweird.f32 %v678_v12  ;;  %v688_v27 = vand.u32 2147483647, %v678_v12 }
 0x76a   :  { %2763 = vpow2.f32 %v2639_v11 }
 0x76b   :  { %v691_v32 = vor.u32 1.1754944e-38, %v690_v25  ;;  %vm689_vm6 = vcmp.eq.f32.partialorder %v688_v27, 8.507059e+37 }
 0x76f   :  { %v2762_v14 = vpop.eup %2761 }
 0x770   :  { %v2764_v15 = vpop.eup %2763  ;;  %v680_v16 = vmul.f32 %v2762_v14, %v678_v12  ;;  %vm685_vm2 = vweird.f32 %v2762_v14  ;;  %v3294_v12 = vadd.f32 %v3148_v28, %v3221_v53 }
 0x771   :  { %v609_v17 = vadd.f32 1.0, %v2764_v15  ;;  %vm686_vm4 = vmor %vm684_vm3, %vm685_vm2 }
 0x772   :  { %v681_v19 = vsub.f32 1.0, %v680_v16 }
 0x773   :  { %2765 = vrcp.f32 %v609_v17  ;;  %v621_v40 = vand.u32 2147483648, %v609_v17  ;;  %vm615_vm8 = vweird.f32 %v609_v17  ;;  %v619_v42 = vand.u32 2147483647, %v609_v17 }
 0x774   :  { %v682_v20 = vmul.f32 %v2762_v14, %v681_v19 }
 0x775   :  { %v622_v44 = vor.u32 1.1754944e-38, %v621_v40  ;;  %vm620_vm12 = vcmp.eq.f32.partialorder %v619_v42, 8.507059e+37 }
 0x776   :  { %v683_v22 = vadd.f32 %v2762_v14, %v682_v20 }
 0x778   :  { %v687_v29 = vsel %vm686_vm4, %v2762_v14, %v683_v22 }
 0x779   :  { %v2766_v24 = vpop.eup %2765  ;;  %v692_v13 = vsel %vm689_vm6, %v691_v32, %v687_v29 }
 0x77a   :  { %v611_v31 = vmul.f32 %v2766_v24, %v609_v17  ;;  %vm616_vm7 = vweird.f32 %v2766_v24  ;;  %v706_v62 = vsub.f32 1.0, %v692_v13  ;;  %v713_v63 = vmul.f32 %v692_v13, %v649_v56 }
 0x77b   :  { %vm617_vm9 = vmor %vm615_vm8, %vm616_vm7 }
 0x77c   :  { %v612_v37 = vsub.f32 1.0, %v611_v31 }
 0x77e   :  { %v613_v38 = vmul.f32 %v2766_v24, %v612_v37 }
 0x780   :  { %v614_v39 = vadd.f32 %v2766_v24, %v613_v38 }
 0x782   :  { %v618_v43 = vsel %vm617_vm9, %v2766_v24, %v614_v39 }
 0x783   :  { %v623_v46 = vsel %vm620_vm12, %v622_v44, %v618_v43 }
 0x784   :  { %v638_v54 = vsub.f32 1.0, %v623_v46  ;;  %v646_v59 = vmul.f32 %v644_v57, %v623_v46 }
 0x7b8   :  { %v697_v34 = vpop.permute.xlu2 %696 }
 0x7b9   :  { %v699_v36 = vmul.f32 %v697_v34, %v692_v13 }
 0x7bb   :  { %701 = vrot.lane.b32.xlu1 %v699_v36, %s2941_s3 }
 0x7c8   :  { %v629_v45 = vpop.permute.xlu1 %628 }
 0x7c9   :  { %v631_v47 = vmul.f32 %v629_v45, %v623_v46 }
 0x7cb   :  { %633 = vrot.lane.b32.xlu0 %v631_v47, %s2941_s3 }
 0x82d   :  { %v702_v48 = vpop.permute.xlu1 %701 }
 0x82e   :  { %v704_v49 = vadd.f32 %v702_v48, %v3154_v35 }
 0x830   :  { %2767 = vtanh.f32 %v704_v49 }
 0x836   :  { %v2768_v26 = vpop.eup %2767 }
 0x837   :  { %708 = vrot.lane.b32.xlu0 %v2768_v26, %s2943_s4 }
 0x83d   :  { %v634_v50 = vpop.permute.xlu0 %633 }
 0x83e   :  { %v636_v51 = vadd.f32 %v634_v50, %v3151_v30 }
 0x840   :  { %2769 = vtanh.f32 %v636_v51 }
 0x846   :  { %v2770_v52 = vpop.eup %2769 }
 0x847   :  { %640 = vrot.lane.b32.xlu2 %v2770_v52, %s2943_s4 }
 0x8a1   :  { %v641_v58 = vpop.permute.xlu2 %640 }
 0x8a2   :  { %v643_v41 = vmul.f32 %v641_v58, %v638_v54 }
 0x8a4   :  { %v3271_v60 = vadd.f32 %v646_v59, %v643_v41 }
 0x8a6   :  { %v723_v35 = vrot.slane %v3271_v60, 6 }
 0x8a8   :  { %724 = vrot.lane.b32.xlu1 %v723_v35, %s2943_s4 }
 0x8a9   :  { %v709_v30 = vpop.permute.xlu0 %708 }
 0x8aa   :  { %v711_v4 = vmul.f32 %v709_v30, %v706_v62 }
 0x8ac   :  { %v3279_v6 = vadd.f32 %v713_v63, %v711_v4 }
 0x8ae   :  { %790 = vrot.lane.b32.xlu2 %v3279_v6, %s2943_s4  ;;  %722 = vst.msk [vmem:[#allocation2 + $0x8] sm:$0x3] %vm721_vm13, %v3279_v6  ;;  %v856_v57 = vrot.slane %v3279_v6, 2 }
 0x908   :  { %v791_v0 = vpop.permute.xlu2 %790 }
 0x909   :  { %2644 = vmatmul.msk.f32.vlgmr.msra.gmra.mxu1 %vm122_vm1, %v791_v0 }
 0x91a   :  { %v725_v9 = vpop.permute.xlu1 %724 }
 0x91b   :  { %2642 = vmatmul.msk.f32.vlgmr.msra.gmra.mxu0 %vm122_vm1, %v725_v9 }
 0x986   :  { %v811_v1 = vpop.f32.mrf.mxu1 }
 0x987   :  { %v837_v55 = vadd.f32 %v811_v1, %v3137_v23  ;;  %v815_v3 = vrot.slane %v811_v1, 2 }
 0x989   :  { %v839_v56 = vrot.slane %v837_v55, 2  ;;  %v817_v5 = vadd.f32 %v815_v3, %v3135_v21 }
 0x98b   :  { %840 = vrot.lane.b32.xlu1 %v839_v56, %s2941_s3  ;;  %v2645_v10 = vmul.f32 -1.442695, %v817_v5 }
 0x98d   :  { %2771 = vpow2.f32 %v2645_v10 }
 0x993   :  { %v2772_v8 = vpop.eup %2771 }
 0x994   :  { %v821_v14 = vadd.f32 1.0, %v2772_v8 }
 0x996   :  { %2773 = vrcp.f32 %v821_v14  ;;  %v833_v29 = vand.u32 2147483648, %v821_v14  ;;  %vm827_vm15 = vweird.f32 %v821_v14  ;;  %v831_v28 = vand.u32 2147483647, %v821_v14 }
 0x998   :  { %v745_v2 = vpop.f32.mrf.mxu0  ;;  %v834_v32 = vor.u32 1.1754944e-38, %v833_v29  ;;  %vm832_vm3 = vcmp.eq.f32.partialorder %v831_v28, 8.507059e+37 }
 0x999   :  { %v768_v7 = vadd.f32 %v745_v2, %v3130_v18  ;;  %v748_v11 = vadd.f32 %v745_v2, %v3294_v12 }
 0x99b   :  { %770 = vrot.lane.b32.xlu0 %v768_v7, %s2941_s3  ;;  %v2643_v15 = vmul.f32 -1.442695, %v748_v11 }
 0x99c   :  { %v2774_v16 = vpop.eup %2773 }
 0x99d   :  { %2775 = vpow2.f32 %v2643_v15  ;;  %v823_v19 = vmul.f32 %v2774_v16, %v821_v14  ;;  %vm828_vm14 = vweird.f32 %v2774_v16 }
 0x99e   :  { %vm829_vm2 = vmor %vm827_vm15, %vm828_vm14 }
 0x99f   :  { %v824_v22 = vsub.f32 1.0, %v823_v19 }
 0x9a1   :  { %v825_v24 = vmul.f32 %v2774_v16, %v824_v22 }
 0x9a3   :  { %v2776_v17 = vpop.eup %2775  ;;  %v826_v25 = vadd.f32 %v2774_v16, %v825_v24 }
 0x9a4   :  { %v752_v20 = vadd.f32 1.0, %v2776_v17 }
 0x9a5   :  { %v830_v53 = vsel %vm829_vm2, %v2774_v16, %v826_v25 }
 0x9a6   :  { %2777 = vrcp.f32 %v752_v20  ;;  %v835_v34 = vsel %vm832_vm3, %v834_v32, %v830_v53  ;;  %v764_v40 = vand.u32 2147483648, %v752_v20  ;;  %vm758_vm6 = vweird.f32 %v752_v20 }
 0x9a7   :  { %v762_v42 = vand.u32 2147483647, %v752_v20  ;;  %v850_v54 = vsub.f32 1.0, %v835_v34  ;;  %v858_v59 = vmul.f32 %v856_v57, %v835_v34 }
 0x9a8   :  { %v765_v44 = vor.u32 1.1754944e-38, %v764_v40 }
 0x9a9   :  { %vm763_vm8 = vcmp.eq.f32.partialorder %v762_v42, 8.507059e+37 }
 0x9ac   :  { %v2778_v27 = vpop.eup %2777 }
 0x9ad   :  { %v754_v31 = vmul.f32 %v2778_v27, %v752_v20  ;;  %vm759_vm4 = vweird.f32 %v2778_v27 }
 0x9ae   :  { %vm760_vm7 = vmor %vm758_vm6, %vm759_vm4 }
 0x9af   :  { %v755_v37 = vsub.f32 1.0, %v754_v31 }
 0x9b1   :  { %v756_v38 = vmul.f32 %v2778_v27, %v755_v37 }
 0x9b3   :  { %v757_v39 = vadd.f32 %v2778_v27, %v756_v38 }
 0x9b5   :  { %v761_v43 = vsel %vm760_vm7, %v2778_v27, %v757_v39 }
 0x9b6   :  { %v766_v46 = vsel %vm763_vm8, %v765_v44, %v761_v43 }
 0x9b7   :  { %v780_v63 = vsub.f32 1.0, %v766_v46  ;;  %v787_v0 = vmul.f32 %v766_v46, %v723_v35 }
 0x9fd   :  { %v841_v13 = vpop.permute.xlu1 %840 }
 0x9fe   :  { %v843_v36 = vmul.f32 %v841_v13, %v835_v34 }
 0xa00   :  { %845 = vrot.lane.b32.xlu0 %v843_v36, %s2941_s3 }
 0xa0d   :  { %v771_v45 = vpop.permute.xlu0 %770 }
 0xa0e   :  { %v773_v47 = vmul.f32 %v771_v45, %v766_v46 }
 0xa10   :  { %775 = vrot.lane.b32.xlu2 %v773_v47, %s2941_s3 }
 0xa6a   :  { %v776_v48 = vpop.permute.xlu2 %775 }
 0xa6b   :  { %v778_v49 = vadd.f32 %v776_v48, %v3294_v12 }
 0xa6d   :  { %2779 = vtanh.f32 %v778_v49 }
 0xa72   :  { %v846_v26 = vpop.permute.xlu0 %845 }
 0xa73   :  { %v2780_v50 = vpop.eup %2779  ;;  %v848_v51 = vadd.f32 %v846_v26, %v3135_v21 }
 0xa74   :  { %782 = vrot.lane.b32.xlu1 %v2780_v50, %s2943_s4 }
 0xa75   :  { %2781 = vtanh.f32 %v848_v51 }
 0xa7b   :  { %v2782_v52 = vpop.eup %2781 }
 0xa7c   :  { %852 = vrot.lane.b32.xlu2 %v2782_v52, %s2943_s4 }
 0xad6   :  { %v853_v58 = vpop.permute.xlu2 %852 }
 0xad7   :  { %v855_v41 = vmul.f32 %v853_v58, %v850_v54 }
 0xad9   :  { %v3304_v62 = vadd.f32 %v858_v59, %v855_v41 }
 0xadb   :  { %v935_v30 = vrot.slane %v3304_v62, 6 }
 0xadd   :  { %936 = vrot.lane.b32.xlu1 %v935_v30, %s2943_s4 }
 0xae6   :  { %v783_v4 = vpop.permute.xlu1 %782 }
 0xae7   :  { %v785_v9 = vmul.f32 %v783_v4, %v780_v63  ;;  %v1002_v63 = vrot.slane %v3304_v62, 2 }
 0xae9   :  { %v788_v1 = vadd.f32 %v787_v0, %v785_v9 }
 0xaeb   :  { %861 = vrot.lane.b32.xlu0 %v788_v1, %s2943_s4  ;;  %v930_v29 = vrot.slane %v788_v1, 6 }
 0xb4f   :  { %v937_v55 = vpop.permute.xlu1 %936 }
 0xb50   :  { %2648 = vmatmul.msk.f32.vlgmr.msrb.gmra.mxu3 %vm122_vm1, %v937_v55 }
 0xb5d   :  { %v862_v6 = vpop.permute.xlu0 %861 }
 0xb5e   :  { %864 = vst.msk [vmem:[#allocation2 + $0x8] sm:$0x3] %vm274_vm11, %v862_v6  ;;  %2646 = vmatmul.msk.f32.vlgmr.msrb.gmra.mxu2 %vm122_vm1, %v862_v6 }
 0xbd3   :  { %v957_v56 = vpop.f32.mrf.mxu3 }
 0xbd4   :  { %v983_v2 = vadd.f32 %v957_v56, %v3137_v23  ;;  %v961_v32 = vrot.slane %v957_v56, 4 }
 0xbd6   :  { %v985_v7 = vrot.slane %v983_v2, 4  ;;  %v963_v13 = vadd.f32 %v961_v32, %v3135_v21 }
 0xbd8   :  { %986 = vrot.lane.b32.xlu0 %v985_v7, %s2941_s3  ;;  %v2649_v34 = vmul.f32 -1.442695, %v963_v13 }
 0xbe1   :  { %v885_v3 = vpop.f32.mrf.mxu2 }
 0xbe2   :  { %v889_v35 = vrot.slane %v885_v3, 6  ;;  %v911_v5 = vadd.f32 %v885_v3, %v3130_v18 }
 0xbe4   :  { %v891_v10 = vadd.f32 %v889_v35, %v3294_v12  ;;  %v913_v8 = vrot.slane %v911_v5, 6 }
 0xbe6   :  { %v2647_v11 = vmul.f32 -1.442695, %v891_v10  ;;  %914 = vrot.lane.b32.xlu2 %v913_v8, %s2941_s3 }
 0xbe8   :  { %2783 = vpow2.f32 %v2647_v11 }
 0xbee   :  { %v2784_v14 = vpop.eup %2783 }
 0xbef   :  { %v895_v15 = vadd.f32 1.0, %v2784_v14 }
 0xbf1   :  { %2785 = vrcp.f32 %v895_v15  ;;  %v907_v20 = vand.u32 2147483648, %v895_v15  ;;  %v905_v24 = vand.u32 2147483647, %v895_v15  ;;  %vm901_vm12 = vweird.f32 %v895_v15 }
 0xbf2   :  { %2787 = vpow2.f32 %v2649_v34 }
 0xbf3   :  { %v908_v27 = vor.u32 1.1754944e-38, %v907_v20  ;;  %vm906_vm15 = vcmp.eq.f32.partialorder %v905_v24, 8.507059e+37 }
 0xbf7   :  { %v2786_v16 = vpop.eup %2785 }
 0xbf8   :  { %v897_v17 = vmul.f32 %v2786_v16, %v895_v15  ;;  %vm902_vm9 = vweird.f32 %v2786_v16  ;;  %v2788_v36 = vpop.eup %2787 }
 0xbf9   :  { %vm903_vm14 = vmor %vm901_vm12, %vm902_vm9  ;;  %v967_v37 = vadd.f32 1.0, %v2788_v36 }
 0xbfa   :  { %v898_v19 = vsub.f32 1.0, %v897_v17 }
 0xbfb   :  { %2789 = vrcp.f32 %v967_v37  ;;  %v979_v46 = vand.u32 2147483648, %v967_v37  ;;  %vm973_vm3 = vweird.f32 %v967_v37  ;;  %v977_v47 = vand.u32 2147483647, %v967_v37 }
 0xbfc   :  { %v899_v22 = vmul.f32 %v2786_v16, %v898_v19 }
 0xbfd   :  { %v980_v49 = vor.u32 1.1754944e-38, %v979_v46  ;;  %vm978_vm6 = vcmp.eq.f32.partialorder %v977_v47, 8.507059e+37 }
 0xbfe   :  { %v900_v25 = vadd.f32 %v2786_v16, %v899_v22 }
 0xc00   :  { %v904_v28 = vsel %vm903_vm14, %v2786_v16, %v900_v25 }
 0xc01   :  { %v909_v53 = vsel %vm906_vm15, %v908_v27, %v904_v28  ;;  %v2790_v38 = vpop.eup %2789 }
 0xc02   :  { %v932_v31 = vmul.f32 %v930_v29, %v909_v53  ;;  %v969_v39 = vmul.f32 %v2790_v38, %v967_v37  ;;  %vm974_vm2 = vweird.f32 %v2790_v38  ;;  %v924_v6 = vsub.f32 1.0, %v909_v53 }
 0xc03   :  { %vm975_vm4 = vmor %vm973_vm3, %vm974_vm2 }
 0xc04   :  { %v970_v40 = vsub.f32 1.0, %v969_v39 }
 0xc06   :  { %v971_v42 = vmul.f32 %v2790_v38, %v970_v40 }
 0xc08   :  { %v972_v45 = vadd.f32 %v2790_v38, %v971_v42 }
 0xc0a   :  { %v976_v48 = vsel %vm975_vm4, %v2790_v38, %v972_v45 }
 0xc0b   :  { %v981_v50 = vsel %vm978_vm6, %v980_v49, %v976_v48 }
 0xc0c   :  { %v996_v30 = vsub.f32 1.0, %v981_v50  ;;  %v1004_v0 = vmul.f32 %v1002_v63, %v981_v50 }
 0xc40   :  { %v915_v43 = vpop.permute.xlu2 %914 }
 0xc41   :  { %v917_v44 = vmul.f32 %v915_v43, %v909_v53 }
 0xc43   :  { %919 = vrot.lane.b32.xlu1 %v917_v44, %s2941_s3 }
 0xc4a   :  { %v987_v26 = vpop.permute.xlu0 %986 }
 0xc4b   :  { %v989_v51 = vmul.f32 %v987_v26, %v981_v50 }
 0xc4d   :  { %991 = vrot.lane.b32.xlu2 %v989_v51, %s2941_s3 }
 0xca7   :  { %v992_v52 = vpop.permute.xlu2 %991 }
 0xca8   :  { %v994_v54 = vadd.f32 %v992_v52, %v3135_v21 }
 0xcaa   :  { %2791 = vtanh.f32 %v994_v54 }
 0xcb0   :  { %v2792_v57 = vpop.eup %2791 }
 0xcb1   :  { %998 = vrot.lane.b32.xlu1 %v2792_v57, %s2943_s4 }
 0xcb5   :  { %v920_v58 = vpop.permute.xlu1 %919 }
 0xcb6   :  { %v922_v59 = vadd.f32 %v920_v58, %v3294_v12 }
 0xcb8   :  { %2793 = vtanh.f32 %v922_v59 }
 0xcbe   :  { %v2794_v41 = vpop.eup %2793 }
 0xcbf   :  { %926 = vrot.lane.b32.xlu0 %v2794_v41, %s2943_s4 }
 0xd23   :  { %v999_v4 = vpop.permute.xlu1 %998 }
 0xd24   :  { %v1001_v9 = vmul.f32 %v999_v4, %v996_v30 }
 0xd26   :  { %v3327_v1 = vadd.f32 %v1004_v0, %v1001_v9 }
 0xd28   :  { %v1084_v55 = vrot.slane %v3327_v1, 4 }
 0xd2a   :  { %1085 = vrot.lane.b32.xlu0 %v1084_v55, %s2943_s4 }
 0xd31   :  { %v927_v56 = vpop.permute.xlu0 %926 }
 0xd32   :  { %v929_v2 = vmul.f32 %v927_v56, %v924_v6 }
 0xd34   :  { %v3331_v7 = vadd.f32 %v932_v31, %v929_v2 }
 0xd36   :  { %v1012_v3 = vrot.slane %v3331_v7, 2  ;;  %v1079_v55 = vrot.slane %v3331_v7, 6 }
 0xd38   :  { %1013 = vrot.lane.b32.xlu2 %v1012_v3, %s2943_s4 }
 0xd92   :  { %v1014_v35 = vpop.permute.xlu2 %1013 }
 0xd93   :  { %2650 = vmatmul.msk.f32.vlgmr.msrb.gmra.mxu0 %vm122_vm1, %v1014_v35 }
 0xd9c   :  { %v1086_v5 = vpop.permute.xlu0 %1085 }
 0xd9d   :  { %2652 = vmatmul.msk.f32.vlgmr.msrb.gmra.mxu1 %vm122_vm1, %v1086_v5 }
 0xe10   :  { %v1034_v10 = vpop.f32.mrf.mxu0 }
 0xe11   :  { %v1060_v8 = vadd.f32 %v1034_v10, %v3130_v18  ;;  %v1038_v22 = vrot.slane %v1034_v10, 4  ;;  %v1151_v10 = vrot.slane %v3327_v1, 2 }
 0xe13   :  { %v1062_v11 = vrot.slane %v1060_v8, 4  ;;  %v1040_v25 = vadd.f32 %v1038_v22, %v3294_v12 }
 0xe15   :  { %1063 = vrot.lane.b32.xlu1 %v1062_v11, %s2941_s3  ;;  %v2651_v29 = vmul.f32 -1.442695, %v1040_v25 }
 0xe1a   :  { %v1106_v14 = vpop.f32.mrf.mxu1 }
 0xe1b   :  { %v1132_v15 = vadd.f32 %v1106_v14, %v3137_v23  ;;  %v1110_v17 = vrot.slane %v1106_v14, 6 }
 0xe1d   :  { %v1134_v16 = vrot.slane %v1132_v15, 6  ;;  %v1112_v19 = vadd.f32 %v1110_v17, %v3135_v21 }
 0xe1f   :  { %1135 = vrot.lane.b32.xlu2 %v1134_v16, %s2941_s3  ;;  %v2653_v20 = vmul.f32 -1.442695, %v1112_v19 }
 0xe21   :  { %2795 = vpow2.f32 %v2653_v20 }
 0xe27   :  { %v2796_v24 = vpop.eup %2795 }
 0xe28   :  { %v1116_v27 = vadd.f32 1.0, %v2796_v24 }
 0xe2a   :  { %2797 = vrcp.f32 %v1116_v27  ;;  %v1128_v38 = vand.u32 2147483648, %v1116_v27  ;;  %vm1122_vm8 = vweird.f32 %v1116_v27  ;;  %v1126_v39 = vand.u32 2147483647, %v1116_v27 }
 0xe2b   :  { %2799 = vpow2.f32 %v2651_v29 }
 0xe2c   :  { %v1129_v43 = vor.u32 1.1754944e-38, %v1128_v38  ;;  %vm1127_vm12 = vcmp.eq.f32.partialorder %v1126_v39, 8.507059e+37 }
 0xe30   :  { %v2798_v28 = vpop.eup %2797 }
 0xe31   :  { %v2800_v53 = vpop.eup %2799  ;;  %v1118_v31 = vmul.f32 %v2798_v28, %v1116_v27  ;;  %vm1123_vm7 = vweird.f32 %v2798_v28 }
 0xe32   :  { %v1044_v32 = vadd.f32 1.0, %v2800_v53  ;;  %vm1124_vm9 = vmor %vm1122_vm8, %vm1123_vm7 }
 0xe33   :  { %v1119_v13 = vsub.f32 1.0, %v1118_v31 }
 0xe34   :  { %2801 = vrcp.f32 %v1044_v32  ;;  %v1056_v26 = vand.u32 2147483648, %v1044_v32  ;;  %vm1050_vm15 = vweird.f32 %v1044_v32  ;;  %v1054_v50 = vand.u32 2147483647, %v1044_v32 }
 0xe35   :  { %v1120_v34 = vmul.f32 %v2798_v28, %v1119_v13 }
 0xe36   :  { %v1057_v52 = vor.u32 1.1754944e-38, %v1056_v26  ;;  %vm1055_vm3 = vcmp.eq.f32.partialorder %v1054_v50, 8.507059e+37 }
 0xe37   :  { %v1121_v37 = vadd.f32 %v2798_v28, %v1120_v34 }
 0xe39   :  { %v1125_v42 = vsel %vm1124_vm9, %v2798_v28, %v1121_v37 }
 0xe3a   :  { %v2802_v36 = vpop.eup %2801  ;;  %v1130_v45 = vsel %vm1127_vm12, %v1129_v43, %v1125_v42 }
 0xe3b   :  { %v1046_v40 = vmul.f32 %v2802_v36, %v1044_v32  ;;  %vm1051_vm14 = vweird.f32 %v2802_v36  ;;  %v1145_v5 = vsub.f32 1.0, %v1130_v45  ;;  %v1153_v11 = vmul.f32 %v1151_v10, %v1130_v45  ;;  %v2719_v10 = vld [vmem:[%s3917_s9] ss:$0 sm:$0xff] }
 0xe3c   :  { %vm1052_vm2 = vmor %vm1050_vm15, %vm1051_vm14 }
 0xe3d   :  { %v1047_v44 = vsub.f32 1.0, %v1046_v40 }
 0xe3f   :  { %v1048_v48 = vmul.f32 %v2802_v36, %v1047_v44 }
 0xe41   :  { %v1049_v49 = vadd.f32 %v2802_v36, %v1048_v48 }
 0xe43   :  { %v1053_v51 = vsel %vm1052_vm2, %v2802_v36, %v1049_v49  ;;  %vm422_vm2 = vcmask 257026  }
 0xe44   :  { %v1058_v57 = vsel %vm1055_vm3, %v1057_v52, %v1053_v51  ;;  %vm719_vm3 = vcmask 261126  }
 0xe45   :  { %v1073_v9 = vsub.f32 1.0, %v1058_v57  ;;  %v1081_v56 = vmul.f32 %v1079_v55, %v1058_v57 }
 0xe79   :  { %v1136_v46 = vpop.permute.xlu2 %1135 }
 0xe7a   :  { %v1138_v47 = vmul.f32 %v1136_v46, %v1130_v45 }
 0xe7c   :  { %1140 = vrot.lane.b32.xlu1 %v1138_v47, %s2941_s3 }
 0xe87   :  { %v1064_v54 = vpop.permute.xlu1 %1063 }
 0xe88   :  { %v1066_v58 = vmul.f32 %v1064_v54, %v1058_v57 }
 0xe8a   :  { %1068 = vrot.lane.b32.xlu0 %v1066_v58, %s2941_s3 }
 0xeee   :  { %v1141_v59 = vpop.permute.xlu1 %1140 }
 0xeef   :  { %v1143_v41 = vadd.f32 %v1141_v59, %v3135_v21 }
 0xef1   :  { %2803 = vtanh.f32 %v1143_v41 }
 0xef7   :  { %v2804_v30 = vpop.eup %2803 }
 0xef8   :  { %1147 = vrot.lane.b32.xlu0 %v2804_v30, %s2943_s4 }
 0xefc   :  { %v1069_v63 = vpop.permute.xlu0 %1068 }
 0xefd   :  { %v1071_v4 = vadd.f32 %v1069_v63, %v3294_v12 }
 0xeff   :  { %2805 = vtanh.f32 %v1071_v4  ;;  %v3389_v4 = vld [vmem:[%s3915_s7 + $0x10] sm:$0xff] }
 0xf05   :  { %v2806_v0 = vpop.eup %2805 }
 0xf06   :  { %1075 = vrot.lane.b32.xlu2 %v2806_v0, %s2943_s4  ;;  %v3395_v0 = vld [vmem:[%s3915_s7 + $0x8] sm:$0xff] }
 0xf60   :  { %v1076_v6 = vpop.permute.xlu2 %1075 }
 0xf61   :  { %v1078_v2 = vmul.f32 %v1076_v6, %v1073_v9  ;;  %v3407_v9 = vld [vmem:[%s3909_s1 + $0x4] sm:$0x3] }
 0xf63   :  { %v3350_v3 = vadd.f32 %v1081_v56, %v1078_v2 }
 0xf65   :  { %v1161_v35 = vrot.slane %v3350_v3, 4 }
 0xf67   :  { %1162 = vrot.lane.b32.xlu1 %v1161_v35, %s2943_s4 }
 0xf6a   :  { %v1148_v8 = vpop.permute.xlu0 %1147 }
 0xf6b   :  { %v1150_v14 = vmul.f32 %v1148_v8, %v1145_v5  ;;  %v1325_v8 = vld [vmem:[%s3914_s6 + $0x38] sm:$0xff] }
 0xf6c   :  { %1345 = vmatpush.msra.mxu0 %v1325_v8 }
 0xf6d   :  { %v3355_v15 = vadd.f32 %v1153_v11, %v1150_v14  ;;  %v1324_v11 = vld [vmem:[%s3914_s6 + $0x30] sm:$0xff] }
 0xf6e   :  { %v2668_v14 = vld [vmem:[%s3914_s6 + $0x70] sm:$0xff]  ;;  %1346 = vmatpush.msra.mxu0 %v1324_v11 }
 0xf6f   :  { %v1233_v16 = vrot.slane %v3355_v15, 2 }
 0xf71   :  { %1234 = vrot.lane.b32.xlu2 %v1233_v16, %s2943_s4 }
 0xfcb   :  { %v1235_v17 = vpop.permute.xlu2 %1234 }
 0xfcc   :  { %2656 = vmatmul.msk.f32.vlgmr.msra.gmra.mxu3 %vm122_vm1, %v1235_v17  ;;  %v3458_v17 = vld [vmem:[%s3915_s7 + $0x30] sm:$0xff] }
 0xfd9   :  { %v1163_v19 = vpop.permute.xlu1 %1162 }
 0xfda   :  { %2654 = vmatmul.msk.f32.vlgmr.msra.gmra.mxu2 %vm122_vm1, %v1163_v19  ;;  %v1323_v19 = vld [vmem:[%s3914_s6 + $0x28] sm:$0xff] }
 0xfdb   :  { %1347 = vmatpush.msra.mxu0 %v1323_v19 }
0x104f   :  { %v1255_v20 = vpop.f32.mrf.mxu3 }
0x1050   :  { %v1278_v22 = vadd.f32 %v1255_v20, %v3137_v23  ;;  %v1258_v29 = vadd.f32 %v1255_v20, %v3135_v21  ;;  %v2667_v20 = vld [vmem:[%s3914_s6 + $0x68] sm:$0xff] }
0x1052   :  { %1280 = vrot.lane.b32.xlu1 %v1278_v22, %s2941_s3  ;;  %v2657_v28 = vmul.f32 -1.442695, %v1258_v29  ;;  %v3470_v22 = vld [vmem:[%s3915_s7 + $0x28] sm:$0xff]  ;;  %v1321_v29 = vld [vmem:[%s3914_s6 + $0x18] sm:$0xff] }
0x1054   :  { %2807 = vpow2.f32 %v2657_v28  ;;  %v2665_v28 = vld [vmem:[%s3914_s6 + $0x58] sm:$0xff] }
0x105a   :  { %v2808_v31 = vpop.eup %2807 }
0x105b   :  { %v1262_v13 = vadd.f32 1.0, %v2808_v31  ;;  %v1320_v31 = vld [vmem:[%s3914_s6 + $0x10] sm:$0xff] }
0x105d   :  { %v1183_v24 = vpop.f32.mrf.mxu2  ;;  %2809 = vrcp.f32 %v1262_v13  ;;  %v1274_v43 = vand.u32 2147483648, %v1262_v13  ;;  %vm1268_vm6 = vweird.f32 %v1262_v13  ;;  %v1272_v44 = vand.u32 2147483647, %v1262_v13 }
0x105e   :  { %v1209_v25 = vadd.f32 %v1183_v24, %v3130_v18  ;;  %v1187_v53 = vrot.slane %v1183_v24, 2  ;;  %v1322_v24 = vld [vmem:[%s3914_s6 + $0x20] sm:$0xff] }
0x105f   :  { %v1275_v47 = vor.u32 1.1754944e-38, %v1274_v43  ;;  %vm1273_vm8 = vcmp.eq.f32.partialorder %v1272_v44, 8.507059e+37  ;;  %1348 = vmatpush.msra.mxu0 %v1322_v24  ;;  %v1228_v43 = vrot.slane %v3350_v3, 6 }
0x1060   :  { %v1211_v27 = vrot.slane %v1209_v25, 2  ;;  %v1189_v32 = vadd.f32 %v1187_v53, %v3294_v12  ;;  %v2666_v25 = vld [vmem:[%s3914_s6 + $0x60] sm:$0xff] }
0x1061   :  { %v3495_v53 = vld [vmem:[%s3909_s1 + $0x6] sm:$0x3]  ;;  %1349 = vmatpush.msra.mxu0 %v1321_v29 }
0x1062   :  { %1212 = vrot.lane.b32.xlu0 %v1211_v27, %s2941_s3  ;;  %v2655_v34 = vmul.f32 -1.442695, %v1189_v32  ;;  %v3483_v27 = vld [vmem:[%s3915_s7 + $0x20] sm:$0xff]  ;;  %v2664_v32 = vld [vmem:[%s3914_s6 + $0x50] sm:$0xff] }
0x1063   :  { %v2810_v23 = vpop.eup %2809  ;;  %1350 = vmatpush.msra.mxu0 %v1320_v31 }
0x1064   :  { %2811 = vpow2.f32 %v2655_v34  ;;  %v1264_v37 = vmul.f32 %v2810_v23, %v1262_v13  ;;  %vm1269_vm4 = vweird.f32 %v2810_v23  ;;  %v1319_v13 = vld [vmem:[%s3914_s6 + $0x8] sm:$0xff] }
0x1065   :  { %vm1270_vm7 = vmor %vm1268_vm6, %vm1269_vm4  ;;  %v2663_v34 = vld [vmem:[%s3914_s6 + $0x48] sm:$0xff]  ;;  %1351 = vmatpush.msra.mxu0 %v1319_v13  ;;  %vm573_vm4 = vcmask 259076   ;;  %vm1330_vm6 = vcmask 523264  }
0x1066   :  { %v1265_v18 = vsub.f32 1.0, %v1264_v37 }
0x1068   :  { %v1266_v39 = vmul.f32 %v2810_v23, %v1265_v18  ;;  %v1318_v18 = vld [vmem:[%s3914_s6] sm:$0xff] }
0x1069   :  { %1352 = vmatpush.msra.mxu0 %v1318_v18 }
0x106a   :  { %v2812_v36 = vpop.eup %2811  ;;  %v1267_v40 = vadd.f32 %v2810_v23, %v1266_v39  ;;  %v2662_v39 = vld [vmem:[%s3914_s6 + $0x40] sm:$0xff] }
0x106b   :  { %v1193_v38 = vadd.f32 1.0, %v2812_v36 }
0x106c   :  { %v1271_v45 = vsel %vm1270_vm7, %v2810_v23, %v1267_v40  ;;  %v2720_v40 = vld [vmem:[%s3917_s9 + $0x1] ss:$0 sm:$0xff] }
0x106d   :  { %2813 = vrcp.f32 %v1193_v38  ;;  %v3369_v49 = vsel %vm1273_vm8, %v1275_v47, %v1271_v45  ;;  %v1205_v54 = vand.u32 2147483648, %v1193_v38  ;;  %vm1199_vm12 = vweird.f32 %v1193_v38 }
0x106e   :  { %v1203_v57 = vand.u32 2147483647, %v1193_v38  ;;  %v1290_v23 = vsub.f32 1.0, %v3369_v49  ;;  %v1297_v37 = vmul.f32 %v3369_v49, %v1233_v16 }
0x106f   :  { %v1206_v59 = vor.u32 1.1754944e-38, %v1205_v54 }
0x1070   :  { %vm1204_vm15 = vcmp.eq.f32.partialorder %v1203_v57, 8.507059e+37 }
0x1073   :  { %v2814_v42 = vpop.eup %2813 }
0x1074   :  { %v1195_v46 = vmul.f32 %v2814_v42, %v1193_v38  ;;  %vm1200_vm9 = vweird.f32 %v2814_v42 }
0x1075   :  { %vm1201_vm14 = vmor %vm1199_vm12, %vm1200_vm9 }
0x1076   :  { %v1196_v50 = vsub.f32 1.0, %v1195_v46 }
0x1078   :  { %v1197_v51 = vmul.f32 %v2814_v42, %v1196_v50 }
0x107a   :  { %v1198_v52 = vadd.f32 %v2814_v42, %v1197_v51 }
0x107c   :  { %v1202_v58 = vsel %vm1201_vm14, %v2814_v42, %v1198_v52 }
0x107d   :  { %v3375_v30 = vsel %vm1204_vm15, %v1206_v59, %v1202_v58  ;;  %v3581_v59 = vld [vmem:[%s3916_s8] ss:$0 sm:$0xff] }
0x107e   :  { %v1222_v42 = vsub.f32 1.0, %v3375_v30  ;;  %v1230_v45 = vmul.f32 %v1228_v43, %v3375_v30 }
0x10c4   :  { %v1281_v48 = vpop.permute.xlu1 %1280 }
0x10c5   :  { %v1283_v26 = vmul.f32 %v1281_v48, %v3369_v49 }
0x10c7   :  { %1285 = vrot.lane.b32.xlu0 %v1283_v26, %s2941_s3 }
0x10cf   :  { %419 = vrot.lane.b32.xlu0 %v3206_v33, %s2943_s4  ;;  %v3384_v33 = vld [vmem:[%s3915_s7 + $0x18] sm:$0xff] }
0x10d0   :  { %1424 = vmatpush.msrb.mxu2 %v3384_v33  ;;  %1874 = vmatpush.msrb.mxu0 %v3384_v33 }
0x10d2   :  { %1425 = vmatpush.msrb.mxu2 %v3389_v4  ;;  %1875 = vmatpush.msrb.mxu0 %v3389_v4 }
0x10d4   :  { %v1213_v41 = vpop.permute.xlu0 %1212  ;;  %1426 = vmatpush.msrb.mxu2 %v3395_v0  ;;  %1876 = vmatpush.msrb.mxu0 %v3395_v0 }
0x10d5   :  { %v1215_v63 = vmul.f32 %v1213_v41, %v3375_v30 }
0x10d7   :  { %1217 = vrot.lane.b32.xlu2 %v1215_v63, %s2941_s3  ;;  %1007 = vrot.lane.b32.xlu0 %v3331_v7, %s2943_s4  ;;  %v3401_v7 = vld [vmem:[%s3915_s7] sm:$0xff] }
0x10d8   :  { %1427 = vmatpush.msrb.mxu2 %v3401_v7  ;;  %1877 = vmatpush.msrb.mxu0 %v3401_v7 }
0x10d9   :  { %2678 = vmatmul.msk.f32.vlgmr.msrb.gmra.mxu2 %vm122_vm1, %v3407_v9 }
0x10da   :  { %1576 = vmatpush.msra.mxu2 %v3384_v33 }
0x10dc   :  { %1577 = vmatpush.msra.mxu2 %v3389_v4 }
0x10de   :  { %1578 = vmatpush.msra.mxu2 %v3395_v0 }
0x10df   :  { %1528 = vrot.lane.b32.xlu0 %v2720_v40, %s2941_s3 }
0x10e0   :  { %1579 = vmatpush.msra.mxu2 %v3401_v7 }
0x10e2   :  { %1725 = vmatpush.msrb.mxu2 %v3384_v33 }
0x10e4   :  { %1726 = vmatpush.msrb.mxu2 %v3389_v4 }
0x10e6   :  { %1727 = vmatpush.msrb.mxu2 %v3395_v0 }
0x10e8   :  { %1728 = vmatpush.msrb.mxu2 %v3401_v7 }
0x1131   :  { %v1218_v55 = vpop.permute.xlu2 %1217 }
0x1132   :  { %v1220_v6 = vadd.f32 %v1218_v55, %v3294_v12 }
0x1134   :  { %2815 = vtanh.f32 %v1220_v6 }
0x1139   :  { %v1286_v56 = vpop.permute.xlu0 %1285 }
0x113a   :  { %v2816_v2 = vpop.eup %2815  ;;  %v1288_v35 = vadd.f32 %v1286_v56, %v3135_v21 }
0x113b   :  { %1224 = vrot.lane.b32.xlu1 %v2816_v2, %s2943_s4 }
0x113c   :  { %2817 = vtanh.f32 %v1288_v35 }
0x1141   :  { %v420_v12 = vpop.permute.xlu0 %419 }
0x1142   :  { %v2818_v5 = vpop.eup %2817  ;;  %423 = vst.msk [vmem:[#allocation2] sm:$0xc] %vm422_vm2, %v420_v12 }
0x1143   :  { %1160 = vst.msk [vmem:[#allocation2] sm:$0xc] %vm575_vm0, %v3355_v15  ;;  %1292 = vrot.lane.b32.xlu2 %v2818_v5, %s2943_s4  ;;  %570 = vrot.lane.b32.xlu1 %v3244_v61, %s2943_s4  ;;  %v2669_v61 = vld [vmem:[%s3914_s6 + $0x78] sm:$0xff] }
0x1144   :  { %1382 = vmatpush.msra.mxu1 %v2669_v61 }
0x1146   :  { %1383 = vmatpush.msra.mxu1 %v2668_v14 }
0x1148   :  { %1384 = vmatpush.msra.mxu1 %v2667_v20 }
0x1149   :  { %v1008_v21 = vpop.permute.xlu0 %1007 }
0x114a   :  { %1010 = vst.msk [vmem:[#allocation2 + $0x8] sm:$0xc] %vm422_vm2, %v1008_v21  ;;  %1385 = vmatpush.msra.mxu1 %v2666_v25  ;;  %v3595_v25 = vld [vmem:[%s3916_s8 + $0x1] ss:$0 sm:$0xff] }
0x114b   :  { %716 = vrot.lane.b32.xlu2 %v3271_v60, %s2943_s4  ;;  %1156 = vrot.lane.b32.xlu1 %v3350_v3, %s2943_s4  ;;  %v3447_v60 = vld [vmem:[%s3915_s7 + $0x38] sm:$0xff] }
0x114c   :  { %1495 = vmatpush.msrb.mxu3 %v3447_v60  ;;  %1386 = vmatpush.msra.mxu1 %v2665_v28 }
0x114e   :  { %1496 = vmatpush.msrb.mxu3 %v3458_v17  ;;  %1387 = vmatpush.msra.mxu1 %v2664_v32 }
0x1150   :  { %1497 = vmatpush.msrb.mxu3 %v3470_v22  ;;  %1388 = vmatpush.msra.mxu1 %v2663_v34 }
0x1151   :  { %v3574_v52 = vpop.permute.xlu0 %1528 }
0x1152   :  { %1498 = vmatpush.msrb.mxu3 %v3483_v27  ;;  %1389 = vmatpush.msra.mxu1 %v2662_v39 }
0x1153   :  { %1454 = vrot.lane.b32.xlu1 %v2719_v10, %s2941_s3  ;;  %2680 = vmatmul.msk.f32.vlgmr.msrb.gmra.mxu3 %vm122_vm1, %v3495_v53 }
0x1154   :  { %1648 = vmatpush.msra.mxu3 %v3447_v60  ;;  %1946 = vmatpush.msrb.mxu1 %v3447_v60 }
0x1156   :  { %1649 = vmatpush.msra.mxu3 %v3458_v17  ;;  %1947 = vmatpush.msrb.mxu1 %v3458_v17 }
0x1158   :  { %1650 = vmatpush.msra.mxu3 %v3470_v22  ;;  %1948 = vmatpush.msrb.mxu1 %v3470_v22 }
0x115a   :  { %1651 = vmatpush.msra.mxu3 %v3483_v27  ;;  %1949 = vmatpush.msrb.mxu1 %v3483_v27 }
0x115c   :  { %1797 = vmatpush.msrb.mxu3 %v3447_v60  ;;  %v1429_v3 = vpop.f32.mrf.mxu2 }
0x115e   :  { %1798 = vmatpush.msrb.mxu3 %v3458_v17 }
0x1160   :  { %1799 = vmatpush.msrb.mxu3 %v3470_v22 }
0x1162   :  { %1800 = vmatpush.msrb.mxu3 %v3483_v27 }
0x119d   :  { %v1293_v36 = vpop.permute.xlu2 %1292 }
0x119e   :  { %v1295_v38 = vmul.f32 %v1293_v36, %v1290_v23 }
0x11a0   :  { %v3526_v15 = vadd.f32 %v1297_v37, %v1295_v38 }
0x11a2   :  { %1304 = vst.msk [vmem:[#allocation2] sm:$0x3] %vm721_vm13, %v3526_v15 }
0x11a5   :  { %v717_v16 = vpop.permute.xlu2 %716 }
0x11a6   :  { %720 = vst.msk [vmem:[#allocation2] sm:$0xc0] %vm719_vm3, %v717_v16 }
0x11a7   :  { %865 = vst.msk [vmem:[#allocation2] sm:$0xc0] %vm276_vm10, %v3304_v62 }
0x11ad   :  { %v1225_v44 = vpop.permute.xlu1 %1224 }
0x11ae   :  { %v1227_v46 = vmul.f32 %v1225_v44, %v1222_v42 }
0x11b0   :  { %v1231_v47 = vadd.f32 %v1230_v45, %v1227_v46 }
0x11b2   :  { %1300 = vrot.lane.b32.xlu2 %v1231_v47, %s2943_s4 }
0x11b5   :  { %v571_v48 = vpop.permute.xlu1 %570 }
0x11b6   :  { %574 = vst.msk [vmem:[#allocation2] sm:$0x30] %vm573_vm4, %v571_v48 }
0x11b7   :  { %1011 = vst.msk [vmem:[#allocation2] sm:$0x30] %vm3920_vm5, %v3327_v1 }
0x11bd   :  { %v1157_v62 = vpop.permute.xlu1 %1156 }
0x11be   :  { %1159 = vst.msk [vmem:[#allocation2 + $0x8] sm:$0x30] %vm573_vm4, %v1157_v62  ;;  %v1312_v49 = vld [vmem:[#allocation2] sm:$0xff]  ;;  %v1550_v62 = vrot.slane %v3495_v53, 2 }
0x11bf   :  { %2660 = vmatmul.msk.f32.vlgmr.msra.gmra.mxu0 %vm1330_vm6, %v1312_v49  ;;  %2671 = vmatmul.msk.f32.vlgmr.msra.gmra.mxu1 %vm1330_vm6, %v1312_v49 }
0x11c0   :  { %2158 = vmatpush.msra.mxu0 %v3384_v33  ;;  %2230 = vmatpush.msra.mxu1 %v3447_v60 }
0x11c2   :  { %2159 = vmatpush.msra.mxu0 %v3389_v4  ;;  %2231 = vmatpush.msra.mxu1 %v3458_v17 }
0x11c4   :  { %2160 = vmatpush.msra.mxu0 %v3395_v0  ;;  %2232 = vmatpush.msra.mxu1 %v3470_v22 }
0x11c5   :  { %v3564_v1 = vpop.permute.xlu1 %1454 }
0x11c6   :  { %v1457_v26 = vadd.f32 %v3564_v1, %v1429_v3  ;;  %2161 = vmatpush.msra.mxu0 %v3401_v7  ;;  %2233 = vmatpush.msra.mxu1 %v3483_v27 }
0x11c8   :  { %1459 = vrot.lane.b32.xlu2 %v1457_v26, %s2941_s3 }
0x11d6   :  { %v1500_v54 = vpop.f32.mrf.mxu3 }
0x11d7   :  { %v1531_v57 = vadd.f32 %v3574_v52, %v1500_v54  ;;  %v1504_v28 = vrot.slane %v1500_v54, 2 }
0x11d9   :  { %v1533_v58 = vrot.slane %v1531_v57, 2 }
0x11db   :  { %1534 = vrot.lane.b32.xlu0 %v1533_v58, %s2941_s3 }
0x120c   :  { %v1301_v50 = vpop.permute.xlu2 %1300 }
0x120d   :  { %1303 = vst.msk [vmem:[#allocation2 + $0x8] sm:$0xc0] %vm719_vm3, %v1301_v50 }
0x120e   :  { %1305 = vst.msk [vmem:[#allocation3 - $0x6] sm:$0xc0] %vm719_vm3, %v1301_v50 }
0x1214   :  { %v1313_v51 = vld [vmem:[#allocation2 + $0x8] sm:$0xff] }
0x1215   :  { %2661 = vmatmul.msk.f32.gmra.mxu0 %vm1330_vm6, %v1313_v51  ;;  %2672 = vmatmul.msk.f32.gmra.mxu1 %vm1330_vm6, %v1313_v51 }
0x1222   :  { %v1460_v11 = vpop.permute.xlu2 %1459 }
0x123c   :  { %v1354_v41 = vpop.f32.mrf.mxu0  ;;  %v3590_v24 = vpop.f32.mrf.mxu1 }
0x123d   :  { %v3584_v30 = vadd.f32 %v3581_v59, %v1354_v41 }
0x123f   :  { %v1432_v63 = vadd.f32 %v1429_v3, %v3584_v30 }
0x1241   :  { %v2679_v55 = vmul.f32 -1.442695, %v1432_v63 }
0x1243   :  { %2819 = vpow2.f32 %v2679_v55 }
0x1249   :  { %v2820_v6 = vpop.eup %2819 }
0x124a   :  { %v1436_v56 = vadd.f32 1.0, %v2820_v6 }
0x124c   :  { %2821 = vrcp.f32 %v1436_v56  ;;  %v1448_v5 = vand.u32 2147483648, %v1436_v56  ;;  %v1446_v10 = vand.u32 2147483647, %v1436_v56  ;;  %vm1442_vm8 = vweird.f32 %v1436_v56 }
0x124d   :  { %v1535_v16 = vpop.permute.xlu0 %1534 }
0x124e   :  { %v1449_v61 = vor.u32 1.1754944e-38, %v1448_v5  ;;  %vm1447_vm12 = vcmp.eq.f32.partialorder %v1446_v10, 8.507059e+37 }
0x1252   :  { %v2822_v2 = vpop.eup %2821 }
0x1253   :  { %v1438_v35 = vmul.f32 %v2822_v2, %v1436_v56  ;;  %vm1443_vm7 = vweird.f32 %v2822_v2 }
0x1254   :  { %vm1444_vm9 = vmor %vm1442_vm8, %vm1443_vm7 }
0x1255   :  { %v1439_v12 = vsub.f32 1.0, %v1438_v35 }
0x1257   :  { %v1440_v21 = vmul.f32 %v2822_v2, %v1439_v12 }
0x1259   :  { %v1441_v8 = vadd.f32 %v2822_v2, %v1440_v21 }
0x125b   :  { %v1445_v14 = vsel %vm1444_vm9, %v2822_v2, %v1441_v8 }
0x125c   :  { %v1450_v19 = vsel %vm1447_vm12, %v1449_v61, %v1445_v14 }
0x125d   :  { %v1462_v20 = vmul.f32 %v1460_v11, %v1450_v19  ;;  %v1469_v51 = vsub.f32 1.0, %v1450_v19 }
0x125f   :  { %1464 = vrot.lane.b32.xlu1 %v1462_v20, %s2941_s3 }
0x1267   :  { %1475 = vrot.lane.b32.xlu1 %v3407_v9, %s2942_s14 }
0x1292   :  { %v1394_v29 = vpop.f32.mrf.mxu1 }
0x1293   :  { %v3598_v31 = vadd.f32 %v3595_v25, %v1394_v29 }
0x1295   :  { %v1506_v32 = vadd.f32 %v1504_v28, %v3598_v31 }
0x1297   :  { %v2681_v13 = vmul.f32 -1.442695, %v1506_v32 }
0x1299   :  { %2823 = vpow2.f32 %v2681_v13 }
0x129f   :  { %v2824_v34 = vpop.eup %2823 }
0x12a0   :  { %v1510_v23 = vadd.f32 1.0, %v2824_v34 }
0x12a2   :  { %2825 = vrcp.f32 %v1510_v23  ;;  %v1522_v38 = vand.u32 2147483648, %v1510_v23  ;;  %v1520_v39 = vand.u32 2147483647, %v1510_v23  ;;  %vm1516_vm15 = vweird.f32 %v1510_v23 }
0x12a4   :  { %v1523_v42 = vor.u32 1.1754944e-38, %v1522_v38  ;;  %vm1521_vm7 = vcmp.eq.f32.partialorder %v1520_v39, 8.507059e+37 }
0x12a8   :  { %v2826_v9 = vpop.eup %2825 }
0x12a9   :  { %v1512_v36 = vmul.f32 %v2826_v9, %v1510_v23  ;;  %vm1517_vm14 = vweird.f32 %v2826_v9 }
0x12aa   :  { %vm1518_vm6 = vmor %vm1516_vm15, %vm1517_vm14 }
0x12ab   :  { %v1513_v37 = vsub.f32 1.0, %v1512_v36 }
0x12ad   :  { %v1514_v18 = vmul.f32 %v2826_v9, %v1513_v37 }
0x12af   :  { %v1515_v40 = vadd.f32 %v2826_v9, %v1514_v18 }
0x12b1   :  { %v1519_v43 = vsel %vm1518_vm6, %v2826_v9, %v1515_v40 }
0x12b2   :  { %v1524_v44 = vsel %vm1521_vm7, %v1523_v42, %v1519_v43 }
0x12b3   :  { %v1537_v45 = vmul.f32 %v1535_v16, %v1524_v44  ;;  %v1544_v63 = vsub.f32 1.0, %v1524_v44 }
0x12b5   :  { %1539 = vrot.lane.b32.xlu2 %v1537_v45, %s2941_s3 }
0x12d1   :  { %v1465_v46 = vpop.permute.xlu1 %1464 }
0x12d2   :  { %v1467_v47 = vadd.f32 %v1465_v46, %v3584_v30 }
0x12d4   :  { %2827 = vtanh.f32 %v1467_v47 }
0x12d9   :  { %v1476_v50 = vpop.permute.xlu1 %1475 }
0x12da   :  { %v2828_v48 = vpop.eup %2827  ;;  %v1478_v57 = vmul.f32 %v1476_v50, %v1450_v19 }
0x12db   :  { %1471 = vrot.lane.b32.xlu0 %v2828_v48, %s2943_s4 }
0x12e3   :  { %1551 = vrot.lane.b32.xlu0 %v1550_v62, %s2942_s14 }
0x130f   :  { %v1540_v49 = vpop.permute.xlu2 %1539 }
0x1310   :  { %v1542_v3 = vadd.f32 %v1540_v49, %v3598_v31 }
0x1312   :  { %2829 = vtanh.f32 %v1542_v3 }
0x1318   :  { %v2830_v26 = vpop.eup %2829 }
0x1319   :  { %1546 = vrot.lane.b32.xlu2 %v2830_v26, %s2943_s4 }
0x134d   :  { %v1472_v54 = vpop.permute.xlu0 %1471 }
0x134e   :  { %v1474_v58 = vmul.f32 %v1472_v54, %v1469_v51 }
0x1350   :  { %v3608_v41 = vadd.f32 %v1478_v57, %v1474_v58 }
0x1352   :  { %1557 = vrot.lane.b32.xlu1 %v3608_v41, %s2943_s4 }
0x1355   :  { %v1552_v53 = vpop.permute.xlu0 %1551 }
0x1356   :  { %v1554_v6 = vmul.f32 %v1552_v53, %v1524_v44 }
0x1373   :  { %v1547_v55 = vpop.permute.xlu2 %1546 }
0x1374   :  { %v1549_v56 = vmul.f32 %v1547_v55, %v1544_v63 }
0x1376   :  { %v3612_v2 = vadd.f32 %v1554_v6, %v1549_v56 }
0x1378   :  { %1561 = vst.msk [vmem:[%s3918_s10 + $0x8] sm:$0xc0] %vm276_vm10, %v3612_v2  ;;  %v1631_v35 = vrot.slane %v3612_v2, 6 }
0x137a   :  { %1632 = vrot.lane.b32.xlu2 %v1631_v35, %s2943_s4 }
0x13c4   :  { %v1558_v12 = vpop.permute.xlu1 %1557 }
0x13c5   :  { %1560 = vst.msk [vmem:[%s3918_s10] sm:$0x3] %vm274_vm11, %v1558_v12  ;;  %2682 = vmatmul.msk.f32.vlgmr.msra.gmra.mxu2 %vm122_vm1, %v1558_v12 }
0x13c6   :  { %2018 = vmatpush.msra.mxu2 %v3384_v33 }
0x13c8   :  { %2019 = vmatpush.msra.mxu2 %v3389_v4 }
0x13ca   :  { %2020 = vmatpush.msra.mxu2 %v3395_v0 }
0x13cc   :  { %2021 = vmatpush.msra.mxu2 %v3401_v7 }
0x13d4   :  { %v1633_v5 = vpop.permute.xlu2 %1632 }
0x13d5   :  { %2684 = vmatmul.msk.f32.vlgmr.msra.gmra.mxu3 %vm122_vm1, %v1633_v5 }
0x13d6   :  { %2084 = vmatpush.msra.mxu3 %v3447_v60 }
0x13d8   :  { %2085 = vmatpush.msra.mxu3 %v3458_v17 }
0x13da   :  { %2086 = vmatpush.msra.mxu3 %v3470_v22 }
0x13dc   :  { %2087 = vmatpush.msra.mxu3 %v3483_v27 }
0x1448   :  { %v1581_v21 = vpop.f32.mrf.mxu2 }
0x1449   :  { %v1607_v10 = vadd.f32 %v1581_v21, %v3564_v1  ;;  %v1585_v19 = vrot.slane %v1581_v21, 6  ;;  %v1626_v21 = vrot.slane %v3608_v41, 6 }
0x144b   :  { %v1609_v8 = vrot.slane %v1607_v10, 6  ;;  %v1587_v20 = vadd.f32 %v1585_v19, %v3584_v30 }
0x144d   :  { %1610 = vrot.lane.b32.xlu0 %v1609_v8, %s2941_s3  ;;  %v2683_v29 = vmul.f32 -1.442695, %v1587_v20 }
0x144f   :  { %2831 = vpow2.f32 %v2683_v29  ;;  %v1698_v29 = vrot.slane %v3612_v2, 2 }
0x1455   :  { %v2832_v32 = vpop.eup %2831 }
0x1456   :  { %v1591_v34 = vadd.f32 1.0, %v2832_v32 }
0x1458   :  { %v1653_v61 = vpop.f32.mrf.mxu3  ;;  %2833 = vrcp.f32 %v1591_v34  ;;  %v1603_v42 = vand.u32 2147483648, %v1591_v34  ;;  %vm1597_vm9 = vweird.f32 %v1591_v34  ;;  %v1601_v43 = vand.u32 2147483647, %v1591_v34 }
0x1459   :  { %v1679_v11 = vadd.f32 %v1653_v61, %v3574_v52  ;;  %v1657_v28 = vrot.slane %v1653_v61, 4 }
0x145a   :  { %v1604_v46 = vor.u32 1.1754944e-38, %v1603_v42  ;;  %vm1602_vm14 = vcmp.eq.f32.partialorder %v1601_v43, 8.507059e+37 }
0x145b   :  { %v1681_v14 = vrot.slane %v1679_v11, 4  ;;  %v1659_v13 = vadd.f32 %v1657_v28, %v3598_v31 }
0x145d   :  { %1682 = vrot.lane.b32.xlu1 %v1681_v14, %s2941_s3  ;;  %v2685_v23 = vmul.f32 -1.442695, %v1659_v13 }
0x145e   :  { %v2834_v9 = vpop.eup %2833 }
0x145f   :  { %2835 = vpow2.f32 %v2685_v23  ;;  %v1593_v37 = vmul.f32 %v2834_v9, %v1591_v34  ;;  %vm1598_vm8 = vweird.f32 %v2834_v9 }
0x1460   :  { %vm1599_vm12 = vmor %vm1597_vm9, %vm1598_vm8 }
0x1461   :  { %v1594_v18 = vsub.f32 1.0, %v1593_v37 }
0x1463   :  { %v1595_v39 = vmul.f32 %v2834_v9, %v1594_v18 }
0x1465   :  { %v2836_v36 = vpop.eup %2835  ;;  %v1596_v40 = vadd.f32 %v2834_v9, %v1595_v39 }
0x1466   :  { %v1663_v38 = vadd.f32 1.0, %v2836_v36 }
0x1467   :  { %v1600_v44 = vsel %vm1599_vm12, %v2834_v9, %v1596_v40 }
0x1468   :  { %2837 = vrcp.f32 %v1663_v38  ;;  %v1605_v48 = vsel %vm1602_vm14, %v1604_v46, %v1600_v44  ;;  %v1675_v50 = vand.u32 2147483648, %v1663_v38  ;;  %vm1669_vm6 = vweird.f32 %v1663_v38 }
0x1469   :  { %v1673_v51 = vand.u32 2147483647, %v1663_v38  ;;  %v1620_v10 = vsub.f32 1.0, %v1605_v48  ;;  %v1628_v61 = vmul.f32 %v1626_v21, %v1605_v48 }
0x146a   :  { %v1676_v57 = vor.u32 1.1754944e-38, %v1675_v50 }
0x146b   :  { %vm1674_vm8 = vcmp.eq.f32.partialorder %v1673_v51, 8.507059e+37 }
0x146e   :  { %v2838_v16 = vpop.eup %2837 }
0x146f   :  { %v1665_v45 = vmul.f32 %v2838_v16, %v1663_v38  ;;  %vm1670_vm15 = vweird.f32 %v2838_v16 }
0x1470   :  { %vm1671_vm7 = vmor %vm1669_vm6, %vm1670_vm15 }
0x1471   :  { %v1666_v49 = vsub.f32 1.0, %v1665_v45 }
0x1473   :  { %v1667_v3 = vmul.f32 %v2838_v16, %v1666_v49 }
0x1475   :  { %v1668_v26 = vadd.f32 %v2838_v16, %v1667_v3 }
0x1477   :  { %v1672_v54 = vsel %vm1671_vm7, %v2838_v16, %v1668_v26 }
0x1478   :  { %v1677_v53 = vsel %vm1674_vm8, %v1676_v57, %v1672_v54 }
0x1479   :  { %v1692_v20 = vsub.f32 1.0, %v1677_v53  ;;  %v1700_v32 = vmul.f32 %v1698_v29, %v1677_v53 }
0x14bf   :  { %v1611_v47 = vpop.permute.xlu0 %1610 }
0x14c0   :  { %v1613_v62 = vmul.f32 %v1611_v47, %v1605_v48 }
0x14c2   :  { %1615 = vrot.lane.b32.xlu2 %v1613_v62, %s2941_s3 }
0x14cf   :  { %v1683_v58 = vpop.permute.xlu1 %1682 }
0x14d0   :  { %v1685_v63 = vmul.f32 %v1683_v58, %v1677_v53 }
0x14d2   :  { %1687 = vrot.lane.b32.xlu0 %v1685_v63, %s2941_s3 }
0x151c   :  { %v1616_v55 = vpop.permute.xlu2 %1615 }
0x151d   :  { %v1618_v6 = vadd.f32 %v1616_v55, %v3584_v30 }
0x151f   :  { %2839 = vtanh.f32 %v1618_v6 }
0x1525   :  { %v2840_v56 = vpop.eup %2839 }
0x1526   :  { %1622 = vrot.lane.b32.xlu1 %v2840_v56, %s2943_s4 }
0x1544   :  { %v1688_v35 = vpop.permute.xlu0 %1687 }
0x1545   :  { %v1690_v12 = vadd.f32 %v1688_v35, %v3598_v31 }
0x1547   :  { %2841 = vtanh.f32 %v1690_v12 }
0x154d   :  { %v2842_v5 = vpop.eup %2841 }
0x154e   :  { %1694 = vrot.lane.b32.xlu2 %v2842_v5, %s2943_s4 }
0x1598   :  { %v1623_v8 = vpop.permute.xlu1 %1622 }
0x1599   :  { %v1625_v11 = vmul.f32 %v1623_v8, %v1620_v10 }
0x159b   :  { %v3648_v14 = vadd.f32 %v1628_v61, %v1625_v11 }
0x159d   :  { %v1708_v19 = vrot.slane %v3648_v14, 2 }
0x159f   :  { %1709 = vrot.lane.b32.xlu0 %v1708_v19, %s2943_s4 }
0x15a8   :  { %v1695_v28 = vpop.permute.xlu2 %1694 }
0x15a9   :  { %v1697_v13 = vmul.f32 %v1695_v28, %v1692_v20 }
0x15ab   :  { %v3653_v34 = vadd.f32 %v1700_v32, %v1697_v13 }
0x15ad   :  { %1707 = vst.msk [vmem:[%s3918_s10 + $0x8] sm:$0x30] %vm3920_vm5, %v3653_v34  ;;  %v1780_v41 = vrot.slane %v3653_v34, 4 }
0x15af   :  { %1781 = vrot.lane.b32.xlu1 %v1780_v41, %s2943_s4 }
0x1611   :  { %v1710_v23 = vpop.permute.xlu0 %1709 }
0x1612   :  { %2686 = vmatmul.msk.f32.vlgmr.msrb.gmra.mxu2 %vm122_vm1, %v1710_v23 }
0x1613   :  { %2307 = vmatpush.msrb.mxu2 %v3384_v33 }
0x1615   :  { %2308 = vmatpush.msrb.mxu2 %v3389_v4 }
0x1617   :  { %2309 = vmatpush.msrb.mxu2 %v3395_v0 }
0x1619   :  { %2310 = vmatpush.msrb.mxu2 %v3401_v7 }
0x1621   :  { %v1782_v2 = vpop.permute.xlu1 %1781 }
0x1622   :  { %2688 = vmatmul.msk.f32.vlgmr.msrb.gmra.mxu3 %vm122_vm1, %v1782_v2 }
0x1623   :  { %2379 = vmatpush.msrb.mxu3 %v3447_v60 }
0x1625   :  { %2380 = vmatpush.msrb.mxu3 %v3458_v17 }
0x1627   :  { %2381 = vmatpush.msrb.mxu3 %v3470_v22 }
0x1629   :  { %2382 = vmatpush.msrb.mxu3 %v3483_v27 }
0x1695   :  { %v1730_v9 = vpop.f32.mrf.mxu2 }
0x1696   :  { %v1756_v36 = vadd.f32 %v1730_v9, %v3564_v1  ;;  %v1734_v40 = vrot.slane %v1730_v9, 4 }
0x1698   :  { %v1758_v37 = vrot.slane %v1756_v36, 4  ;;  %v1736_v16 = vadd.f32 %v1734_v40, %v3584_v30  ;;  %v1775_v36 = vrot.slane %v3648_v14, 6 }
0x169a   :  { %1759 = vrot.lane.b32.xlu2 %v1758_v37, %s2941_s3  ;;  %v2687_v42 = vmul.f32 -1.442695, %v1736_v16 }
0x169c   :  { %2843 = vpow2.f32 %v2687_v42  ;;  %v1847_v42 = vrot.slane %v3653_v34, 2 }
0x16a2   :  { %v2844_v43 = vpop.eup %2843 }
0x16a3   :  { %v1740_v44 = vadd.f32 1.0, %v2844_v43 }
0x16a5   :  { %v1802_v38 = vpop.f32.mrf.mxu3  ;;  %2845 = vrcp.f32 %v1740_v44  ;;  %v1752_v26 = vand.u32 2147483648, %v1740_v44  ;;  %vm1746_vm12 = vweird.f32 %v1740_v44  ;;  %v1750_v51 = vand.u32 2147483647, %v1740_v44 }
0x16a6   :  { %v1828_v18 = vadd.f32 %v1802_v38, %v3574_v52  ;;  %v1806_v48 = vrot.slane %v1802_v38, 6 }
0x16a7   :  { %v1753_v57 = vor.u32 1.1754944e-38, %v1752_v26  ;;  %vm1751_vm15 = vcmp.eq.f32.partialorder %v1750_v51, 8.507059e+37 }
0x16a8   :  { %v1830_v39 = vrot.slane %v1828_v18, 6  ;;  %v1808_v49 = vadd.f32 %v1806_v48, %v3598_v31 }
0x16aa   :  { %1831 = vrot.lane.b32.xlu0 %v1830_v39, %s2941_s3  ;;  %v2689_v50 = vmul.f32 -1.442695, %v1808_v49 }
0x16ab   :  { %v2846_v45 = vpop.eup %2845 }
0x16ac   :  { %v1742_v46 = vmul.f32 %v2846_v45, %v1740_v44  ;;  %vm1747_vm9 = vweird.f32 %v2846_v45  ;;  %2847 = vpow2.f32 %v2689_v50 }
0x16ad   :  { %vm1748_vm14 = vmor %vm1746_vm12, %vm1747_vm9 }
0x16ae   :  { %v1743_v47 = vsub.f32 1.0, %v1742_v46 }
0x16b0   :  { %v1744_v62 = vmul.f32 %v2846_v45, %v1743_v47 }
0x16b2   :  { %v1745_v3 = vadd.f32 %v2846_v45, %v1744_v62  ;;  %v2848_v55 = vpop.eup %2847  ;;  %v3711_v62 = vpop.f32.mrf.mxu0 }
0x16b3   :  { %v1812_v6 = vadd.f32 1.0, %v2848_v55 }
0x16b4   :  { %v1749_v54 = vsel %vm1748_vm14, %v2846_v45, %v1745_v3 }
0x16b5   :  { %v1754_v58 = vsel %vm1751_vm15, %v1753_v57, %v1749_v54  ;;  %2849 = vrcp.f32 %v1812_v6  ;;  %v1824_v10 = vand.u32 2147483648, %v1812_v6  ;;  %vm1818_vm7 = vweird.f32 %v1812_v6 }
0x16b6   :  { %v1822_v8 = vand.u32 2147483647, %v1812_v6  ;;  %v1769_v9 = vsub.f32 1.0, %v1754_v58  ;;  %v1777_v38 = vmul.f32 %v1775_v36, %v1754_v58 }
0x16b7   :  { %v1825_v11 = vor.u32 1.1754944e-38, %v1824_v10 }
0x16b8   :  { %vm1823_vm9 = vcmp.eq.f32.partialorder %v1822_v8, 8.507059e+37 }
0x16bb   :  { %v2850_v56 = vpop.eup %2849 }
0x16bc   :  { %v1814_v35 = vmul.f32 %v2850_v56, %v1812_v6  ;;  %vm1819_vm6 = vweird.f32 %v2850_v56 }
0x16bd   :  { %vm1820_vm8 = vmor %vm1818_vm7, %vm1819_vm6 }
0x16be   :  { %v1815_v12 = vsub.f32 1.0, %v1814_v35 }
0x16c0   :  { %v1816_v5 = vmul.f32 %v2850_v56, %v1815_v12 }
0x16c2   :  { %v1817_v21 = vadd.f32 %v2850_v56, %v1816_v5 }
0x16c4   :  { %v1821_v61 = vsel %vm1820_vm8, %v2850_v56, %v1817_v21 }
0x16c5   :  { %v1826_v20 = vsel %vm1823_vm9, %v1825_v11, %v1821_v61 }
0x16c6   :  { %v1841_v16 = vsub.f32 1.0, %v1826_v20  ;;  %v1849_v44 = vmul.f32 %v1847_v42, %v1826_v20 }
0x16f4   :  { %v1760_v53 = vpop.permute.xlu2 %1759 }
0x16f5   :  { %v1762_v63 = vmul.f32 %v1760_v53, %v1754_v58 }
0x16f7   :  { %1764 = vrot.lane.b32.xlu1 %v1762_v63, %s2941_s3 }
0x171c   :  { %v1832_v19 = vpop.permute.xlu0 %1831 }
0x171d   :  { %v1834_v29 = vmul.f32 %v1832_v19, %v1826_v20 }
0x171f   :  { %1836 = vrot.lane.b32.xlu2 %v1834_v29, %s2941_s3 }
0x1769   :  { %v1765_v28 = vpop.permute.xlu1 %1764 }
0x176a   :  { %v1767_v32 = vadd.f32 %v1765_v28, %v3584_v30 }
0x176c   :  { %2851 = vtanh.f32 %v1767_v32 }
0x1772   :  { %v2852_v13 = vpop.eup %2851 }
0x1773   :  { %1771 = vrot.lane.b32.xlu0 %v2852_v13, %s2943_s4 }
0x1779   :  { %v1837_v41 = vpop.permute.xlu2 %1836 }
0x177a   :  { %v1839_v23 = vadd.f32 %v1837_v41, %v3598_v31 }
0x177c   :  { %2853 = vtanh.f32 %v1839_v23 }
0x1782   :  { %v2854_v2 = vpop.eup %2853 }
0x1783   :  { %1843 = vrot.lane.b32.xlu1 %v2854_v2, %s2943_s4 }
0x17e5   :  { %v1772_v37 = vpop.permute.xlu0 %1771 }
0x17e6   :  { %v1774_v18 = vmul.f32 %v1772_v37, %v1769_v9 }
0x17e8   :  { %v3685_v39 = vadd.f32 %v1777_v38, %v1774_v18 }
0x17ea   :  { %v1857_v40 = vrot.slane %v3685_v39, 4  ;;  %v1924_v42 = vrot.slane %v3685_v39, 6 }
0x17ec   :  { %1858 = vrot.lane.b32.xlu2 %v1857_v40, %s2943_s4 }
0x17f5   :  { %v1844_v43 = vpop.permute.xlu1 %1843 }
0x17f6   :  { %v1846_v45 = vmul.f32 %v1844_v43, %v1841_v16 }
0x17f8   :  { %v3690_v46 = vadd.f32 %v1849_v44, %v1846_v45 }
0x17fa   :  { %1856 = vst.msk [vmem:[%s3918_s10 + $0x8] sm:$0xc] %vm575_vm0, %v3690_v46  ;;  %v1929_v47 = vrot.slane %v3690_v46, 2 }
0x17fc   :  { %1930 = vrot.lane.b32.xlu0 %v1929_v47, %s2943_s4 }
0x1846   :  { %v1859_v48 = vpop.permute.xlu2 %1858 }
0x1847   :  { %2690 = vmatmul.msk.f32.vlgmr.msrb.gmra.mxu0 %vm122_vm1, %v1859_v48 }
0x1848   :  { %2456 = vmatpush.msrb.mxu0 %v3384_v33 }
0x184a   :  { %2457 = vmatpush.msrb.mxu0 %v3389_v4 }
0x184c   :  { %2458 = vmatpush.msrb.mxu0 %v3395_v0 }
0x184e   :  { %2459 = vmatpush.msrb.mxu0 %v3401_v7 }
0x186e   :  { %v1931_v34 = vpop.permute.xlu0 %1930 }
0x186f   :  { %2692 = vmatmul.msk.f32.vlgmr.msrb.gmra.mxu1 %vm122_vm1, %v1931_v34 }
0x1870   :  { %2528 = vmatpush.msrb.mxu1 %v3447_v60 }
0x1872   :  { %2529 = vmatpush.msrb.mxu1 %v3458_v17 }
0x1874   :  { %2530 = vmatpush.msrb.mxu1 %v3470_v22 }
0x1876   :  { %2531 = vmatpush.msrb.mxu1 %v3483_v27 }
0x18c4   :  { %v1879_v33 = vpop.f32.mrf.mxu0 }
0x18c5   :  { %v1905_v4 = vadd.f32 %v1879_v33, %v3564_v1  ;;  %v1883_v60 = vrot.slane %v1879_v33, 2 }
0x18c7   :  { %v1907_v49 = vrot.slane %v1905_v4, 2  ;;  %v1885_v17 = vadd.f32 %v1883_v60, %v3584_v30 }
0x18c9   :  { %1908 = vrot.lane.b32.xlu1 %v1907_v49, %s2941_s3  ;;  %v2691_v3 = vmul.f32 -1.442695, %v1885_v17 }
0x18cb   :  { %2855 = vpow2.f32 %v2691_v3 }
0x18d1   :  { %v2856_v22 = vpop.eup %2855 }
0x18d2   :  { %v1889_v26 = vadd.f32 1.0, %v2856_v22  ;;  %v3751_v22 = vadd.f32 %v3581_v59, %v3711_v62 }
0x18d4   :  { %2857 = vrcp.f32 %v1889_v26  ;;  %v1901_v56 = vand.u32 2147483648, %v1889_v26  ;;  %vm1895_vm14 = vweird.f32 %v1889_v26  ;;  %v1899_v35 = vand.u32 2147483647, %v1889_v26 }
0x18d6   :  { %v1902_v21 = vor.u32 1.1754944e-38, %v1901_v56  ;;  %vm1900_vm6 = vcmp.eq.f32.partialorder %v1899_v35, 8.507059e+37 }
0x18da   :  { %v2858_v51 = vpop.eup %2857 }
0x18db   :  { %v1891_v57 = vmul.f32 %v2858_v51, %v1889_v26  ;;  %vm1896_vm12 = vweird.f32 %v2858_v51 }
0x18dc   :  { %vm1897_vm15 = vmor %vm1895_vm14, %vm1896_vm12 }
0x18dd   :  { %v1892_v53 = vsub.f32 1.0, %v1891_v57 }
0x18df   :  { %v1893_v63 = vmul.f32 %v2858_v51, %v1892_v53 }
0x18e1   :  { %v1894_v6 = vadd.f32 %v2858_v51, %v1893_v63 }
0x18e3   :  { %v1898_v5 = vsel %vm1897_vm15, %v2858_v51, %v1894_v6 }
0x18e4   :  { %v1903_v61 = vsel %vm1900_vm6, %v1902_v21, %v1898_v5  ;;  %v3757_v21 = vadd.f32 %v3595_v25, %v3590_v24 }
0x18e5   :  { %v1918_v16 = vsub.f32 1.0, %v1903_v61  ;;  %v1926_v44 = vmul.f32 %v1924_v42, %v1903_v61 }
0x18ec   :  { %v1951_v0 = vpop.f32.mrf.mxu1 }
0x18ed   :  { %v1974_v7 = vadd.f32 %v1951_v0, %v3574_v52  ;;  %v1954_v27 = vadd.f32 %v1951_v0, %v3598_v31 }
0x18ef   :  { %1976 = vrot.lane.b32.xlu2 %v1974_v7, %s2941_s3  ;;  %v2693_v50 = vmul.f32 -1.442695, %v1954_v27 }
0x18f1   :  { %2859 = vpow2.f32 %v2693_v50 }
0x18f7   :  { %v2860_v54 = vpop.eup %2859 }
0x18f8   :  { %v1958_v58 = vadd.f32 1.0, %v2860_v54 }
0x18fa   :  { %2861 = vrcp.f32 %v1958_v58  ;;  %v1970_v29 = vand.u32 2147483648, %v1958_v58  ;;  %vm1964_vm8 = vweird.f32 %v1958_v58  ;;  %v1968_v28 = vand.u32 2147483647, %v1958_v58 }
0x18fc   :  { %v1971_v13 = vor.u32 1.1754944e-38, %v1970_v29  ;;  %vm1969_vm5 = vcmp.eq.f32.partialorder %v1968_v28, 8.507059e+37 }
0x1900   :  { %v2862_v55 = vpop.eup %2861 }
0x1901   :  { %v1960_v12 = vmul.f32 %v2862_v55, %v1958_v58  ;;  %vm1965_vm7 = vweird.f32 %v2862_v55 }
0x1902   :  { %vm1966_vm9 = vmor %vm1964_vm8, %vm1965_vm7 }
0x1903   :  { %v1961_v10 = vsub.f32 1.0, %v1960_v12 }
0x1905   :  { %v1962_v19 = vmul.f32 %v2862_v55, %v1961_v10 }
0x1907   :  { %v1963_v20 = vadd.f32 %v2862_v55, %v1962_v19 }
0x1909   :  { %v1967_v32 = vsel %vm1966_vm9, %v2862_v55, %v1963_v20 }
0x190a   :  { %v1972_v41 = vsel %vm1969_vm5, %v1971_v13, %v1967_v32 }
0x190b   :  { %v1986_v34 = vsub.f32 1.0, %v1972_v41  ;;  %v1993_v33 = vmul.f32 %v1972_v41, %v1929_v47 }
0x193b   :  { %v1909_v8 = vpop.permute.xlu1 %1908 }
0x193c   :  { %v1911_v11 = vmul.f32 %v1909_v8, %v1903_v61 }
0x193e   :  { %1913 = vrot.lane.b32.xlu0 %v1911_v11, %s2941_s3 }
0x1949   :  { %v1977_v23 = vpop.permute.xlu2 %1976 }
0x194a   :  { %v1979_v2 = vmul.f32 %v1977_v23, %v1972_v41 }
0x194c   :  { %1981 = vrot.lane.b32.xlu1 %v1979_v2, %s2941_s3 }
0x19b0   :  { %v1914_v9 = vpop.permute.xlu0 %1913 }
0x19b1   :  { %v1916_v36 = vadd.f32 %v1914_v9, %v3584_v30 }
0x19b3   :  { %2863 = vtanh.f32 %v1916_v36 }
0x19b9   :  { %v2864_v37 = vpop.eup %2863 }
0x19ba   :  { %1920 = vrot.lane.b32.xlu2 %v2864_v37, %s2943_s4 }
0x19be   :  { %v1982_v38 = vpop.permute.xlu1 %1981 }
0x19bf   :  { %v1984_v18 = vadd.f32 %v1982_v38, %v3598_v31 }
0x19c1   :  { %2865 = vtanh.f32 %v1984_v18 }
0x19c7   :  { %v2866_v40 = vpop.eup %2865 }
0x19c8   :  { %1988 = vrot.lane.b32.xlu0 %v2866_v40, %s2943_s4 }
0x1a14   :  { %v1921_v43 = vpop.permute.xlu2 %1920 }
0x1a15   :  { %v1923_v45 = vmul.f32 %v1921_v43, %v1918_v16 }
0x1a17   :  { %v3726_v48 = vadd.f32 %v1926_v44, %v1923_v45 }
0x1a19   :  { %v2001_v30 = vrot.slane %v3726_v48, 6 }
0x1a1b   :  { %2002 = vrot.lane.b32.xlu2 %v2001_v30, %s2943_s4 }
0x1a3a   :  { %v1989_v31 = vpop.permute.xlu0 %1988 }
0x1a3b   :  { %v1991_v4 = vmul.f32 %v1989_v31, %v1986_v34 }
0x1a3d   :  { %v3734_v49 = vadd.f32 %v1993_v33, %v1991_v4 }
0x1a3f   :  { %2000 = vst.msk [vmem:[%s3918_s10 + $0x8] sm:$0x3] %vm721_vm13, %v3734_v49  ;;  %2068 = vrot.lane.b32.xlu1 %v3734_v49, %s2943_s4  ;;  %v2134_v33 = vrot.slane %v3734_v49, 2 }
0x1a75   :  { %v2003_v0 = vpop.permute.xlu2 %2002 }
0x1a76   :  { %2694 = vmatmul.msk.f32.vlgmr.msra.gmra.mxu2 %vm122_vm1, %v2003_v0 }
0x1ab1   :  { %v2069_v7 = vpop.permute.xlu1 %2068 }
0x1ab2   :  { %2696 = vmatmul.msk.f32.vlgmr.msra.gmra.mxu3 %vm122_vm1, %v2069_v7 }
0x1af9   :  { %v2023_v46 = vpop.f32.mrf.mxu2 }
0x1afa   :  { %v2046_v47 = vadd.f32 %v2023_v46, %v3564_v1  ;;  %v2026_v27 = vadd.f32 %v2023_v46, %v3751_v22 }
0x1afc   :  { %2048 = vrot.lane.b32.xlu0 %v2046_v47, %s2941_s3  ;;  %v2695_v26 = vmul.f32 -1.442695, %v2026_v27 }
0x1afe   :  { %2867 = vpow2.f32 %v2695_v26 }
0x1b04   :  { %v2868_v50 = vpop.eup %2867 }
0x1b05   :  { %v2030_v51 = vadd.f32 1.0, %v2868_v50 }
0x1b07   :  { %2869 = vrcp.f32 %v2030_v51  ;;  %v2042_v55 = vand.u32 2147483648, %v2030_v51  ;;  %vm2036_vm12 = vweird.f32 %v2030_v51  ;;  %v2040_v6 = vand.u32 2147483647, %v2030_v51 }
0x1b09   :  { %v2043_v59 = vor.u32 1.1754944e-38, %v2042_v55  ;;  %vm2041_vm15 = vcmp.eq.f32.partialorder %v2040_v6, 8.507059e+37 }
0x1b0d   :  { %v2870_v54 = vpop.eup %2869 }
0x1b0e   :  { %v2032_v57 = vmul.f32 %v2870_v54, %v2030_v51  ;;  %vm2037_vm5 = vweird.f32 %v2870_v54 }
0x1b0f   :  { %vm2038_vm14 = vmor %vm2036_vm12, %vm2037_vm5 }
0x1b10   :  { %v2033_v58 = vsub.f32 1.0, %v2032_v57 }
0x1b12   :  { %v2034_v53 = vmul.f32 %v2870_v54, %v2033_v58 }
0x1b14   :  { %v2035_v63 = vadd.f32 %v2870_v54, %v2034_v53 }
0x1b16   :  { %v2039_v56 = vsel %vm2038_vm14, %v2870_v54, %v2035_v63 }
0x1b17   :  { %v2044_v35 = vsel %vm2041_vm15, %v2043_v59, %v2039_v56 }
0x1b18   :  { %v2058_v42 = vsub.f32 1.0, %v2044_v35  ;;  %v2065_v44 = vmul.f32 %v2044_v35, %v2001_v30 }
0x1b35   :  { %v2089_v60 = vpop.f32.mrf.mxu3 }
0x1b36   :  { %v2115_v17 = vadd.f32 %v2089_v60, %v3574_v52  ;;  %v2093_v5 = vrot.slane %v2089_v60, 2 }
0x1b38   :  { %v2117_v3 = vrot.slane %v2115_v17, 2  ;;  %v2095_v10 = vadd.f32 %v2093_v5, %v3757_v21 }
0x1b3a   :  { %2118 = vrot.lane.b32.xlu1 %v2117_v3, %s2941_s3  ;;  %v2697_v8 = vmul.f32 -1.442695, %v2095_v10 }
0x1b3c   :  { %2871 = vpow2.f32 %v2697_v8 }
0x1b42   :  { %v2872_v61 = vpop.eup %2871 }
0x1b43   :  { %v2099_v11 = vadd.f32 1.0, %v2872_v61 }
0x1b45   :  { %2873 = vrcp.f32 %v2099_v11  ;;  %v2111_v13 = vand.u32 2147483648, %v2099_v11  ;;  %vm2105_vm7 = vweird.f32 %v2099_v11  ;;  %v2109_v41 = vand.u32 2147483647, %v2099_v11 }
0x1b47   :  { %v2112_v24 = vor.u32 1.1754944e-38, %v2111_v13  ;;  %vm2110_vm9 = vcmp.eq.f32.partialorder %v2109_v41, 8.507059e+37 }
0x1b4b   :  { %v2874_v19 = vpop.eup %2873 }
0x1b4c   :  { %v2101_v20 = vmul.f32 %v2874_v19, %v2099_v11  ;;  %vm2106_vm6 = vweird.f32 %v2874_v19 }
0x1b4d   :  { %vm2107_vm8 = vmor %vm2105_vm7, %vm2106_vm6 }
0x1b4e   :  { %v2102_v29 = vsub.f32 1.0, %v2101_v20 }
0x1b50   :  { %v2103_v28 = vmul.f32 %v2874_v19, %v2102_v29 }
0x1b52   :  { %v2104_v32 = vadd.f32 %v2874_v19, %v2103_v28 }
0x1b54   :  { %v2108_v23 = vsel %vm2107_vm8, %v2874_v19, %v2104_v32 }
0x1b55   :  { %v2113_v2 = vsel %vm2110_vm9, %v2112_v24, %v2108_v23 }
0x1b56   :  { %v2128_v31 = vsub.f32 1.0, %v2113_v2  ;;  %v2136_v0 = vmul.f32 %v2134_v33, %v2113_v2 }
0x1b6e   :  { %v2049_v62 = vpop.permute.xlu0 %2048 }
0x1b6f   :  { %v2051_v12 = vmul.f32 %v2049_v62, %v2044_v35 }
0x1b71   :  { %2053 = vrot.lane.b32.xlu2 %v2051_v12, %s2941_s3 }
0x1bac   :  { %v2119_v25 = vpop.permute.xlu1 %2118 }
0x1bad   :  { %v2121_v9 = vmul.f32 %v2119_v25, %v2113_v2 }
0x1baf   :  { %2123 = vrot.lane.b32.xlu0 %v2121_v9, %s2941_s3 }
0x1bcb   :  { %v2054_v36 = vpop.permute.xlu2 %2053 }
0x1bcc   :  { %v2056_v37 = vadd.f32 %v2054_v36, %v3751_v22 }
0x1bce   :  { %2875 = vtanh.f32 %v2056_v37 }
0x1bd4   :  { %v2876_v38 = vpop.eup %2875 }
0x1bd5   :  { %2060 = vrot.lane.b32.xlu1 %v2876_v38, %s2943_s4 }
0x1c21   :  { %v2124_v18 = vpop.permute.xlu0 %2123 }
0x1c22   :  { %v2126_v40 = vadd.f32 %v2124_v18, %v3757_v21 }
0x1c24   :  { %2877 = vtanh.f32 %v2126_v40 }
0x1c2a   :  { %v2878_v16 = vpop.eup %2877 }
0x1c2b   :  { %2130 = vrot.lane.b32.xlu2 %v2878_v16, %s2943_s4 }
0x1c47   :  { %v2061_v43 = vpop.permute.xlu1 %2060 }
0x1c48   :  { %v2063_v45 = vmul.f32 %v2061_v43, %v2058_v42 }
0x1c4a   :  { %v2066_v34 = vadd.f32 %v2065_v44, %v2063_v45 }
0x1c4c   :  { %2139 = vrot.lane.b32.xlu0 %v2066_v34, %s2943_s4  ;;  %v2208_v62 = vrot.slane %v2066_v34, 6 }
0x1c85   :  { %v2131_v4 = vpop.permute.xlu2 %2130 }
0x1c86   :  { %v2133_v7 = vmul.f32 %v2131_v4, %v2128_v31 }
0x1c88   :  { %v3769_v46 = vadd.f32 %v2136_v0, %v2133_v7 }
0x1c8a   :  { %v2213_v47 = vrot.slane %v3769_v46, 6 }
0x1c8c   :  { %2214 = vrot.lane.b32.xlu1 %v2213_v47, %s2943_s4 }
0x1cbe   :  { %v2140_v60 = vpop.permute.xlu0 %2139 }
0x1cbf   :  { %2142 = vst.msk [vmem:[%s3918_s10 + $0x8] sm:$0x3] %vm274_vm11, %v2140_v60  ;;  %2698 = vmatmul.msk.f32.vlgmr.msra.gmra.mxu0 %vm122_vm1, %v2140_v60 }
0x1cfe   :  { %v2215_v30 = vpop.permute.xlu1 %2214 }
0x1cff   :  { %2700 = vmatmul.msk.f32.vlgmr.msra.gmra.mxu1 %vm122_vm1, %v2215_v30  ;;  %v2280_v30 = vrot.slane %v3769_v46, 2 }
0x1d3c   :  { %v2163_v49 = vpop.f32.mrf.mxu0 }
0x1d3d   :  { %v2167_v17 = vrot.slane %v2163_v49, 6  ;;  %v2189_v3 = vadd.f32 %v2163_v49, %v3564_v1 }
0x1d3f   :  { %v2169_v27 = vadd.f32 %v2167_v17, %v3751_v22  ;;  %v2191_v26 = vrot.slane %v2189_v3, 6 }
0x1d41   :  { %v2699_v50 = vmul.f32 -1.442695, %v2169_v27  ;;  %2192 = vrot.lane.b32.xlu2 %v2191_v26, %s2941_s3 }
0x1d43   :  { %2879 = vpow2.f32 %v2699_v50 }
0x1d49   :  { %v2880_v51 = vpop.eup %2879 }
0x1d4a   :  { %v2173_v54 = vadd.f32 1.0, %v2880_v51 }
0x1d4c   :  { %2881 = vrcp.f32 %v2173_v54  ;;  %v2185_v63 = vand.u32 2147483648, %v2173_v54  ;;  %v2183_v6 = vand.u32 2147483647, %v2173_v54  ;;  %vm2179_vm12 = vweird.f32 %v2173_v54 }
0x1d4e   :  { %v2186_v59 = vor.u32 1.1754944e-38, %v2185_v63  ;;  %vm2184_vm15 = vcmp.eq.f32.partialorder %v2183_v6, 8.507059e+37 }
0x1d52   :  { %v2882_v57 = vpop.eup %2881 }
0x1d53   :  { %v2175_v58 = vmul.f32 %v2882_v57, %v2173_v54  ;;  %vm2180_vm5 = vweird.f32 %v2882_v57 }
0x1d54   :  { %vm2181_vm14 = vmor %vm2179_vm12, %vm2180_vm5 }
0x1d55   :  { %v2176_v53 = vsub.f32 1.0, %v2175_v58 }
0x1d57   :  { %v2177_v55 = vmul.f32 %v2882_v57, %v2176_v53 }
0x1d59   :  { %v2178_v56 = vadd.f32 %v2882_v57, %v2177_v55 }
0x1d5b   :  { %v2182_v35 = vsel %vm2181_vm14, %v2882_v57, %v2178_v56 }
0x1d5c   :  { %v2187_v12 = vsel %vm2184_vm15, %v2186_v59, %v2182_v35 }
0x1d5d   :  { %v2210_v5 = vmul.f32 %v2208_v62, %v2187_v12  ;;  %v2202_v33 = vsub.f32 1.0, %v2187_v12 }
0x1d7c   :  { %v2235_v10 = vpop.f32.mrf.mxu1 }
0x1d7d   :  { %v2261_v8 = vadd.f32 %v2235_v10, %v3574_v52  ;;  %v2239_v20 = vrot.slane %v2235_v10, 4 }
0x1d7f   :  { %v2263_v61 = vrot.slane %v2261_v8, 4  ;;  %v2241_v29 = vadd.f32 %v2239_v20, %v3757_v21 }
0x1d81   :  { %2264 = vrot.lane.b32.xlu0 %v2263_v61, %s2941_s3  ;;  %v2701_v28 = vmul.f32 -1.442695, %v2241_v29 }
0x1d83   :  { %2883 = vpow2.f32 %v2701_v28 }
0x1d89   :  { %v2884_v32 = vpop.eup %2883 }
0x1d8a   :  { %v2245_v13 = vadd.f32 1.0, %v2884_v32 }
0x1d8c   :  { %2885 = vrcp.f32 %v2245_v13  ;;  %v2257_v9 = vand.u32 2147483648, %v2245_v13  ;;  %vm2251_vm7 = vweird.f32 %v2245_v13  ;;  %v2255_v36 = vand.u32 2147483647, %v2245_v13 }
0x1d8e   :  { %v2258_v38 = vor.u32 1.1754944e-38, %v2257_v9  ;;  %vm2256_vm9 = vcmp.eq.f32.partialorder %v2255_v36, 8.507059e+37 }
0x1d92   :  { %v2886_v41 = vpop.eup %2885 }
0x1d93   :  { %v2247_v23 = vmul.f32 %v2886_v41, %v2245_v13  ;;  %vm2252_vm6 = vweird.f32 %v2886_v41 }
0x1d94   :  { %vm2253_vm8 = vmor %vm2251_vm7, %vm2252_vm6 }
0x1d95   :  { %v2248_v24 = vsub.f32 1.0, %v2247_v23 }
0x1d97   :  { %v2249_v25 = vmul.f32 %v2886_v41, %v2248_v24 }
0x1d99   :  { %v2250_v2 = vadd.f32 %v2886_v41, %v2249_v25 }
0x1d9b   :  { %v2193_v11 = vpop.permute.xlu2 %2192  ;;  %v2254_v37 = vsel %vm2253_vm8, %v2886_v41, %v2250_v2 }
0x1d9c   :  { %v2195_v19 = vmul.f32 %v2193_v11, %v2187_v12  ;;  %v2259_v40 = vsel %vm2256_vm9, %v2258_v38, %v2254_v37 }
0x1d9d   :  { %v2274_v60 = vsub.f32 1.0, %v2259_v40  ;;  %v2282_v17 = vmul.f32 %v2280_v30, %v2259_v40 }
0x1d9e   :  { %2197 = vrot.lane.b32.xlu1 %v2195_v19, %s2941_s3 }
0x1df3   :  { %v2265_v18 = vpop.permute.xlu0 %2264 }
0x1df4   :  { %v2267_v16 = vmul.f32 %v2265_v18, %v2259_v40 }
0x1df6   :  { %2269 = vrot.lane.b32.xlu2 %v2267_v16, %s2941_s3 }
0x1e10   :  { %v2198_v42 = vpop.permute.xlu1 %2197 }
0x1e11   :  { %v2200_v43 = vadd.f32 %v2198_v42, %v3751_v22 }
0x1e13   :  { %2887 = vtanh.f32 %v2200_v43 }
0x1e19   :  { %v2888_v44 = vpop.eup %2887 }
0x1e1a   :  { %2204 = vrot.lane.b32.xlu0 %v2888_v44, %s2943_s4 }
0x1e50   :  { %v2270_v45 = vpop.permute.xlu2 %2269 }
0x1e51   :  { %v2272_v34 = vadd.f32 %v2270_v45, %v3757_v21 }
0x1e53   :  { %2889 = vtanh.f32 %v2272_v34 }
0x1e59   :  { %v2890_v31 = vpop.eup %2889 }
0x1e5a   :  { %2276 = vrot.lane.b32.xlu1 %v2890_v31, %s2943_s4 }
0x1e8c   :  { %v2205_v4 = vpop.permute.xlu0 %2204 }
0x1e8d   :  { %v2207_v0 = vmul.f32 %v2205_v4, %v2202_v33 }
0x1e8f   :  { %v3791_v7 = vadd.f32 %v2210_v5, %v2207_v0 }
0x1e91   :  { %v2290_v47 = vrot.slane %v3791_v7, 2 }
0x1e93   :  { %2291 = vrot.lane.b32.xlu2 %v2290_v47, %s2943_s4 }
0x1ecc   :  { %v2277_v49 = vpop.permute.xlu1 %2276 }
0x1ecd   :  { %v2279_v3 = vmul.f32 %v2277_v49, %v2274_v60  ;;  %v2357_v49 = vrot.slane %v3791_v7, 6 }
0x1ecf   :  { %v3796_v27 = vadd.f32 %v2282_v17, %v2279_v3 }
0x1ed1   :  { %v2362_v26 = vrot.slane %v3796_v27, 4 }
0x1ed3   :  { %2363 = vrot.lane.b32.xlu0 %v2362_v26, %s2943_s4 }
0x1eed   :  { %v2292_v50 = vpop.permute.xlu2 %2291 }
0x1eee   :  { %2702 = vmatmul.msk.f32.vlgmr.msrb.gmra.mxu2 %vm122_vm1, %v2292_v50 }
0x1f45   :  { %v2364_v51 = vpop.permute.xlu0 %2363 }
0x1f46   :  { %2704 = vmatmul.msk.f32.vlgmr.msrb.gmra.mxu3 %vm122_vm1, %v2364_v51 }
0x1f71   :  { %v2312_v54 = vpop.f32.mrf.mxu2 }
0x1f72   :  { %v2338_v57 = vadd.f32 %v2312_v54, %v3564_v1  ;;  %v2316_v53 = vrot.slane %v2312_v54, 4 }
0x1f74   :  { %v2340_v58 = vrot.slane %v2338_v57, 4  ;;  %v2318_v63 = vadd.f32 %v2316_v53, %v3751_v22  ;;  %v2429_v57 = vrot.slane %v3796_v27, 2 }
0x1f76   :  { %2341 = vrot.lane.b32.xlu1 %v2340_v58, %s2941_s3  ;;  %v2703_v55 = vmul.f32 -1.442695, %v2318_v63 }
0x1f78   :  { %2891 = vpow2.f32 %v2703_v55 }
0x1f7e   :  { %v2892_v6 = vpop.eup %2891 }
0x1f7f   :  { %v2322_v56 = vadd.f32 1.0, %v2892_v6 }
0x1f81   :  { %2893 = vrcp.f32 %v2322_v56  ;;  %v2334_v11 = vand.u32 2147483648, %v2322_v56  ;;  %vm2328_vm12 = vweird.f32 %v2322_v56  ;;  %v2332_v19 = vand.u32 2147483647, %v2322_v56 }
0x1f83   :  { %v2335_v29 = vor.u32 1.1754944e-38, %v2334_v11  ;;  %vm2333_vm15 = vcmp.eq.f32.partialorder %v2332_v19, 8.507059e+37 }
0x1f87   :  { %v2894_v12 = vpop.eup %2893 }
0x1f88   :  { %v2324_v5 = vmul.f32 %v2894_v12, %v2322_v56  ;;  %vm2329_vm5 = vweird.f32 %v2894_v12 }
0x1f89   :  { %vm2330_vm14 = vmor %vm2328_vm12, %vm2329_vm5 }
0x1f8a   :  { %v2325_v10 = vsub.f32 1.0, %v2324_v5 }
0x1f8c   :  { %v2326_v8 = vmul.f32 %v2894_v12, %v2325_v10 }
0x1f8e   :  { %v2327_v61 = vadd.f32 %v2894_v12, %v2326_v8 }
0x1f90   :  { %v2331_v20 = vsel %vm2330_vm14, %v2894_v12, %v2327_v61 }
0x1f91   :  { %v2336_v32 = vsel %vm2333_vm15, %v2335_v29, %v2331_v20 }
0x1f92   :  { %v2351_v30 = vsub.f32 1.0, %v2336_v32  ;;  %v2359_v3 = vmul.f32 %v2357_v49, %v2336_v32 }
0x1fc9   :  { %v2384_v59 = vpop.f32.mrf.mxu3 }
0x1fca   :  { %v2410_v62 = vadd.f32 %v2384_v59, %v3574_v52  ;;  %v2388_v41 = vrot.slane %v2384_v59, 6 }
0x1fcc   :  { %v2412_v35 = vrot.slane %v2410_v62, 6  ;;  %v2390_v23 = vadd.f32 %v2388_v41, %v3757_v21 }
0x1fce   :  { %2413 = vrot.lane.b32.xlu2 %v2412_v35, %s2941_s3  ;;  %v2705_v24 = vmul.f32 -1.442695, %v2390_v23 }
0x1fd0   :  { %2895 = vpow2.f32 %v2705_v24 }
0x1fd6   :  { %v2896_v25 = vpop.eup %2895 }
0x1fd7   :  { %v2394_v2 = vadd.f32 1.0, %v2896_v25 }
0x1fd9   :  { %2897 = vrcp.f32 %v2394_v2  ;;  %v2406_v40 = vand.u32 2147483648, %v2394_v2  ;;  %vm2400_vm7 = vweird.f32 %v2394_v2  ;;  %v2404_v16 = vand.u32 2147483647, %v2394_v2 }
0x1fdb   :  { %v2407_v43 = vor.u32 1.1754944e-38, %v2406_v40  ;;  %vm2405_vm9 = vcmp.eq.f32.partialorder %v2404_v16, 8.507059e+37 }
0x1fdf   :  { %v2898_v9 = vpop.eup %2897 }
0x1fe0   :  { %v2396_v36 = vmul.f32 %v2898_v9, %v2394_v2  ;;  %vm2401_vm6 = vweird.f32 %v2898_v9 }
0x1fe1   :  { %vm2402_vm8 = vmor %vm2400_vm7, %vm2401_vm6 }
0x1fe2   :  { %v2397_v37 = vsub.f32 1.0, %v2396_v36 }
0x1fe4   :  { %v2398_v38 = vmul.f32 %v2898_v9, %v2397_v37 }
0x1fe6   :  { %v2399_v18 = vadd.f32 %v2898_v9, %v2398_v38 }
0x1fe8   :  { %v2342_v28 = vpop.permute.xlu1 %2341  ;;  %v2403_v42 = vsel %vm2402_vm8, %v2898_v9, %v2399_v18 }
0x1fe9   :  { %v2344_v13 = vmul.f32 %v2342_v28, %v2336_v32  ;;  %v2408_v44 = vsel %vm2405_vm9, %v2407_v43, %v2403_v42 }
0x1fea   :  { %v2423_v54 = vsub.f32 1.0, %v2408_v44  ;;  %v2431_v53 = vmul.f32 %v2429_v57, %v2408_v44 }
0x1feb   :  { %2346 = vrot.lane.b32.xlu0 %v2344_v13, %s2941_s3 }
0x2028   :  { %v2414_v45 = vpop.permute.xlu2 %2413 }
0x2029   :  { %v2416_v34 = vmul.f32 %v2414_v45, %v2408_v44 }
0x202b   :  { %2418 = vrot.lane.b32.xlu1 %v2416_v34, %s2941_s3 }
0x205d   :  { %v2347_v31 = vpop.permute.xlu0 %2346 }
0x205e   :  { %v2349_v33 = vadd.f32 %v2347_v31, %v3751_v22 }
0x2060   :  { %2899 = vtanh.f32 %v2349_v33 }
0x2066   :  { %v2900_v4 = vpop.eup %2899 }
0x2067   :  { %2353 = vrot.lane.b32.xlu2 %v2900_v4, %s2943_s4 }
0x209d   :  { %v2419_v0 = vpop.permute.xlu1 %2418 }
0x209e   :  { %v2421_v47 = vadd.f32 %v2419_v0, %v3757_v21 }
0x20a0   :  { %2901 = vtanh.f32 %v2421_v47 }
0x20a6   :  { %v2902_v60 = vpop.eup %2901 }
0x20a7   :  { %2425 = vrot.lane.b32.xlu0 %v2902_v60, %s2943_s4 }
0x20c1   :  { %v2354_v17 = vpop.permute.xlu2 %2353 }
0x20c2   :  { %v2356_v26 = vmul.f32 %v2354_v17, %v2351_v30 }
0x20c4   :  { %v3815_v50 = vadd.f32 %v2359_v3, %v2356_v26 }
0x20c6   :  { %v2439_v51 = vrot.slane %v3815_v50, 4 }
0x20c8   :  { %2440 = vrot.lane.b32.xlu1 %v2439_v51, %s2943_s4 }
0x2119   :  { %v2426_v58 = vpop.permute.xlu0 %2425 }
0x211a   :  { %v2428_v63 = vmul.f32 %v2426_v58, %v2423_v54 }
0x211c   :  { %v3820_v55 = vadd.f32 %v2431_v53, %v2428_v63 }
0x211e   :  { %v2511_v6 = vrot.slane %v3820_v55, 2 }
0x2120   :  { %2512 = vrot.lane.b32.xlu2 %v2511_v6, %s2943_s4 }
0x213a   :  { %v2441_v56 = vpop.permute.xlu1 %2440 }
0x213b   :  { %2706 = vmatmul.msk.f32.vlgmr.msrb.gmra.mxu0 %vm122_vm1, %v2441_v56 }
0x217a   :  { %v2513_v59 = vpop.permute.xlu2 %2512 }
0x217b   :  { %2708 = vmatmul.msk.f32.vlgmr.msrb.gmra.mxu1 %vm122_vm1, %v2513_v59 }
0x21b8   :  { %v2461_v62 = vpop.f32.mrf.mxu0 }
0x21b9   :  { %v2487_v35 = vadd.f32 %v2461_v62, %v3564_v1  ;;  %v2465_v8 = vrot.slane %v2461_v62, 2 }
0x21bb   :  { %v2489_v12 = vrot.slane %v2487_v35, 2  ;;  %v2467_v61 = vadd.f32 %v2465_v8, %v3751_v22 }
0x21bd   :  { %2490 = vrot.lane.b32.xlu0 %v2489_v12, %s2941_s3  ;;  %v2707_v11 = vmul.f32 -1.442695, %v2467_v61 }
0x21bf   :  { %2903 = vpow2.f32 %v2707_v11 }
0x21c5   :  { %v2904_v19 = vpop.eup %2903 }
0x21c6   :  { %v2471_v20 = vadd.f32 1.0, %v2904_v19 }
0x21c8   :  { %2905 = vrcp.f32 %v2471_v20  ;;  %v2483_v41 = vand.u32 2147483648, %v2471_v20  ;;  %vm2477_vm5 = vweird.f32 %v2471_v20  ;;  %v2481_v23 = vand.u32 2147483647, %v2471_v20 }
0x21ca   :  { %v2484_v24 = vor.u32 1.1754944e-38, %v2483_v41  ;;  %vm2482_vm14 = vcmp.eq.f32.partialorder %v2481_v23, 8.507059e+37 }
0x21ce   :  { %v2906_v29 = vpop.eup %2905 }
0x21cf   :  { %v2473_v28 = vmul.f32 %v2906_v29, %v2471_v20  ;;  %vm2478_vm1 = vweird.f32 %v2906_v29 }
0x21d0   :  { %vm2479_vm12 = vmor %vm2477_vm5, %vm2478_vm1 }
0x21d1   :  { %v2474_v32 = vsub.f32 1.0, %v2473_v28 }
0x21d3   :  { %v2475_v1 = vmul.f32 %v2906_v29, %v2474_v32 }
0x21d5   :  { %v2476_v13 = vadd.f32 %v2906_v29, %v2475_v1 }
0x21f8   :  { %v2533_v5 = vpop.f32.mrf.mxu1 }
0x21f9   :  { %v2556_v10 = vadd.f32 %v2533_v5, %v3574_v52  ;;  %v2480_v52 = vsel %vm2479_vm12, %v2906_v29, %v2476_v13  ;;  %v2536_v36 = vadd.f32 %v2533_v5, %v3757_v21 }
0x21fa   :  { %v2485_v2 = vsel %vm2482_vm14, %v2484_v24, %v2480_v52 }
0x21fb   :  { %2558 = vrot.lane.b32.xlu1 %v2556_v10, %s2941_s3  ;;  %v2709_v37 = vmul.f32 -1.442695, %v2536_v36 }
0x21fd   :  { %2907 = vpow2.f32 %v2709_v37 }
0x2203   :  { %v2908_v38 = vpop.eup %2907 }
0x2204   :  { %v2540_v18 = vadd.f32 1.0, %v2908_v38 }
0x2206   :  { %2909 = vrcp.f32 %v2540_v18  ;;  %v2552_v45 = vand.u32 2147483648, %v2540_v18  ;;  %vm2546_vm6 = vweird.f32 %v2540_v18  ;;  %v2550_v34 = vand.u32 2147483647, %v2540_v18 }
0x2208   :  { %v2553_v33 = vor.u32 1.1754944e-38, %v2552_v45  ;;  %vm2551_vm8 = vcmp.eq.f32.partialorder %v2550_v34, 8.507059e+37 }
0x220c   :  { %v2910_v40 = vpop.eup %2909 }
0x220d   :  { %v2542_v16 = vmul.f32 %v2910_v40, %v2540_v18  ;;  %vm2547_vm15 = vweird.f32 %v2910_v40 }
0x220e   :  { %vm2548_vm7 = vmor %vm2546_vm6, %vm2547_vm15 }
0x220f   :  { %v2543_v42 = vsub.f32 1.0, %v2542_v16 }
0x2211   :  { %v2544_v43 = vmul.f32 %v2910_v40, %v2543_v42 }
0x2213   :  { %v2545_v44 = vadd.f32 %v2910_v40, %v2544_v43 }
0x2215   :  { %v2549_v31 = vsel %vm2548_vm7, %v2910_v40, %v2545_v44 }
0x2216   :  { %v2554_v0 = vsel %vm2551_vm8, %v2553_v33, %v2549_v31 }
0x2217   :  { %v2575_v53 = vmul.f32 %v2554_v0, %v2511_v6 }
0x222f   :  { %v2491_v25 = vpop.permute.xlu0 %2490 }
0x2230   :  { %v2493_v9 = vmul.f32 %v2491_v25, %v2485_v2 }
0x2232   :  { %2495 = vrot.lane.b32.xlu2 %v2493_v9, %s2941_s3 }
0x226d   :  { %v2559_v4 = vpop.permute.xlu1 %2558 }
0x226e   :  { %v2561_v47 = vmul.f32 %v2559_v4, %v2554_v0 }
0x2270   :  { %2563 = vrot.lane.b32.xlu0 %v2561_v47, %s2941_s3 }
0x2278   :  { %1307 = vrot.lane.b32.xlu0 %v3526_v15, %s2943_s4 }
0x2280   :  { %1996 = vrot.lane.b32.xlu0 %v3726_v48, %s2943_s4 }
0x2288   :  { %2285 = vrot.lane.b32.xlu0 %v3791_v7, %s2943_s4 }
0x228c   :  { %v2496_v60 = vpop.permute.xlu2 %2495 }
0x228d   :  { %v2498_v30 = vadd.f32 %v2496_v60, %v3751_v22  ;;  %v2500_v22 = vsub.f32 1.0, %v2485_v2 }
0x228f   :  { %2911 = vtanh.f32 %v2498_v30 }
0x2295   :  { %v2912_v49 = vpop.eup %2911 }
0x2296   :  { %2502 = vrot.lane.b32.xlu1 %v2912_v49, %s2943_s4 }
0x229e   :  { %1703 = vrot.lane.b32.xlu1 %v3648_v14, %s2943_s4 }
0x22e2   :  { %v2564_v17 = vpop.permute.xlu0 %2563 }
0x22e3   :  { %v2566_v3 = vadd.f32 %v2564_v17, %v3757_v21  ;;  %v2506_v21 = vrot.slane %v3815_v50, 6 }
0x22e5   :  { %2913 = vtanh.f32 %v2566_v3  ;;  %v2508_v51 = vmul.f32 %v2506_v21, %v2485_v2 }
0x22ea   :  { %v1308_v15 = vpop.permute.xlu0 %1307 }
0x22eb   :  { %v2914_v26 = vpop.eup %2913  ;;  %1311 = vst.msk [vmem:[#allocation3 + $0x2] sm:$0x3] %vm274_vm11, %v1308_v15 }
0x22ec   :  { %2570 = vrot.lane.b32.xlu2 %v2914_v26, %s2943_s4 }
0x22f2   :  { %v1997_v48 = vpop.permute.xlu0 %1996 }
0x22f3   :  { %1999 = vst.msk [vmem:[%s3918_s10] sm:$0xc0] %vm719_vm3, %v1997_v48 }
0x22f4   :  { %2143 = vst.msk [vmem:[%s3918_s10] sm:$0xc0] %vm276_vm10, %v3769_v46  ;;  %1852 = vrot.lane.b32.xlu2 %v3685_v39, %s2943_s4  ;;  %v2568_v39 = vsub.f32 1.0, %v2554_v0  ;;  %vm3921_vm10 = vcmask 521476  }
0x22fa   :  { %v2286_v14 = vpop.permute.xlu0 %2285 }
0x22fb   :  { %2288 = vst.msk [vmem:[%s3918_s10 + $0x8] sm:$0xc] %vm422_vm2, %v2286_v14 }
0x2308   :  { %v2503_v7 = vpop.permute.xlu1 %2502 }
0x2309   :  { %v2505_v54 = vmul.f32 %v2503_v7, %v2500_v22 }
0x230b   :  { %v2509_v57 = vadd.f32 %v2508_v51, %v2505_v54 }
0x230d   :  { %2578 = vrot.lane.b32.xlu1 %v2509_v57, %s2943_s4 }
0x2310   :  { %v1704_v58 = vpop.permute.xlu1 %1703 }
0x2311   :  { %1706 = vst.msk [vmem:[%s3918_s10] sm:$0xc] %vm422_vm2, %v1704_v58 }
0x2312   :  { %2438 = vst.msk [vmem:[%s3918_s10] sm:$0xc] %vm575_vm0, %v3820_v55 }
0x2315   :  { %2434 = vrot.lane.b32.xlu1 %v3815_v50, %s2943_s4 }
0x2346   :  { %v2571_v46 = vpop.permute.xlu2 %2570 }
0x2347   :  { %v2573_v63 = vmul.f32 %v2571_v46, %v2568_v39 }
0x2349   :  { %v2576_v56 = vadd.f32 %v2575_v53, %v2573_v63 }
0x234b   :  { %2582 = vst.msk [vmem:[%s3918_s10] sm:$0x3] %vm721_vm13, %v2576_v56  ;;  %2586 = vrot.lane.b32.xlu2 %v2576_v56, %s2943_s4 }
0x234e   :  { %v1853_v59 = vpop.permute.xlu2 %1852 }
0x234f   :  { %1855 = vst.msk [vmem:[%s3918_s10] sm:$0x30] %vm573_vm4, %v1853_v59 }
0x2350   :  { %2289 = vst.msk [vmem:[%s3918_s10] sm:$0x30] %vm3921_vm10, %v3796_v27 }
0x237f   :  { %v2579_v50 = vpop.permute.xlu1 %2578 }
0x2380   :  { %2581 = vst.msk [vmem:[%s3918_s10 + $0x8] sm:$0xc0] %vm719_vm3, %v2579_v50 }
0x2381   :  { %2584 = vst.msk [vmem:[#allocation3 - $0x2] sm:$0xc0] %vm719_vm3, %v2579_v50 }
0x2387   :  { %v2435_v55 = vpop.permute.xlu1 %2434 }
0x2388   :  { %2437 = vst.msk [vmem:[%s3918_s10 + $0x8] sm:$0x30] %vm573_vm4, %v2435_v55 }
0x23a5   :  { %v2587_v27 = vpop.permute.xlu2 %2586 }
0x23a6   :  { %2590 = vst.msk [vmem:[#allocation3 + $0x6] sm:$0x3] %vm274_vm11, %v2587_v27 }
0x23a7   :  { %2605 = dma.vmem_to_hbm [thread:$0]  %s2598_s13, 128, %s2600_s17, [#allocation4], %s2942_s14, %s2942_s14, %s2945_s18  }
0x23a8   :  { %2939 = dma.done.wait [#allocation4], 128  }
0x23a9   :  { %2940 = vsyncadd [#allocation4], 4294967168 }
0x23aa   :  { %2612 = vsyncpa [#allocation4], 1 }

</bundles_post_ra>
